<compile_context>
chip_gen: v7x
topology: tpu7x:2x2x1
jax: 0.10.0
libtpu: 0.0.40
codegen_flags: <defaults>
</compile_context>

<pallas_src>
import functools

import jax
import jax.numpy as jnp
import numpy as np
from jax import lax
from jax.experimental import pallas as pl
from jax.experimental.pallas import tpu as pltpu


def _round_up(x, m):
    return ((x + m - 1) // m) * m


# ----------------------------------------------------------------------------
# LSTM recurrence kernel, time-chunked.
#   grid = (batch_chunks, time_chunks), dims ("parallel", "arbitrary").
#   1) gates_x for the whole chunk in ONE MXU-filling matmul -> bf16 scratch.
#   2) fully unrolled static time loop: only h @ W_hh is serialized; per-step
#      h is stored batch-major with a static size-1 slice on the time dim.
#   3) one whole-block padding mask after the loop.
# ----------------------------------------------------------------------------
def _lstm_kernel(x_ref, lens_ref, w_ih_ref, w_hh_ref, b_ref, out_ref,
                 gx_ref, h_ref, c_ref, *, ts, bc, hidden, embed):
    H = hidden
    t_chunk = pl.program_id(1)

    # h/c persist across grid steps along the inner "arbitrary" time axis;
    # reset at the start of each batch chunk's time sweep.
    @pl.when(t_chunk == 0)
    def _():
        h_ref[...] = jnp.zeros_like(h_ref)
        c_ref[...] = jnp.zeros_like(c_ref)

    # Hoisted input projection for this chunk:
    #   (ts*bc, E) bf16 @ (E, 4H) bf16 -> f32 (+bias) -> bf16 scratch.
    # The (ts, bc, E) -> (ts*bc, E) collapse is done on an f32 value (bc is a
    # multiple of 8) so it is a pure vreg restack; bf16 cast follows.
    x = x_ref[...].astype(jnp.float32).reshape(ts * bc, embed)
    gx_ref[...] = (
        jnp.dot(x.astype(jnp.bfloat16), w_ih_ref[...],
                preferred_element_type=jnp.float32)
        + b_ref[...]).astype(gx_ref.dtype)

    w_hh = w_hh_ref[...]            # (H, 4H) bf16, resident across the chunk
    h = h_ref[...]                  # (bc, H) f32
    c = c_ref[...]                  # (bc, H) f32

    # Fully unrolled static time loop (ts <= 32): only h @ W_hh sits on the
    # recurrent dependency chain; gate math stays in f32 (v5e-safe).
    # TODO(synk): W_hh could be held in the MXU across steps with
    # pltpu.matmul_push_rhs/acc_lhs; plain jnp.dot kept for portability.
    for tl in range(ts):
        gates = (gx_ref[pl.ds(tl * bc, bc), :].astype(jnp.float32)
                 + jnp.dot(h.astype(w_hh.dtype), w_hh,
                           preferred_element_type=jnp.float32))
        # PyTorch gate order [i, f, g, o].
        i_g = jax.nn.sigmoid(gates[:, 0 * H:1 * H])
        f_g = jax.nn.sigmoid(gates[:, 1 * H:2 * H])
        g_g = jnp.tanh(gates[:, 2 * H:3 * H])
        o_g = jax.nn.sigmoid(gates[:, 3 * H:4 * H])
        c = f_g * c + i_g * g_g
        h = o_g * jnp.tanh(c)
        # Batch-major output block: static size-1 slice on the time dim, so no
        # XLA transpose of the (B, S, H) activation is needed afterwards.
        out_ref[:, pl.ds(tl, 1), :] = h[:, None, :].astype(out_ref.dtype)

    h_ref[...] = h
    c_ref[...] = c

    # pack_padded / pad_packed semantics: zero outputs at padded positions.
    # One whole-block mask per chunk, outside the serial loop.
    t0 = t_chunk * ts
    tpos = t0 + lax.broadcasted_iota(jnp.int32, (bc, ts, H), 1)
    lens = lens_ref[...].reshape(bc, 1, 1)
    vals = out_ref[...]
    out_ref[...] = jnp.where(tpos < lens, vals, jnp.zeros_like(vals))


def lstm_recurrence_pallas(x_tm, lens, w_ih_t, w_hh_t, bias):
    """x_tm: (S, B, E) bf16 time-major, S % 8 == 0, B % 8 == 0.

    Returns batch-major (B, S, H) bf16 outputs (padded timesteps zeroed).
    """
    S, B, E = x_tm.shape
    H4 = w_ih_t.shape[1]
    H = H4 // 4
    assert S % 8 == 0 and B % 8 == 0

    # Time-chunk size: bounds per-buffer VMEM to O(ts) and enables pipelining.
    ts = 8
    for cand in (32, 16):
        if S % cand == 0 and S // cand >= 2:
            ts = cand
            break
    nt = S // ts

    # Batch chunks: leading "parallel" axis so v7x's two TensorCores each run
    # half of the (independent) sequences.  Single chunk for small batches.
    if B % 16 == 0:
        bc, nb = B // 2, 2
    else:
        bc, nb = B, 1

    lens2d = lens.reshape(B, 1).astype(jnp.int32)
    bias2d = bias.reshape(1, H4).astype(jnp.float32)

    kernel = functools.partial(_lstm_kernel, ts=ts, bc=bc, hidden=H, embed=E)
    return pl.pallas_call(
        kernel,
        out_shape=jax.ShapeDtypeStruct((B, S, H), jnp.bfloat16),
        grid_spec=pltpu.PrefetchScalarGridSpec(
            num_scalar_prefetch=0,
            grid=(nb, nt),
            in_specs=[
                pl.BlockSpec((ts, bc, E), lambda bi, ti: (ti, bi, 0)),  # x chunk
                pl.BlockSpec((bc, 1), lambda bi, ti: (bi, 0)),          # lengths
                pl.BlockSpec((E, H4), lambda bi, ti: (0, 0)),           # W_ih^T
                pl.BlockSpec((H, H4), lambda bi, ti: (0, 0)),           # W_hh^T
                pl.BlockSpec((1, H4), lambda bi, ti: (0, 0)),           # bias
            ],
            out_specs=pl.BlockSpec((bc, ts, H), lambda bi, ti: (bi, ti, 0)),
            scratch_shapes=[
                pltpu.VMEM((ts * bc, H4), jnp.bfloat16),   # hoisted gates_x
                pltpu.VMEM((bc, H), jnp.float32),          # h carry
                pltpu.VMEM((bc, H), jnp.float32),          # c carry
            ],
        ),
        compiler_params=pltpu.CompilerParams(
            dimension_semantics=("parallel", "arbitrary")),
    )(x_tm, lens2d, w_ih_t, w_hh_t, bias2d)


# ----------------------------------------------------------------------------
# Final linear projection: tiled (tm, H) @ (H, tn) + bias -> (tm, tn) f32.
# Odd vocab sizes are zero-padded to a tile multiple (never a full-V block).
# ----------------------------------------------------------------------------
def _ff_kernel(x_ref, w_ref, b_ref, o_ref):
    o_ref[...] = (jnp.dot(x_ref[...], w_ref[...],
                          preferred_element_type=jnp.float32)
                  + b_ref[...]).astype(o_ref.dtype)


def ff_pallas(x2d, w_t, bias, *, tm=256, tn=1024):
    M, H = x2d.shape
    V = w_t.shape[1]
    tm = min(tm, _round_up(M, 8))
    tn = min(tn, _round_up(V, 128))
    Mp = _round_up(M, tm)
    Vp = _round_up(V, tn)
    if Mp != M:
        x2d = jnp.pad(x2d, ((0, Mp - M), (0, 0)))
    if Vp != V:
        w_t = jnp.pad(w_t, ((0, 0), (0, Vp - V)))
        bias = jnp.pad(bias, (0, Vp - V))
    bias2d = bias.reshape(1, Vp).astype(jnp.float32)

    out = pl.pallas_call(
        _ff_kernel,
        out_shape=jax.ShapeDtypeStruct((Mp, Vp), jnp.float32),
        grid_spec=pltpu.PrefetchScalarGridSpec(
            num_scalar_prefetch=0,
            grid=(Mp // tm, Vp // tn),
            in_specs=[
                pl.BlockSpec((tm, H), lambda i, j: (i, 0)),
                pl.BlockSpec((H, tn), lambda i, j: (0, j)),
                pl.BlockSpec((1, tn), lambda i, j: (0, j)),
            ],
            out_specs=pl.BlockSpec((tm, tn), lambda i, j: (i, j)),
        ),
        compiler_params=pltpu.CompilerParams(
            dimension_semantics=("parallel", "parallel")),
    )(x2d, w_t, bias2d)
    if Mp != M or Vp != V:
        out = out[:M, :V]
    return out


# ----------------------------------------------------------------------------
# Full model wrapper (mirrors LSTM.forward)
# ----------------------------------------------------------------------------
def lstm_lm_forward(params, input_ids, input_lens, *, s_out=None):
    """Returns (logits (B * s_out, V), lengths).  s_out = max(input_lens)."""
    B, S = input_ids.shape
    H = params["w_hh_t"].shape[0]
    if s_out is None:
        # pad_packed_sequence pads to max(input_lens); pass s_out explicitly
        # (static) to keep this wrapper jit-traceable.
        s_out = int(np.asarray(input_lens).max())

    B_pad = _round_up(B, 8)
    S_pad = _round_up(S, 8)

    # dropout_prob = 0.0 -> identity.  Gather straight from the bf16 table in
    # time-major order (row = (t, b)), matching the kernel's x layout.
    ids_tm = jnp.transpose(input_ids).astype(jnp.int32)              # (S, B)
    x_tm = jnp.take(params["embeddings_bf16"], ids_tm, axis=0)       # (S, B, E)
    if S_pad != S or B_pad != B:
        x_tm = jnp.pad(x_tm, ((0, S_pad - S), (0, B_pad - B), (0, 0)))
    lens_pad = input_lens.astype(jnp.int32)
    if B_pad != B:
        lens_pad = jnp.pad(lens_pad, (0, B_pad - B))

    lstm_out = lstm_recurrence_pallas(
        x_tm, lens_pad,
        params["w_ih_t_bf16"], params["w_hh_t_bf16"],
        params["lstm_bias"])                                         # (B_pad, S_pad, H) bf16

    # Batch-major output: rows are already in (b, t) order -> free reshape.
    x2d = lstm_out[:B, :s_out, :].reshape(B * s_out, H)
    logits = ff_pallas(x2d, params["w_ff_t_bf16"], params["b_ff"])

    # TODO(synk): final (h_n, c_n) with pack_padded semantics is not emitted;
    # the torch forward returns the pad_packed lengths, not the LSTM state.
    return logits, input_lens


# ----------------------------------------------------------------------------
# Deterministic parameter init (xavier_normal_ for weights, zeros for biases)
# ----------------------------------------------------------------------------
def init_params(key, vocab_size, embed_dim, lstm_dim):
    k_emb, k_ih, k_hh, k_ff = jax.random.split(key, 4)
    V, E, H = vocab_size, embed_dim, lstm_dim

    def xavier(k, shape):  # shape = (fan_out, fan_in) torch convention
        fan_out, fan_in = shape
        std = np.sqrt(2.0 / (fan_in + fan_out))
        return jax.random.normal(k, shape, jnp.float32) * std

    embeddings = jax.random.normal(k_emb, (V, E), jnp.float32) * 0.1
    w_ih = xavier(k_ih, (4 * H, E))       # torch weight_ih_l0
    w_hh = xavier(k_hh, (4 * H, H))       # torch weight_hh_l0
    b_ih = jnp.zeros((4 * H,), jnp.float32)
    b_hh = jnp.zeros((4 * H,), jnp.float32)
    w_ff = xavier(k_ff, (V, H))           # torch Linear weight
    b_ff = jnp.zeros((V,), jnp.float32)

    w_ih_t = jnp.transpose(w_ih)          # (E, 4H)
    w_hh_t = jnp.transpose(w_hh)          # (H, 4H)
    w_ff_t = jnp.transpose(w_ff)          # (H, V)

    return {
        # f32 masters (used by the pure-JAX reference)
        "embeddings": embeddings,
        "w_ih_t": w_ih_t,
        "w_hh_t": w_hh_t,
        "lstm_bias": b_ih + b_hh,          # (4H,)
        "w_ff_t": w_ff_t,
        "b_ff": b_ff,
        # bf16 copies prepared once (halve gather / weight-stream HBM traffic)
        "embeddings_bf16": embeddings.astype(jnp.bfloat16),
        "w_ih_t_bf16": w_ih_t.astype(jnp.bfloat16),
        "w_hh_t_bf16": w_hh_t.astype(jnp.bfloat16),
        "w_ff_t_bf16": w_ff_t.astype(jnp.bfloat16),
    }


# ----------------------------------------------------------------------------
# Pure-JAX f32 reference (correctness check)
# ----------------------------------------------------------------------------
def reference_forward(params, input_ids, input_lens):
    emb = params["embeddings"]
    embeds = jnp.take(emb, input_ids, axis=0)
    B, S, E = embeds.shape
    H = params["w_hh_t"].shape[0]

    def step(carry, x_t):
        h, c = carry
        gates = x_t @ params["w_ih_t"] + h @ params["w_hh_t"] + params["lstm_bias"]
        i = jax.nn.sigmoid(gates[:, 0 * H:1 * H])
        f = jax.nn.sigmoid(gates[:, 1 * H:2 * H])
        g = jnp.tanh(gates[:, 2 * H:3 * H])
        o = jax.nn.sigmoid(gates[:, 3 * H:4 * H])
        c = f * c + i * g
        h = o * jnp.tanh(c)
        return (h, c), h

    x_tm = jnp.transpose(embeds, (1, 0, 2))
    (_, _), hs = jax.lax.scan(step, (jnp.zeros((B, H)), jnp.zeros((B, H))), x_tm)
    hs = jnp.transpose(hs, (1, 0, 2))                       # (B, S, H)
    mask = (jnp.arange(S)[None, :] < input_lens[:, None])[..., None]
    hs = jnp.where(mask, hs, 0.0)
    s_out = int(np.asarray(input_lens).max())
    hs = hs[:, :s_out, :]
    logits = hs.reshape(-1, H) @ params["w_ff_t"] + params["b_ff"]
    return logits


if __name__ == "__main__":
    V, E, H = 256, 128, 128   # vocab, embed dim, lstm_dim
    B, S = 8, 16              # batch, max sequence length

    key = jax.random.PRNGKey(0)
    k_params, k_ids = jax.random.split(key)
    params = init_params(k_params, V, E, H)

    input_ids = jax.random.randint(k_ids, (B, S), 0, V, dtype=jnp.int32)
    input_lens = jnp.array([16, 12, 16, 8, 5, 16, 9, 3], dtype=jnp.int32)
    s_out = int(np.asarray(input_lens).max())

    logits, lengths = lstm_lm_forward(params, input_ids, input_lens, s_out=s_out)
    logits = jax.block_until_ready(logits)

    ref = reference_forward(params, input_ids, input_lens)
    np.testing.assert_allclose(np.asarray(logits), np.asarray(ref),
                               rtol=2e-2, atol=2e-2)

    assert logits.shape == (B * s_out, V)
    print("KERNEL_OK")
</pallas_src>

<mosaic_0001>
module attributes {stable_mosaic.version = 11 : i64} {
  func.func @_lstm_kernel(%arg0: i32, %arg1: i32, %arg2: memref<8x8x128xbf16, #tpu.memory_space<vmem>>, %arg3: memref<8x1xi32, #tpu.memory_space<vmem>>, %arg4: memref<128x512xbf16, #tpu.memory_space<vmem>>, %arg5: memref<128x512xbf16, #tpu.memory_space<vmem>>, %arg6: memref<1x512xf32, #tpu.memory_space<vmem>>, %arg7: memref<8x8x128xbf16, #tpu.memory_space<vmem>>, %arg8: memref<64x512xbf16, #tpu.memory_space<vmem>>, %arg9: memref<8x128xf32, #tpu.memory_space<vmem>>, %arg10: memref<8x128xf32, #tpu.memory_space<vmem>>) attributes {dimension_semantics = [#tpu.dimension_semantics<parallel>, #tpu.dimension_semantics<arbitrary>], iteration_bounds = array<i64: 1, 2>, scalar_prefetch = 0 : i64, scratch_operands = 3 : i64, tpu.core_type = #tpu.core_type<tc>, window_params = [{transform_indices = @transform_0, window_bounds = array<i64: 8, 8, 128>}, {transform_indices = @transform_1, window_bounds = array<i64: 8, 1>}, {pipeline_mode = #tpu.pipeline_mode<synchronous>, transform_indices = @transform_2, window_bounds = array<i64: 128, 512>}, {pipeline_mode = #tpu.pipeline_mode<synchronous>, transform_indices = @transform_3, window_bounds = array<i64: 128, 512>}, {pipeline_mode = #tpu.pipeline_mode<synchronous>, transform_indices = @transform_4, window_bounds = array<i64: 1, 512>}, {transform_indices = @transform_5, window_bounds = array<i64: 8, 8, 128>}]} {
    %c0_i32 = arith.constant 0 : i32
    %0 = arith.cmpi eq, %arg1, %c0_i32 : i32
    %1 = arith.extui %0 : i1 to i32
    %c0_i32_0 = arith.constant 0 : i32
    %2 = arith.cmpi ne, %1, %c0_i32_0 : i32
    scf.if %2 {
      %cst_86 = arith.constant 0.000000e+00 : f32
      %295 = vector.broadcast %cst_86 : f32 to vector<8x128xf32>
      %c0_87 = arith.constant 0 : index
      %c0_88 = arith.constant 0 : index
      %296 = vector.load %arg9[%c0_87, %c0_88] : memref<8x128xf32, #tpu.memory_space<vmem>>, vector<8x128xf32>
      tpu.vector_store %arg9[%c0_87, %c0_88], %295 {strides = array<i32>} : memref<8x128xf32, #tpu.memory_space<vmem>>, vector<8x128xf32>,
      %cst_89 = arith.constant 0.000000e+00 : f32
      %297 = vector.broadcast %cst_89 : f32 to vector<8x128xf32>
      %c0_90 = arith.constant 0 : index
      %c0_91 = arith.constant 0 : index
      %298 = vector.load %arg10[%c0_90, %c0_91] : memref<8x128xf32, #tpu.memory_space<vmem>>, vector<8x128xf32>
      tpu.vector_store %arg10[%c0_90, %c0_91], %297 {strides = array<i32>} : memref<8x128xf32, #tpu.memory_space<vmem>>, vector<8x128xf32>,
    } else {
    }
    %c0 = arith.constant 0 : index
    %c0_1 = arith.constant 0 : index
    %c0_2 = arith.constant 0 : index
    %3 = vector.load %arg2[%c0, %c0_1, %c0_2] : memref<8x8x128xbf16, #tpu.memory_space<vmem>>, vector<8x8x128xbf16>
    %4 = arith.extf %3 : vector<8x8x128xbf16> to vector<8x8x128xf32>
    %5 = vector.shape_cast %4 : vector<8x8x128xf32> to vector<64x128xf32>
    %6 = arith.truncf %5 : vector<64x128xf32> to vector<64x128xbf16>
    %c0_3 = arith.constant 0 : index
    %c0_4 = arith.constant 0 : index
    %7 = vector.load %arg4[%c0_3, %c0_4] : memref<128x512xbf16, #tpu.memory_space<vmem>>, vector<128x512xbf16>
    %cst = arith.constant dense<0.000000e+00> : vector<64x512xf32>
    %8 = tpu.matmul %6, %7, %cst {dimension_numbers = #tpu.dot_dimension_numbers<[1], [0], [0], [1], [0, 0, 1, 1], [], []>} : vector<64x128xbf16>, vector<128x512xbf16>, vector<64x512xf32> -> vector<64x512xf32>
    %c0_5 = arith.constant 0 : index
    %c0_6 = arith.constant 0 : index
    %9 = vector.load %arg6[%c0_5, %c0_6] : memref<1x512xf32, #tpu.memory_space<vmem>>, vector<1x512xf32>
    %10 = vector.broadcast %9 : vector<1x512xf32> to vector<64x512xf32>
    %11 = arith.addf %8, %10 : vector<64x512xf32>
    %12 = arith.truncf %11 : vector<64x512xf32> to vector<64x512xbf16>
    %c0_7 = arith.constant 0 : index
    %c0_8 = arith.constant 0 : index
    %13 = vector.load %arg8[%c0_7, %c0_8] : memref<64x512xbf16, #tpu.memory_space<vmem>>, vector<64x512xbf16>
    tpu.vector_store %arg8[%c0_7, %c0_8], %12 {strides = array<i32>} : memref<64x512xbf16, #tpu.memory_space<vmem>>, vector<64x512xbf16>,
    %c0_9 = arith.constant 0 : index
    %c0_10 = arith.constant 0 : index
    %14 = vector.load %arg5[%c0_9, %c0_10] : memref<128x512xbf16, #tpu.memory_space<vmem>>, vector<128x512xbf16>
    %c0_11 = arith.constant 0 : index
    %c0_12 = arith.constant 0 : index
    %15 = vector.load %arg9[%c0_11, %c0_12] : memref<8x128xf32, #tpu.memory_space<vmem>>, vector<8x128xf32>
    %c0_13 = arith.constant 0 : index
    %c0_14 = arith.constant 0 : index
    %16 = vector.load %arg10[%c0_13, %c0_14] : memref<8x128xf32, #tpu.memory_space<vmem>>, vector<8x128xf32>
    %c0_15 = arith.constant 0 : index
    %c0_16 = arith.constant 0 : index
    %17 = vector.load %arg8[%c0_15, %c0_16] : memref<64x512xbf16, #tpu.memory_space<vmem>>, vector<8x512xbf16>
    %18 = arith.extf %17 : vector<8x512xbf16> to vector<8x512xf32>
    %19 = arith.truncf %15 : vector<8x128xf32> to vector<8x128xbf16>
    %cst_17 = arith.constant dense<0.000000e+00> : vector<8x512xf32>
    %20 = tpu.matmul %19, %14, %cst_17 {dimension_numbers = #tpu.dot_dimension_numbers<[1], [0], [0], [1], [0, 0, 1, 1], [], []>} : vector<8x128xbf16>, vector<128x512xbf16>, vector<8x512xf32> -> vector<8x512xf32>
    %21 = arith.addf %18, %20 : vector<8x512xf32>
    %22 = vector.extract_strided_slice %21 {offsets = [0, 0], sizes = [8, 128], strides = [1, 1]} : vector<8x512xf32> to vector<8x128xf32>
    %23 = arith.negf %22 : vector<8x128xf32>
    %24 = math.exp %23 : vector<8x128xf32>
    %cst_18 = arith.constant 1.000000e+00 : f32
    %25 = vector.broadcast %cst_18 : f32 to vector<8x128xf32>
    %26 = arith.addf %25, %24 : vector<8x128xf32>
    %27 = arith.divf %25, %26 : vector<8x128xf32>
    %28 = vector.extract_strided_slice %21 {offsets = [0, 128], sizes = [8, 128], strides = [1, 1]} : vector<8x512xf32> to vector<8x128xf32>
    %29 = arith.negf %28 : vector<8x128xf32>
    %30 = math.exp %29 : vector<8x128xf32>
    %cst_19 = arith.constant 1.000000e+00 : f32
    %31 = vector.broadcast %cst_19 : f32 to vector<8x128xf32>
    %32 = arith.addf %31, %30 : vector<8x128xf32>
    %33 = arith.divf %31, %32 : vector<8x128xf32>
    %34 = vector.extract_strided_slice %21 {offsets = [0, 256], sizes = [8, 128], strides = [1, 1]} : vector<8x512xf32> to vector<8x128xf32>
    %35 = math.tanh %34 : vector<8x128xf32>
    %36 = vector.extract_strided_slice %21 {offsets = [0, 384], sizes = [8, 128], strides = [1, 1]} : vector<8x512xf32> to vector<8x128xf32>
    %37 = arith.negf %36 : vector<8x128xf32>
    %38 = math.exp %37 : vector<8x128xf32>
    %cst_20 = arith.constant 1.000000e+00 : f32
    %39 = vector.broadcast %cst_20 : f32 to vector<8x128xf32>
    %40 = arith.addf %39, %38 : vector<8x128xf32>
    %41 = arith.divf %39, %40 : vector<8x128xf32>
    %42 = arith.mulf %33, %16 : vector<8x128xf32>
    %43 = arith.mulf %27, %35 : vector<8x128xf32>
    %44 = arith.addf %42, %43 : vector<8x128xf32>
    %45 = math.tanh %44 : vector<8x128xf32>
    %46 = arith.mulf %41, %45 : vector<8x128xf32>
    %47 = vector.shape_cast %46 : vector<8x128xf32> to vector<8x1x128xf32>
    %48 = arith.truncf %47 : vector<8x1x128xf32> to vector<8x1x128xbf16>
    %c0_21 = arith.constant 0 : index
    %c0_22 = arith.constant 0 : index
    %c0_23 = arith.constant 0 : index
    %49 = vector.load %arg7[%c0_21, %c0_22, %c0_23] : memref<8x8x128xbf16, #tpu.memory_space<vmem>>, vector<8x1x128xbf16>
    tpu.vector_store %arg7[%c0_21, %c0_22, %c0_23], %48 {strides = array<i32>} : memref<8x8x128xbf16, #tpu.memory_space<vmem>>, vector<8x1x128xbf16>,
    %c8 = arith.constant 8 : index
    %c0_24 = arith.constant 0 : index
    %50 = vector.load %arg8[%c8, %c0_24] : memref<64x512xbf16, #tpu.memory_space<vmem>>, vector<8x512xbf16>
    %51 = arith.extf %50 : vector<8x512xbf16> to vector<8x512xf32>
    %52 = arith.truncf %46 : vector<8x128xf32> to vector<8x128xbf16>
    %cst_25 = arith.constant dense<0.000000e+00> : vector<8x512xf32>
    %53 = tpu.matmul %52, %14, %cst_25 {dimension_numbers = #tpu.dot_dimension_numbers<[1], [0], [0], [1], [0, 0, 1, 1], [], []>} : vector<8x128xbf16>, vector<128x512xbf16>, vector<8x512xf32> -> vector<8x512xf32>
    %54 = arith.addf %51, %53 : vector<8x512xf32>
    %55 = vector.extract_strided_slice %54 {offsets = [0, 0], sizes = [8, 128], strides = [1, 1]} : vector<8x512xf32> to vector<8x128xf32>
    %56 = arith.negf %55 : vector<8x128xf32>
    %57 = math.exp %56 : vector<8x128xf32>
    %cst_26 = arith.constant 1.000000e+00 : f32
    %58 = vector.broadcast %cst_26 : f32 to vector<8x128xf32>
    %59 = arith.addf %58, %57 : vector<8x128xf32>
    %60 = arith.divf %58, %59 : vector<8x128xf32>
    %61 = vector.extract_strided_slice %54 {offsets = [0, 128], sizes = [8, 128], strides = [1, 1]} : vector<8x512xf32> to vector<8x128xf32>
    %62 = arith.negf %61 : vector<8x128xf32>
    %63 = math.exp %62 : vector<8x128xf32>
    %cst_27 = arith.constant 1.000000e+00 : f32
    %64 = vector.broadcast %cst_27 : f32 to vector<8x128xf32>
    %65 = arith.addf %64, %63 : vector<8x128xf32>
    %66 = arith.divf %64, %65 : vector<8x128xf32>
    %67 = vector.extract_strided_slice %54 {offsets = [0, 256], sizes = [8, 128], strides = [1, 1]} : vector<8x512xf32> to vector<8x128xf32>
    %68 = math.tanh %67 : vector<8x128xf32>
    %69 = vector.extract_strided_slice %54 {offsets = [0, 384], sizes = [8, 128], strides = [1, 1]} : vector<8x512xf32> to vector<8x128xf32>
    %70 = arith.negf %69 : vector<8x128xf32>
    %71 = math.exp %70 : vector<8x128xf32>
    %cst_28 = arith.constant 1.000000e+00 : f32
    %72 = vector.broadcast %cst_28 : f32 to vector<8x128xf32>
    %73 = arith.addf %72, %71 : vector<8x128xf32>
    %74 = arith.divf %72, %73 : vector<8x128xf32>
    %75 = arith.mulf %66, %44 : vector<8x128xf32>
    %76 = arith.mulf %60, %68 : vector<8x128xf32>
    %77 = arith.addf %75, %76 : vector<8x128xf32>
    %78 = math.tanh %77 : vector<8x128xf32>
    %79 = arith.mulf %74, %78 : vector<8x128xf32>
    %80 = vector.shape_cast %79 : vector<8x128xf32> to vector<8x1x128xf32>
    %81 = arith.truncf %80 : vector<8x1x128xf32> to vector<8x1x128xbf16>
    %c0_29 = arith.constant 0 : index
    %c1 = arith.constant 1 : index
    %c0_30 = arith.constant 0 : index
    %82 = vector.load %arg7[%c0_29, %c1, %c0_30] : memref<8x8x128xbf16, #tpu.memory_space<vmem>>, vector<8x1x128xbf16>
    tpu.vector_store %arg7[%c0_29, %c1, %c0_30], %81 {strides = array<i32>} : memref<8x8x128xbf16, #tpu.memory_space<vmem>>, vector<8x1x128xbf16>,
    %c16 = arith.constant 16 : index
    %c0_31 = arith.constant 0 : index
    %83 = vector.load %arg8[%c16, %c0_31] : memref<64x512xbf16, #tpu.memory_space<vmem>>, vector<8x512xbf16>
    %84 = arith.extf %83 : vector<8x512xbf16> to vector<8x512xf32>
    %85 = arith.truncf %79 : vector<8x128xf32> to vector<8x128xbf16>
    %cst_32 = arith.constant dense<0.000000e+00> : vector<8x512xf32>
    %86 = tpu.matmul %85, %14, %cst_32 {dimension_numbers = #tpu.dot_dimension_numbers<[1], [0], [0], [1], [0, 0, 1, 1], [], []>} : vector<8x128xbf16>, vector<128x512xbf16>, vector<8x512xf32> -> vector<8x512xf32>
    %87 = arith.addf %84, %86 : vector<8x512xf32>
    %88 = vector.extract_strided_slice %87 {offsets = [0, 0], sizes = [8, 128], strides = [1, 1]} : vector<8x512xf32> to vector<8x128xf32>
    %89 = arith.negf %88 : vector<8x128xf32>
    %90 = math.exp %89 : vector<8x128xf32>
    %cst_33 = arith.constant 1.000000e+00 : f32
    %91 = vector.broadcast %cst_33 : f32 to vector<8x128xf32>
    %92 = arith.addf %91, %90 : vector<8x128xf32>
    %93 = arith.divf %91, %92 : vector<8x128xf32>
    %94 = vector.extract_strided_slice %87 {offsets = [0, 128], sizes = [8, 128], strides = [1, 1]} : vector<8x512xf32> to vector<8x128xf32>
    %95 = arith.negf %94 : vector<8x128xf32>
    %96 = math.exp %95 : vector<8x128xf32>
    %cst_34 = arith.constant 1.000000e+00 : f32
    %97 = vector.broadcast %cst_34 : f32 to vector<8x128xf32>
    %98 = arith.addf %97, %96 : vector<8x128xf32>
    %99 = arith.divf %97, %98 : vector<8x128xf32>
    %100 = vector.extract_strided_slice %87 {offsets = [0, 256], sizes = [8, 128], strides = [1, 1]} : vector<8x512xf32> to vector<8x128xf32>
    %101 = math.tanh %100 : vector<8x128xf32>
    %102 = vector.extract_strided_slice %87 {offsets = [0, 384], sizes = [8, 128], strides = [1, 1]} : vector<8x512xf32> to vector<8x128xf32>
    %103 = arith.negf %102 : vector<8x128xf32>
    %104 = math.exp %103 : vector<8x128xf32>
    %cst_35 = arith.constant 1.000000e+00 : f32
    %105 = vector.broadcast %cst_35 : f32 to vector<8x128xf32>
    %106 = arith.addf %105, %104 : vector<8x128xf32>
    %107 = arith.divf %105, %106 : vector<8x128xf32>
    %108 = arith.mulf %99, %77 : vector<8x128xf32>
    %109 = arith.mulf %93, %101 : vector<8x128xf32>
    %110 = arith.addf %108, %109 : vector<8x128xf32>
    %111 = math.tanh %110 : vector<8x128xf32>
    %112 = arith.mulf %107, %111 : vector<8x128xf32>
    %113 = vector.shape_cast %112 : vector<8x128xf32> to vector<8x1x128xf32>
    %114 = arith.truncf %113 : vector<8x1x128xf32> to vector<8x1x128xbf16>
    %c0_36 = arith.constant 0 : index
    %c2 = arith.constant 2 : index
    %c0_37 = arith.constant 0 : index
    %115 = vector.load %arg7[%c0_36, %c2, %c0_37] : memref<8x8x128xbf16, #tpu.memory_space<vmem>>, vector<8x1x128xbf16>
    tpu.vector_store %arg7[%c0_36, %c2, %c0_37], %114 {strides = array<i32>} : memref<8x8x128xbf16, #tpu.memory_space<vmem>>, vector<8x1x128xbf16>,
    %c24 = arith.constant 24 : index
    %c0_38 = arith.constant 0 : index
    %116 = vector.load %arg8[%c24, %c0_38] : memref<64x512xbf16, #tpu.memory_space<vmem>>, vector<8x512xbf16>
    %117 = arith.extf %116 : vector<8x512xbf16> to vector<8x512xf32>
    %118 = arith.truncf %112 : vector<8x128xf32> to vector<8x128xbf16>
    %cst_39 = arith.constant dense<0.000000e+00> : vector<8x512xf32>
    %119 = tpu.matmul %118, %14, %cst_39 {dimension_numbers = #tpu.dot_dimension_numbers<[1], [0], [0], [1], [0, 0, 1, 1], [], []>} : vector<8x128xbf16>, vector<128x512xbf16>, vector<8x512xf32> -> vector<8x512xf32>
    %120 = arith.addf %117, %119 : vector<8x512xf32>
    %121 = vector.extract_strided_slice %120 {offsets = [0, 0], sizes = [8, 128], strides = [1, 1]} : vector<8x512xf32> to vector<8x128xf32>
    %122 = arith.negf %121 : vector<8x128xf32>
    %123 = math.exp %122 : vector<8x128xf32>
    %cst_40 = arith.constant 1.000000e+00 : f32
    %124 = vector.broadcast %cst_40 : f32 to vector<8x128xf32>
    %125 = arith.addf %124, %123 : vector<8x128xf32>
    %126 = arith.divf %124, %125 : vector<8x128xf32>
    %127 = vector.extract_strided_slice %120 {offsets = [0, 128], sizes = [8, 128], strides = [1, 1]} : vector<8x512xf32> to vector<8x128xf32>
    %128 = arith.negf %127 : vector<8x128xf32>
    %129 = math.exp %128 : vector<8x128xf32>
    %cst_41 = arith.constant 1.000000e+00 : f32
    %130 = vector.broadcast %cst_41 : f32 to vector<8x128xf32>
    %131 = arith.addf %130, %129 : vector<8x128xf32>
    %132 = arith.divf %130, %131 : vector<8x128xf32>
    %133 = vector.extract_strided_slice %120 {offsets = [0, 256], sizes = [8, 128], strides = [1, 1]} : vector<8x512xf32> to vector<8x128xf32>
    %134 = math.tanh %133 : vector<8x128xf32>
    %135 = vector.extract_strided_slice %120 {offsets = [0, 384], sizes = [8, 128], strides = [1, 1]} : vector<8x512xf32> to vector<8x128xf32>
    %136 = arith.negf %135 : vector<8x128xf32>
    %137 = math.exp %136 : vector<8x128xf32>
    %cst_42 = arith.constant 1.000000e+00 : f32
    %138 = vector.broadcast %cst_42 : f32 to vector<8x128xf32>
    %139 = arith.addf %138, %137 : vector<8x128xf32>
    %140 = arith.divf %138, %139 : vector<8x128xf32>
    %141 = arith.mulf %132, %110 : vector<8x128xf32>
    %142 = arith.mulf %126, %134 : vector<8x128xf32>
    %143 = arith.addf %141, %142 : vector<8x128xf32>
    %144 = math.tanh %143 : vector<8x128xf32>
    %145 = arith.mulf %140, %144 : vector<8x128xf32>
    %146 = vector.shape_cast %145 : vector<8x128xf32> to vector<8x1x128xf32>
    %147 = arith.truncf %146 : vector<8x1x128xf32> to vector<8x1x128xbf16>
    %c0_43 = arith.constant 0 : index
    %c3 = arith.constant 3 : index
    %c0_44 = arith.constant 0 : index
    %148 = vector.load %arg7[%c0_43, %c3, %c0_44] : memref<8x8x128xbf16, #tpu.memory_space<vmem>>, vector<8x1x128xbf16>
    tpu.vector_store %arg7[%c0_43, %c3, %c0_44], %147 {strides = array<i32>} : memref<8x8x128xbf16, #tpu.memory_space<vmem>>, vector<8x1x128xbf16>,
    %c32 = arith.constant 32 : index
    %c0_45 = arith.constant 0 : index
    %149 = vector.load %arg8[%c32, %c0_45] : memref<64x512xbf16, #tpu.memory_space<vmem>>, vector<8x512xbf16>
    %150 = arith.extf %149 : vector<8x512xbf16> to vector<8x512xf32>
    %151 = arith.truncf %145 : vector<8x128xf32> to vector<8x128xbf16>
    %cst_46 = arith.constant dense<0.000000e+00> : vector<8x512xf32>
    %152 = tpu.matmul %151, %14, %cst_46 {dimension_numbers = #tpu.dot_dimension_numbers<[1], [0], [0], [1], [0, 0, 1, 1], [], []>} : vector<8x128xbf16>, vector<128x512xbf16>, vector<8x512xf32> -> vector<8x512xf32>
    %153 = arith.addf %150, %152 : vector<8x512xf32>
    %154 = vector.extract_strided_slice %153 {offsets = [0, 0], sizes = [8, 128], strides = [1, 1]} : vector<8x512xf32> to vector<8x128xf32>
    %155 = arith.negf %154 : vector<8x128xf32>
    %156 = math.exp %155 : vector<8x128xf32>
    %cst_47 = arith.constant 1.000000e+00 : f32
    %157 = vector.broadcast %cst_47 : f32 to vector<8x128xf32>
    %158 = arith.addf %157, %156 : vector<8x128xf32>
    %159 = arith.divf %157, %158 : vector<8x128xf32>
    %160 = vector.extract_strided_slice %153 {offsets = [0, 128], sizes = [8, 128], strides = [1, 1]} : vector<8x512xf32> to vector<8x128xf32>
    %161 = arith.negf %160 : vector<8x128xf32>
    %162 = math.exp %161 : vector<8x128xf32>
    %cst_48 = arith.constant 1.000000e+00 : f32
    %163 = vector.broadcast %cst_48 : f32 to vector<8x128xf32>
    %164 = arith.addf %163, %162 : vector<8x128xf32>
    %165 = arith.divf %163, %164 : vector<8x128xf32>
    %166 = vector.extract_strided_slice %153 {offsets = [0, 256], sizes = [8, 128], strides = [1, 1]} : vector<8x512xf32> to vector<8x128xf32>
    %167 = math.tanh %166 : vector<8x128xf32>
    %168 = vector.extract_strided_slice %153 {offsets = [0, 384], sizes = [8, 128], strides = [1, 1]} : vector<8x512xf32> to vector<8x128xf32>
    %169 = arith.negf %168 : vector<8x128xf32>
    %170 = math.exp %169 : vector<8x128xf32>
    %cst_49 = arith.constant 1.000000e+00 : f32
    %171 = vector.broadcast %cst_49 : f32 to vector<8x128xf32>
    %172 = arith.addf %171, %170 : vector<8x128xf32>
    %173 = arith.divf %171, %172 : vector<8x128xf32>
    %174 = arith.mulf %165, %143 : vector<8x128xf32>
    %175 = arith.mulf %159, %167 : vector<8x128xf32>
    %176 = arith.addf %174, %175 : vector<8x128xf32>
    %177 = math.tanh %176 : vector<8x128xf32>
    %178 = arith.mulf %173, %177 : vector<8x128xf32>
    %179 = vector.shape_cast %178 : vector<8x128xf32> to vector<8x1x128xf32>
    %180 = arith.truncf %179 : vector<8x1x128xf32> to vector<8x1x128xbf16>
    %c0_50 = arith.constant 0 : index
    %c4 = arith.constant 4 : index
    %c0_51 = arith.constant 0 : index
    %181 = vector.load %arg7[%c0_50, %c4, %c0_51] : memref<8x8x128xbf16, #tpu.memory_space<vmem>>, vector<8x1x128xbf16>
    tpu.vector_store %arg7[%c0_50, %c4, %c0_51], %180 {strides = array<i32>} : memref<8x8x128xbf16, #tpu.memory_space<vmem>>, vector<8x1x128xbf16>,
    %c40 = arith.constant 40 : index
    %c0_52 = arith.constant 0 : index
    %182 = vector.load %arg8[%c40, %c0_52] : memref<64x512xbf16, #tpu.memory_space<vmem>>, vector<8x512xbf16>
    %183 = arith.extf %182 : vector<8x512xbf16> to vector<8x512xf32>
    %184 = arith.truncf %178 : vector<8x128xf32> to vector<8x128xbf16>
    %cst_53 = arith.constant dense<0.000000e+00> : vector<8x512xf32>
    %185 = tpu.matmul %184, %14, %cst_53 {dimension_numbers = #tpu.dot_dimension_numbers<[1], [0], [0], [1], [0, 0, 1, 1], [], []>} : vector<8x128xbf16>, vector<128x512xbf16>, vector<8x512xf32> -> vector<8x512xf32>
    %186 = arith.addf %183, %185 : vector<8x512xf32>
    %187 = vector.extract_strided_slice %186 {offsets = [0, 0], sizes = [8, 128], strides = [1, 1]} : vector<8x512xf32> to vector<8x128xf32>
    %188 = arith.negf %187 : vector<8x128xf32>
    %189 = math.exp %188 : vector<8x128xf32>
    %cst_54 = arith.constant 1.000000e+00 : f32
    %190 = vector.broadcast %cst_54 : f32 to vector<8x128xf32>
    %191 = arith.addf %190, %189 : vector<8x128xf32>
    %192 = arith.divf %190, %191 : vector<8x128xf32>
    %193 = vector.extract_strided_slice %186 {offsets = [0, 128], sizes = [8, 128], strides = [1, 1]} : vector<8x512xf32> to vector<8x128xf32>
    %194 = arith.negf %193 : vector<8x128xf32>
    %195 = math.exp %194 : vector<8x128xf32>
    %cst_55 = arith.constant 1.000000e+00 : f32
    %196 = vector.broadcast %cst_55 : f32 to vector<8x128xf32>
    %197 = arith.addf %196, %195 : vector<8x128xf32>
    %198 = arith.divf %196, %197 : vector<8x128xf32>
    %199 = vector.extract_strided_slice %186 {offsets = [0, 256], sizes = [8, 128], strides = [1, 1]} : vector<8x512xf32> to vector<8x128xf32>
    %200 = math.tanh %199 : vector<8x128xf32>
    %201 = vector.extract_strided_slice %186 {offsets = [0, 384], sizes = [8, 128], strides = [1, 1]} : vector<8x512xf32> to vector<8x128xf32>
    %202 = arith.negf %201 : vector<8x128xf32>
    %203 = math.exp %202 : vector<8x128xf32>
    %cst_56 = arith.constant 1.000000e+00 : f32
    %204 = vector.broadcast %cst_56 : f32 to vector<8x128xf32>
    %205 = arith.addf %204, %203 : vector<8x128xf32>
    %206 = arith.divf %204, %205 : vector<8x128xf32>
    %207 = arith.mulf %198, %176 : vector<8x128xf32>
    %208 = arith.mulf %192, %200 : vector<8x128xf32>
    %209 = arith.addf %207, %208 : vector<8x128xf32>
    %210 = math.tanh %209 : vector<8x128xf32>
    %211 = arith.mulf %206, %210 : vector<8x128xf32>
    %212 = vector.shape_cast %211 : vector<8x128xf32> to vector<8x1x128xf32>
    %213 = arith.truncf %212 : vector<8x1x128xf32> to vector<8x1x128xbf16>
    %c0_57 = arith.constant 0 : index
    %c5 = arith.constant 5 : index
    %c0_58 = arith.constant 0 : index
    %214 = vector.load %arg7[%c0_57, %c5, %c0_58] : memref<8x8x128xbf16, #tpu.memory_space<vmem>>, vector<8x1x128xbf16>
    tpu.vector_store %arg7[%c0_57, %c5, %c0_58], %213 {strides = array<i32>} : memref<8x8x128xbf16, #tpu.memory_space<vmem>>, vector<8x1x128xbf16>,
    %c48 = arith.constant 48 : index
    %c0_59 = arith.constant 0 : index
    %215 = vector.load %arg8[%c48, %c0_59] : memref<64x512xbf16, #tpu.memory_space<vmem>>, vector<8x512xbf16>
    %216 = arith.extf %215 : vector<8x512xbf16> to vector<8x512xf32>
    %217 = arith.truncf %211 : vector<8x128xf32> to vector<8x128xbf16>
    %cst_60 = arith.constant dense<0.000000e+00> : vector<8x512xf32>
    %218 = tpu.matmul %217, %14, %cst_60 {dimension_numbers = #tpu.dot_dimension_numbers<[1], [0], [0], [1], [0, 0, 1, 1], [], []>} : vector<8x128xbf16>, vector<128x512xbf16>, vector<8x512xf32> -> vector<8x512xf32>
    %219 = arith.addf %216, %218 : vector<8x512xf32>
    %220 = vector.extract_strided_slice %219 {offsets = [0, 0], sizes = [8, 128], strides = [1, 1]} : vector<8x512xf32> to vector<8x128xf32>
    %221 = arith.negf %220 : vector<8x128xf32>
    %222 = math.exp %221 : vector<8x128xf32>
    %cst_61 = arith.constant 1.000000e+00 : f32
    %223 = vector.broadcast %cst_61 : f32 to vector<8x128xf32>
    %224 = arith.addf %223, %222 : vector<8x128xf32>
    %225 = arith.divf %223, %224 : vector<8x128xf32>
    %226 = vector.extract_strided_slice %219 {offsets = [0, 128], sizes = [8, 128], strides = [1, 1]} : vector<8x512xf32> to vector<8x128xf32>
    %227 = arith.negf %226 : vector<8x128xf32>
    %228 = math.exp %227 : vector<8x128xf32>
    %cst_62 = arith.constant 1.000000e+00 : f32
    %229 = vector.broadcast %cst_62 : f32 to vector<8x128xf32>
    %230 = arith.addf %229, %228 : vector<8x128xf32>
    %231 = arith.divf %229, %230 : vector<8x128xf32>
    %232 = vector.extract_strided_slice %219 {offsets = [0, 256], sizes = [8, 128], strides = [1, 1]} : vector<8x512xf32> to vector<8x128xf32>
    %233 = math.tanh %232 : vector<8x128xf32>
    %234 = vector.extract_strided_slice %219 {offsets = [0, 384], sizes = [8, 128], strides = [1, 1]} : vector<8x512xf32> to vector<8x128xf32>
    %235 = arith.negf %234 : vector<8x128xf32>
    %236 = math.exp %235 : vector<8x128xf32>
    %cst_63 = arith.constant 1.000000e+00 : f32
    %237 = vector.broadcast %cst_63 : f32 to vector<8x128xf32>
    %238 = arith.addf %237, %236 : vector<8x128xf32>
    %239 = arith.divf %237, %238 : vector<8x128xf32>
    %240 = arith.mulf %231, %209 : vector<8x128xf32>
    %241 = arith.mulf %225, %233 : vector<8x128xf32>
    %242 = arith.addf %240, %241 : vector<8x128xf32>
    %243 = math.tanh %242 : vector<8x128xf32>
    %244 = arith.mulf %239, %243 : vector<8x128xf32>
    %245 = vector.shape_cast %244 : vector<8x128xf32> to vector<8x1x128xf32>
    %246 = arith.truncf %245 : vector<8x1x128xf32> to vector<8x1x128xbf16>
    %c0_64 = arith.constant 0 : index
    %c6 = arith.constant 6 : index
    %c0_65 = arith.constant 0 : index
    %247 = vector.load %arg7[%c0_64, %c6, %c0_65] : memref<8x8x128xbf16, #tpu.memory_space<vmem>>, vector<8x1x128xbf16>
    tpu.vector_store %arg7[%c0_64, %c6, %c0_65], %246 {strides = array<i32>} : memref<8x8x128xbf16, #tpu.memory_space<vmem>>, vector<8x1x128xbf16>,
    %c56 = arith.constant 56 : index
    %c0_66 = arith.constant 0 : index
    %248 = vector.load %arg8[%c56, %c0_66] : memref<64x512xbf16, #tpu.memory_space<vmem>>, vector<8x512xbf16>
    %249 = arith.extf %248 : vector<8x512xbf16> to vector<8x512xf32>
    %250 = arith.truncf %244 : vector<8x128xf32> to vector<8x128xbf16>
    %cst_67 = arith.constant dense<0.000000e+00> : vector<8x512xf32>
    %251 = tpu.matmul %250, %14, %cst_67 {dimension_numbers = #tpu.dot_dimension_numbers<[1], [0], [0], [1], [0, 0, 1, 1], [], []>} : vector<8x128xbf16>, vector<128x512xbf16>, vector<8x512xf32> -> vector<8x512xf32>
    %252 = arith.addf %249, %251 : vector<8x512xf32>
    %253 = vector.extract_strided_slice %252 {offsets = [0, 0], sizes = [8, 128], strides = [1, 1]} : vector<8x512xf32> to vector<8x128xf32>
    %254 = arith.negf %253 : vector<8x128xf32>
    %255 = math.exp %254 : vector<8x128xf32>
    %cst_68 = arith.constant 1.000000e+00 : f32
    %256 = vector.broadcast %cst_68 : f32 to vector<8x128xf32>
    %257 = arith.addf %256, %255 : vector<8x128xf32>
    %258 = arith.divf %256, %257 : vector<8x128xf32>
    %259 = vector.extract_strided_slice %252 {offsets = [0, 128], sizes = [8, 128], strides = [1, 1]} : vector<8x512xf32> to vector<8x128xf32>
    %260 = arith.negf %259 : vector<8x128xf32>
    %261 = math.exp %260 : vector<8x128xf32>
    %cst_69 = arith.constant 1.000000e+00 : f32
    %262 = vector.broadcast %cst_69 : f32 to vector<8x128xf32>
    %263 = arith.addf %262, %261 : vector<8x128xf32>
    %264 = arith.divf %262, %263 : vector<8x128xf32>
    %265 = vector.extract_strided_slice %252 {offsets = [0, 256], sizes = [8, 128], strides = [1, 1]} : vector<8x512xf32> to vector<8x128xf32>
    %266 = math.tanh %265 : vector<8x128xf32>
    %267 = vector.extract_strided_slice %252 {offsets = [0, 384], sizes = [8, 128], strides = [1, 1]} : vector<8x512xf32> to vector<8x128xf32>
    %268 = arith.negf %267 : vector<8x128xf32>
    %269 = math.exp %268 : vector<8x128xf32>
    %cst_70 = arith.constant 1.000000e+00 : f32
    %270 = vector.broadcast %cst_70 : f32 to vector<8x128xf32>
    %271 = arith.addf %270, %269 : vector<8x128xf32>
    %272 = arith.divf %270, %271 : vector<8x128xf32>
    %273 = arith.mulf %264, %242 : vector<8x128xf32>
    %274 = arith.mulf %258, %266 : vector<8x128xf32>
    %275 = arith.addf %273, %274 : vector<8x128xf32>
    %276 = math.tanh %275 : vector<8x128xf32>
    %277 = arith.mulf %272, %276 : vector<8x128xf32>
    %278 = vector.shape_cast %277 : vector<8x128xf32> to vector<8x1x128xf32>
    %279 = arith.truncf %278 : vector<8x1x128xf32> to vector<8x1x128xbf16>
    %c0_71 = arith.constant 0 : index
    %c7 = arith.constant 7 : index
    %c0_72 = arith.constant 0 : index
    %280 = vector.load %arg7[%c0_71, %c7, %c0_72] : memref<8x8x128xbf16, #tpu.memory_space<vmem>>, vector<8x1x128xbf16>
    tpu.vector_store %arg7[%c0_71, %c7, %c0_72], %279 {strides = array<i32>} : memref<8x8x128xbf16, #tpu.memory_space<vmem>>, vector<8x1x128xbf16>,
    %c0_73 = arith.constant 0 : index
    %c0_74 = arith.constant 0 : index
    %281 = vector.load %arg9[%c0_73, %c0_74] : memref<8x128xf32, #tpu.memory_space<vmem>>, vector<8x128xf32>
    tpu.vector_store %arg9[%c0_73, %c0_74], %277 {strides = array<i32>} : memref<8x128xf32, #tpu.memory_space<vmem>>, vector<8x128xf32>,
    %c0_75 = arith.constant 0 : index
    %c0_76 = arith.constant 0 : index
    %282 = vector.load %arg10[%c0_75, %c0_76] : memref<8x128xf32, #tpu.memory_space<vmem>>, vector<8x128xf32>
    tpu.vector_store %arg10[%c0_75, %c0_76], %275 {strides = array<i32>} : memref<8x128xf32, #tpu.memory_space<vmem>>, vector<8x128xf32>,
    %c8_i32 = arith.constant 8 : i32
    %283 = arith.muli %arg1, %c8_i32 : i32
    %284 = tpu.iota {dimensions = array<i32: 1>} : vector<8x8x128xi32>
    %285 = vector.broadcast %283 : i32 to vector<8x8x128xi32>
    %286 = arith.addi %285, %284 : vector<8x8x128xi32>
    %c0_77 = arith.constant 0 : index
    %c0_78 = arith.constant 0 : index
    %287 = vector.load %arg3[%c0_77, %c0_78] : memref<8x1xi32, #tpu.memory_space<vmem>>, vector<8x1xi32>
    %288 = vector.shape_cast %287 : vector<8x1xi32> to vector<8x1x1xi32>
    %c0_79 = arith.constant 0 : index
    %c0_80 = arith.constant 0 : index
    %c0_81 = arith.constant 0 : index
    %289 = vector.load %arg7[%c0_79, %c0_80, %c0_81] : memref<8x8x128xbf16, #tpu.memory_space<vmem>>, vector<8x8x128xbf16>
    %290 = vector.broadcast %288 : vector<8x1x1xi32> to vector<8x8x128xi32>
    %291 = arith.cmpi slt, %286, %290 : vector<8x8x128xi32>
    %cst_82 = arith.constant 0.000000e+00 : bf16
    %292 = vector.broadcast %cst_82 : bf16 to vector<8x8x128xbf16>
    %293 = arith.select %291, %289, %292 : vector<8x8x128xi1>, vector<8x8x128xbf16>
    %c0_83 = arith.constant 0 : index
    %c0_84 = arith.constant 0 : index
    %c0_85 = arith.constant 0 : index
    %294 = vector.load %arg7[%c0_83, %c0_84, %c0_85] : memref<8x8x128xbf16, #tpu.memory_space<vmem>>, vector<8x8x128xbf16>
    tpu.vector_store %arg7[%c0_83, %c0_84, %c0_85], %293 {strides = array<i32>} : memref<8x8x128xbf16, #tpu.memory_space<vmem>>, vector<8x8x128xbf16>,
    return
  }
  func.func @transform_0(%arg0: i32, %arg1: i32) -> (i32, i32, i32) {
    %c0_i32 = arith.constant 0 : i32
    %c0_i32_0 = arith.constant 0 : i32
    return %arg1, %arg0, %c0_i32 : i32, i32, i32
  }
  func.func @transform_1(%arg0: i32, %arg1: i32) -> (i32, i32) {
    %c0_i32 = arith.constant 0 : i32
    %c0_i32_0 = arith.constant 0 : i32
    return %arg0, %c0_i32 : i32, i32
  }
  func.func @transform_2(%arg0: i32, %arg1: i32) -> (i32, i32) {
    %c0_i32 = arith.constant 0 : i32
    %c0_i32_0 = arith.constant 0 : i32
    %c0_i32_1 = arith.constant 0 : i32
    return %c0_i32, %c0_i32_0 : i32, i32
  }
  func.func @transform_3(%arg0: i32, %arg1: i32) -> (i32, i32) {
    %c0_i32 = arith.constant 0 : i32
    %c0_i32_0 = arith.constant 0 : i32
    %c0_i32_1 = arith.constant 0 : i32
    return %c0_i32, %c0_i32_0 : i32, i32
  }
  func.func @transform_4(%arg0: i32, %arg1: i32) -> (i32, i32) {
    %c0_i32 = arith.constant 0 : i32
    %c0_i32_0 = arith.constant 0 : i32
    %c0_i32_1 = arith.constant 0 : i32
    return %c0_i32, %c0_i32_0 : i32, i32
  }
  func.func @transform_5(%arg0: i32, %arg1: i32) -> (i32, i32, i32) {
    %c0_i32 = arith.constant 0 : i32
    %c0_i32_0 = arith.constant 0 : i32
    return %arg0, %arg1, %c0_i32 : i32, i32, i32
  }
}

</mosaic_0001>

<bundles_post_ra>
// kernel: tpu_custom_call.1
= control target key start
LH: loop header
LB: loop body
LE: loop exit
PB: predicated region body
PF: predicated region fallthrough
CT: control target
= control target key end

     0   :  { %10 = vsyncpa [#allocation6], 0  ;;  %s5316_s0 = inlined_call_operand.hbm [shape: bf16[16,8,128], index: 0, kind: input, shape index: {}]   ;;  %s5317_s1 = inlined_call_operand.vmem [shape: s32[8,1], index: 1, kind: input, shape index: {}]   ;;  %s5318_s2 = inlined_call_operand.hbm [shape: bf16[128,512], index: 2, kind: input, shape index: {}]   ;;  %s5319_s3 = inlined_call_operand.hbm [shape: bf16[128,512], index: 3, kind: input, shape index: {}]   ;;  %s5320_s4 = inlined_call_operand.vmem [shape: f32[1,512], index: 4, kind: input, shape index: {}]   ;;  %s5321_s5 = inlined_call_operand.hbm [shape: bf16[8,16,128], index: 5, kind: output, shape index: {}]  }
   0x1   :  { %12 = vsyncpa [#allocation6 + $0x1], 0 }
   0x2   :  { %13 = vsyncpa [#allocation9], 0 }
   0x3   :  { %14 = vsyncpa [#allocation7], 0 }
   0x4   :  { %16 = vsyncpa [#allocation7 + $0x1], 0  ;;  %s4117_s18 = smov 0   ;;  %s4119_s19 = smov 0  }
   0x5   :  { %s4121_s20 = smov 0   ;;  %s4123_s21 = smov 0  }
   0x6   :  { %s4125_s22 = smov 0   ;;  %s4127_s23 = smov 0  }
   0x7 LB: > { %s3317_s24 = sadd.s32 4294967295, %s4071_s23   ;;  %s3318_s25 = sadd.s32 4294967294, %s4071_s23   ;;  %s4071_s23 = sphi %s4127_s23, %s22_s23   ;;  %s4067_s22 = sphi %s4125_s22, %s5367_s22   ;;  %s4063_s21 = sphi %s4123_s21, %s5366_s21   ;;  %s4059_s20 = sphi %s4121_s20, %s5365_s20   ;;  %s4055_s19 = sphi %s4119_s19, %s5364_s19   ;;  %s4051_s18 = sphi %s4117_s18, %s5363_s18  }
   0x8   : > { %p56_p0 = scmp.ne.s32.totalorder %s4055_s19, %s4051_s18  ;;  %p4151_p1 = scmp.eq.s32.totalorder %s3317_s24, 0 }
   0x9   : > { %p4155_p2 = scmp.eq.s32.totalorder %s3317_s24, 1  ;;  %p177_p3 = scmp.eq.s32.totalorder %s3318_s25, 1 }
   0xa   : > { %s5326_s26 = scalar_select %p4151_p1, 1, 0 }
   0xb   : > { %p4161_p4 = por %p4151_p1, %p56_p0  ;;  %p3319_p5 = scmp.ge.s32.totalorder %s4071_s23, 1 }
   0xc   : > { %p4166_p6 = por %p177_p3, %p56_p0  ;;  %p184_p7 = scmp.lt.s32.totalorder %s4071_s23, 3 }
   0xd   : > { %s5328_s28 = scalar_select %p4161_p4, 1, 0 }
   0xe   : > { %s5329_s29 = scalar_select %p4166_p6, 1, 0 }
   0xf   : > { %p4171_p8 = pnand %p3319_p5, %p184_p7  ;;  %s4073_s6 = smov [#allocation8]  }
  0x10   : > { %s203_s7 = sshll.u32 %s4073_s6, 4  ;;  %s4074_s9 = smov [#allocation10]   ;;  %s4175_s7 = int_to_ptr.vmem [resolvable:$true] %s203_s7 }
  0x11   : > { %p3555_p9 = pneg %p4171_p8  ;;  %s216_s10 = sshll.u32 %s4074_s9, 4  ;;  %s4186_s10 = int_to_ptr.vmem [resolvable:$true] %s216_s10 }
  0x12   : > { %s3899_s13 = scalar_lea.hbm %s5318_s2, 4096 }
  0x13   : > { %p4182_p11 = pnand %p3555_p9, %p4151_p1  ;;  %p3900_p12 = scmp.ne.s32.totalorder %s5318_s2, %s3899_s13 }
  0x14   : > { %p3906_p5 = scmp.lt.u32.totalorder %s3899_s13, %s5318_s2 }
  0x15   : > { %p3901_p13 = pneg %p4182_p11 }
  0x17   : > { %p3902_p0 = pnand %p3901_p13, %p3900_p12 }
  0x19   : > { %p3903_p3 = pneg %p3902_p0 }
  0x1b   : > { %p3908_p7 = pnand %p3906_p5, %p3903_p3 }
  0x1d   : > { %3911 = shalt.err (!%p3908_p7)
}
  0x1e   : > { %s3912_s24 = scalar_lea.vmem %s4175_s7, 4096  ;;  %p3920_p1 = scmp.lt.s32.totalorder %s4175_s7, %s4175_s7 }
  0x1f   : > { %p3913_p9 = scmp.ne.s32.totalorder %s4175_s7, %s3912_s24  ;;  %p3921_p12 = scmp.lt.s32.totalorder %s3912_s24, %s3912_s24 }
  0x21   : > { %p3915_p10 = pnand %p3913_p9, %p3901_p13  ;;  %p3922_p0 = por %p3921_p12, %p3920_p1 }
  0x23   : > { %p3916_p6 = pneg %p3915_p10 }
  0x25   : > { %p3923_p4 = pnand %p3922_p0, %p3916_p6 }
  0x27   : > { %3926 = shalt.err (!%p3923_p4)
}
  0x28   : > { %s4075_s25 = smov 256   ;;  %s4076_s6 = smov 16  }
  0x29   : > { %3558 = dma.hbm_to_vmem [thread:$0]  (!%p4182_p11), %s5318_s2, 4096, %s4175_s7, [#allocation9], %s4075_s25, %s4075_s25, %s4076_s6  }
  0x2a   : > { %s3927_s14 = scalar_lea.hbm %s5319_s3, 4096 }
  0x2b   : > { %p3928_p1 = scmp.ne.s32.totalorder %s5319_s3, %s3927_s14  ;;  %p3934_p10 = scmp.lt.u32.totalorder %s3927_s14, %s5319_s3 }
  0x2d   : > { %p3930_p4 = pnand %p3928_p1, %p3901_p13 }
  0x2f   : > { %p3931_p6 = pneg %p3930_p4 }
  0x31   : > { %p3936_p3 = pnand %p3934_p10, %p3931_p6 }
  0x33   : > { %3939 = shalt.err (!%p3936_p3)
}
  0x34   : > { %s3940_s7 = scalar_lea.vmem %s4186_s10, 4096  ;;  %p3948_p12 = scmp.lt.s32.totalorder %s4186_s10, %s4186_s10 }
  0x35   : > { %p3941_p5 = scmp.ne.s32.totalorder %s4186_s10, %s3940_s7  ;;  %p3949_p0 = scmp.lt.s32.totalorder %s3940_s7, %s3940_s7 }
  0x37   : > { %p3943_p7 = pnand %p3941_p5, %p3901_p13  ;;  %p3950_p1 = por %p3949_p0, %p3948_p12 }
  0x39   : > { %p3944_p9 = pneg %p3943_p7 }
  0x3b   : > { %p3951_p4 = pnand %p3950_p1, %p3944_p9 }
  0x3d   : > { %3954 = shalt.err (!%p3951_p4)
}
  0x3e   : > { %3561 = dma.hbm_to_vmem [thread:$0]  (!%p4182_p11), %s5319_s3, 4096, %s4186_s10, [#allocation9], %s4075_s25, %s4075_s25, %s4076_s6  }
  0x3f   : > { %s31_s12 = sadd.s32 1, %s4067_s22  ;;  %s43_s13 = sadd.s32 1, %s4059_s20 }
  0x40   : > { %p32_p13 = scmp.ge.s32.totalorder %s31_s12, 2  ;;  %p50_p6 = scmp.ne.s32.totalorder %s4059_s20, %s4055_s19 }
  0x41   : > { %p51_p10 = scmp.eq.s32.totalorder %s4071_s23, 0  ;;  %p3572_p3 = scmp.lt.s32.totalorder %s4071_s23, 2 }
  0x42   : > { %s5369_s12 = smov (%p32_p13, %s31_s12), 0  ;;  %p4250_p7 = por %p4155_p2, %p50_p6 }
  0x43   : > { %p52_p5 = por %p51_p10, %p50_p6  ;;  %s38_s14 = ssub.s32 %s4067_s22, %s5369_s12 }
  0x44   : > { %s5332_s8 = scalar_select %p4250_p7, 1, 0 }
  0x45   : > { %s233_s15 = sand.u32 1, %s4059_s20   ;;  %p41_p9 = scmp.eq.s32.totalorder %s38_s14, 0 }
  0x46   : > { %s3324_s10 = sshll.u32 %s233_s15, 5  ;;  %s3486_s25 = sshll.u32 %s4067_s22, 9 }
  0x47   : > { %s4259_s6 = scalar_select %p41_p9, %s4059_s20, %s43_s13  }
  0x48   : > { %s4264_s24 = scalar_lea.hbm %s5316_s0, %s3486_s25  ;;  %s237_s27 = scalar_lea.vmem [#allocation5], %s3324_s10 }
  0x49   : > { %s245_s7 = sshll.u32 %s237_s27, 4  ;;  %p4268_p2 = pnand %p3572_p3, %p52_p5  ;;  %s4272_s7 = int_to_ptr.vmem [resolvable:$true] %s245_s7 }
  0x4a   : > { %s4274_s11 = scalar_lea.sflag [#allocation6], %s233_s15  ;;  %s3955_s13 = scalar_lea.hbm %s4264_s24, 512 }
  0x4b   : > { %p3956_p11 = scmp.ne.s32.totalorder %s4264_s24, %s3955_s13  ;;  %p3957_p12 = pneg %p4268_p2 }
  0x4c   : > { %s3960_s25 = scalar_lea.hbm %s5316_s0, 1024  ;;  %p3961_p4 = scmp.lt.u32.totalorder %s4264_s24, %s5316_s0 }
  0x4d   : > { %p3958_p0 = pnand %p3957_p12, %p3956_p11  ;;  %p3962_p13 = scmp.lt.u32.totalorder %s3960_s25, %s3955_s13 }
  0x4e   : > { %p3964_p10 = scmp.lt.u32.totalorder %s3955_s13, %s4264_s24 }
  0x4f   : > { %p3959_p1 = pneg %p3958_p0  ;;  %p3963_p6 = por %p3962_p13, %p3961_p4 }
  0x51   : > { %p3965_p3 = por %p3964_p10, %p3963_p6 }
  0x53   : > { %p3966_p5 = pnand %p3965_p3, %p3959_p1 }
  0x55   : > { %3969 = shalt.err (!%p3966_p5)
}
  0x56   : > { %s3970_s15 = scalar_lea.vmem %s4272_s7, 512  ;;  %s4077_s27 = smov [#allocation5]  }
  0x57   : > { %p3971_p9 = scmp.ne.s32.totalorder %s4272_s7, %s3970_s15  ;;  %s3975_s14 = sshll.u32 %s4077_s27, 4  ;;  %s3976_s14 = int_to_ptr.vmem [resolvable:$false] %s3975_s14 }
  0x58   : > { %s3977_s10 = scalar_lea.vmem %s3976_s14, 1024  ;;  %p3978_p7 = scmp.lt.s32.totalorder %s4272_s7, %s3976_s14 }
  0x59   : > { %p3973_p11 = pnand %p3971_p9, %p3957_p12  ;;  %p3979_p4 = scmp.lt.s32.totalorder %s3977_s10, %s3970_s15 }
  0x5b   : > { %p3974_p0 = pneg %p3973_p11  ;;  %p3980_p13 = por %p3979_p4, %p3978_p7 }
  0x5d   : > { %p3981_p6 = pnand %p3980_p13, %p3974_p0 }
  0x5f   : > { %3984 = shalt.err (!%p3981_p6)
}
  0x60   : > { %s4078_s13 = smov 64   ;;  %s4079_s25 = smov 4  }
  0x61   : > { %3565 = dma.hbm_to_vmem [thread:$0]  (!%p4268_p2), %s4264_s24, 512, %s4272_s7, %s4274_s11, %s4078_s13, %s4078_s13, %s4079_s25  }
  0x62   : > { %257 = sbr.rel (%p4171_p8) target bundleno = 2306 (0x902), region = 40  ;;  %s4305_s16 = sand.u32 (!%p4171_p8), 1, %s4055_s19  }
  0x63   : > { %s3328_s17 = sshll.u32 (!%p4171_p8), %s4305_s16, 5  ;;  %s260_s15 = scalar_lea.sflag (!%p4171_p8), [#allocation6], %s4305_s16 }
  0x64   : > { %s4309_s27 = scalar_lea.vmem (!%p4171_p8), [#allocation5], %s3328_s17  ;;  %p5334_p7 = scmp.ne.s32.totalorder (!%p4171_p8), %s5328_s28, 0 }
  0x69   : > { %4038 = dma.done.wait (%p5334_p7), %s260_s15, 512  }
  0x6a   : > { %4040 = vsyncadd (%p5334_p7), %s260_s15, 4294966784  ;;  %p5335_p2 = scmp.ne.s32.totalorder %s5326_s26, 0 }
  0x6c   : > { %4042 = dma.done.wait (%p5335_p2), [#allocation9], 8192  }
  0x6d   : > { %4044 = vsyncadd (%p5335_p2), [#allocation9], 4294959104  ;;  %s4319_s30 = scalar_lea.vmem [#allocation11], %s3328_s17  ;;  %p3332_p8 = scmp.ne.s32.totalorder %s4063_s21, 0 }
  0x6e   : > { %v4080_v0 = vmov (!%p3332_p8), 0.0  }
  0x6f   : > { %312 = sbr.rel (%p3332_p8) target bundleno = 118 (0x76), region = 56  ;;  %313 = vst [vmem:[#allocation3] sm:$0xff] (!%p3332_p8), %v4080_v0  ;;  %314 = vst [vmem:[#allocation4] sm:$0xff] (!%p3332_p8), %v4080_v0 }
  0x76 PF: > { %v3638_v1 = vld [vmem:[#allocation8 + $0x4] ss:$16 sps:$4 sm:$0xff]   ;;  %v3640_v2 = vld [vmem:[#allocation8 + $0xc] ss:$16 sps:$4 sm:$0xff]   ;;  %v4081_v3 = vmov 0   ;;  %vm1106_vm0 = vcmask 1040384  }
  0x77   : > { %581 = vmatprep.mubr.bf16.mxu0 %v4081_v3  ;;  %654 = vmatprep.mubr.bf16.mxu1 %v4081_v3  ;;  %v3642_v4 = vld [vmem:[#allocation8] ss:$16 sps:$4 sm:$0xff]   ;;  %v3643_v5 = vld [vmem:[#allocation8 + $0x8] ss:$16 sps:$4 sm:$0xff]   ;;  %v3644_v6 = vld [vmem:[#allocation8 + $0x24] ss:$16 sps:$4 sm:$0xff]  }
  0x78   : > { %549 = vmatprep.subr.bf16.mxu0 %v3638_v1  ;;  %3637 = vset.pattern.permute.xlu1 %v4081_v3  ;;  %v3646_v7 = vld [vmem:[#allocation8 + $0x2c] ss:$16 sps:$4 sm:$0xff]   ;;  %v3648_v8 = vld [vmem:[#allocation8 + $0x20] ss:$16 sps:$4 sm:$0xff]   ;;  %v3649_v9 = vld [vmem:[#allocation8 + $0x28] ss:$16 sps:$4 sm:$0xff]  }
  0x79   : > { %622 = vmatprep.subr.bf16.mxu1 %v3640_v2  ;;  %3636 = vset.pattern.permute.xlu0 %v4081_v3  ;;  %v3650_v10 = vld [vmem:[#allocation8 + $0x44] ss:$16 sps:$4 sm:$0xff]   ;;  %v3652_v11 = vld [vmem:[#allocation8 + $0x4c] ss:$16 sps:$4 sm:$0xff]   ;;  %v3654_v12 = vld [vmem:[#allocation8 + $0x40] ss:$16 sps:$4 sm:$0xff]  }
  0x7a   : > { %550 = vmatpush1.bf16.msra.mxu0 %v3642_v4  ;;  %623 = vmatpush1.bf16.msra.mxu1 %v3643_v5  ;;  %v3655_v13 = vld [vmem:[#allocation8 + $0x48] ss:$16 sps:$4 sm:$0xff]   ;;  %v3656_v14 = vld [vmem:[#allocation8 + $0x64] ss:$16 sps:$4 sm:$0xff]   ;;  %v3658_v15 = vld [vmem:[#allocation8 + $0x6c] ss:$16 sps:$4 sm:$0xff]  }
  0x7b   : > { %551 = vmatprep.subr.bf16.mxu0 %v3644_v6  ;;  %624 = vmatprep.subr.bf16.mxu1 %v3646_v7  ;;  %v3660_v16 = vld [vmem:[#allocation8 + $0x60] ss:$16 sps:$4 sm:$0xff]   ;;  %v3661_v17 = vld [vmem:[#allocation8 + $0x68] ss:$16 sps:$4 sm:$0xff]   ;;  %v3662_v18 = vld [vmem:[#allocation8 + $0x84] ss:$16 sps:$4 sm:$0xff]  }
  0x7c   : > { %v3664_v19 = vld [vmem:[#allocation8 + $0x8c] ss:$16 sps:$4 sm:$0xff]   ;;  %v3666_v20 = vld [vmem:[#allocation8 + $0x80] ss:$16 sps:$4 sm:$0xff]   ;;  %v3667_v21 = vld [vmem:[#allocation8 + $0x88] ss:$16 sps:$4 sm:$0xff]  }
  0x7d   : > { %v3668_v22 = vld [vmem:[#allocation8 + $0xa4] ss:$16 sps:$4 sm:$0xff]   ;;  %v3670_v23 = vld [vmem:[#allocation8 + $0xac] ss:$16 sps:$4 sm:$0xff]   ;;  %v3672_v24 = vld [vmem:[#allocation8 + $0xa0] ss:$16 sps:$4 sm:$0xff]  }
  0x7e   : > { %552 = vmatpush1.bf16.msra.mxu0 %v3648_v8  ;;  %625 = vmatpush1.bf16.msra.mxu1 %v3649_v9  ;;  %v3673_v25 = vld [vmem:[#allocation8 + $0xa8] ss:$16 sps:$4 sm:$0xff]   ;;  %v3674_v26 = vld [vmem:[#allocation8 + $0xc4] ss:$16 sps:$4 sm:$0xff]   ;;  %v3676_v27 = vld [vmem:[#allocation8 + $0xcc] ss:$16 sps:$4 sm:$0xff]   ;;  %v369_v9 = vlaneseq }
  0x7f   : > { %553 = vmatprep.subr.bf16.mxu0 %v3650_v10  ;;  %626 = vmatprep.subr.bf16.mxu1 %v3652_v11  ;;  %v3678_v28 = vld [vmem:[#allocation8 + $0xc0] ss:$16 sps:$4 sm:$0xff]   ;;  %v3679_v29 = vld [vmem:[#allocation8 + $0xc8] ss:$16 sps:$4 sm:$0xff]   ;;  %v3680_v30 = vld [vmem:[#allocation8 + $0xe4] ss:$16 sps:$4 sm:$0xff]  }
  0x80   : > { %v3682_v31 = vld [vmem:[#allocation8 + $0xec] ss:$16 sps:$4 sm:$0xff]   ;;  %v3684_v32 = vld [vmem:[#allocation8 + $0xe0] ss:$16 sps:$4 sm:$0xff]   ;;  %v3685_v33 = vld [vmem:[#allocation8 + $0xe8] ss:$16 sps:$4 sm:$0xff]  }
  0x81   : > { %v4326_v34 = vld [vmem:[#allocation10 + $0x4] ss:$16 sps:$4 sm:$0xff]   ;;  %v4328_v35 = vld [vmem:[#allocation10 + $0xc] ss:$16 sps:$4 sm:$0xff]   ;;  %v4331_v37 = vld [vmem:[#allocation10] ss:$16 sps:$4 sm:$0xff]  }
  0x82   : > { %554 = vmatpush1.bf16.msra.mxu0 %v3654_v12  ;;  %627 = vmatpush1.bf16.msra.mxu1 %v3655_v13  ;;  %v3686_v36 = vld [vmem:[%s4309_s27] sm:$0xff]   ;;  %v4333_v38 = vld [vmem:[#allocation10 + $0x8] ss:$16 sps:$4 sm:$0xff]   ;;  %v4339_v40 = vld [vmem:[#allocation10 + $0x2c] ss:$16 sps:$4 sm:$0xff]   ;;  %v4470_v10 = vshrl.u32 %v369_v9, 7 }
  0x83   : > { %555 = vmatprep.subr.bf16.mxu0 %v3656_v14  ;;  %628 = vmatprep.subr.bf16.mxu1 %v3658_v15  ;;  %v4337_v39 = vld [vmem:[#allocation10 + $0x24] ss:$16 sps:$4 sm:$0xff]   ;;  %v4341_v41 = vld [vmem:[#allocation10 + $0x20] ss:$16 sps:$4 sm:$0xff]   ;;  %v4345_v42 = vld [vmem:[#allocation10 + $0x28] ss:$16 sps:$4 sm:$0xff]  }
  0x84   : > { %v4349_v43 = vld [vmem:[#allocation10 + $0x44] ss:$16 sps:$4 sm:$0xff]   ;;  %v4351_v44 = vld [vmem:[#allocation10 + $0x4c] ss:$16 sps:$4 sm:$0xff]   ;;  %v4356_v46 = vld [vmem:[#allocation10 + $0x40] ss:$16 sps:$4 sm:$0xff]  }
  0x85   : > { %v3699_v45 = vld [vmem:[%s4309_s27 + $0x8] sm:$0xff]   ;;  %v4362_v48 = vld [vmem:[#allocation10 + $0x64] ss:$16 sps:$4 sm:$0xff]   ;;  %v4368_v50 = vld [vmem:[#allocation10 + $0x60] ss:$16 sps:$4 sm:$0xff]   ;;  %v379_v11 = vsub.s32 2, %v4470_v10 }
  0x86   : > { %556 = vmatpush1.bf16.msra.mxu0 %v3660_v16  ;;  %629 = vmatpush1.bf16.msra.mxu1 %v3661_v17  ;;  %v4358_v47 = vld [vmem:[#allocation10 + $0x48] ss:$16 sps:$4 sm:$0xff]   ;;  %v4366_v49 = vld [vmem:[#allocation10 + $0x6c] ss:$16 sps:$4 sm:$0xff]   ;;  %v4374_v52 = vld [vmem:[#allocation10 + $0x84] ss:$16 sps:$4 sm:$0xff]  }
  0x87   : > { %557 = vmatprep.subr.bf16.mxu0 %v3662_v18  ;;  %630 = vmatprep.subr.bf16.mxu1 %v3664_v19  ;;  %v4370_v51 = vld [vmem:[#allocation10 + $0x68] ss:$16 sps:$4 sm:$0xff]   ;;  %v4378_v53 = vld [vmem:[#allocation10 + $0x8c] ss:$16 sps:$4 sm:$0xff]   ;;  %v3712_v54 = vld [vmem:[%s4309_s27 + $0x10] sm:$0xff]   ;;  %v383_v12 = vsub.s32 3, %v4470_v10 }
  0x88   : > { %v4385_v55 = vld [vmem:[#allocation10 + $0x80] ss:$16 sps:$4 sm:$0xff]   ;;  %v4387_v56 = vld [vmem:[#allocation10 + $0x88] ss:$16 sps:$4 sm:$0xff]   ;;  %v4391_v57 = vld [vmem:[#allocation10 + $0xa4] ss:$16 sps:$4 sm:$0xff]  }
  0x89   : > { %v4393_v58 = vld [vmem:[#allocation10 + $0xac] ss:$16 sps:$4 sm:$0xff]   ;;  %v4397_v59 = vld [vmem:[#allocation10 + $0xa0] ss:$16 sps:$4 sm:$0xff]   ;;  %v4399_v60 = vld [vmem:[#allocation10 + $0xa8] ss:$16 sps:$4 sm:$0xff]  }
  0x8a   : > { %558 = vmatpush1.bf16.msra.mxu0 %v3666_v20  ;;  %631 = vmatpush1.bf16.msra.mxu1 %v3667_v21  ;;  %v4403_v61 = vld [vmem:[#allocation10 + $0xc4] ss:$16 sps:$4 sm:$0xff]   ;;  %v4405_v62 = vld [vmem:[#allocation10 + $0xcc] ss:$16 sps:$4 sm:$0xff]   ;;  %v4412_v0 = vld [vmem:[#allocation10 + $0xc0] ss:$16 sps:$4 sm:$0xff]  }
  0x8b   : > { %559 = vmatprep.subr.bf16.mxu0 %v3668_v22  ;;  %632 = vmatprep.subr.bf16.mxu1 %v3670_v23  ;;  %v3725_v63 = vld [vmem:[%s4309_s27 + $0x18] sm:$0xff]   ;;  %v4418_v2 = vld [vmem:[#allocation10 + $0xe4] ss:$16 sps:$4 sm:$0xff]   ;;  %v4424_v5 = vld [vmem:[#allocation10 + $0xe0] ss:$16 sps:$4 sm:$0xff]   ;;  %v4475_v13 = vsub.s32 0, %v4470_v10 }
  0x8c   : > { %v4414_v1 = vld [vmem:[#allocation10 + $0xc8] ss:$16 sps:$4 sm:$0xff]   ;;  %v4420_v4 = vld [vmem:[#allocation10 + $0xec] ss:$16 sps:$4 sm:$0xff]   ;;  %v759_v7 = vld [vmem:[#allocation3] sm:$0xff]  ;;  %v375_v15 = vsub.s32 1, %v4470_v10 }
  0x8d   : > { %v4426_v6 = vld [vmem:[#allocation10 + $0xe8] ss:$16 sps:$4 sm:$0xff]   ;;  %v769_v8 = vpack.c.bf16 %v759_v7, %v759_v7  ;;  %v367_v14 = vld [vmem:[%s5320_s4] sm:$0xf]  ;;  %vm1107_vm1 = vsmask.f32 256 }
  0x8e   : > { %560 = vmatpush1.bf16.msra.mxu0 %v3672_v24  ;;  %633 = vmatpush1.bf16.msra.mxu1 %v3673_v25  ;;  %v4481_v16 = vrot.slane %v367_v14, %v379_v11  ;;  %v4483_v17 = vrot.slane %v367_v14, %v383_v12  ;;  %v4486_v18 = vrot.slane %v367_v14, %v4475_v13  ;;  %vm4536_vm2 = vmand %vm1106_vm0, %vm1107_vm1  ;;  %vm1386_vm3 = vsmask.f32 7938  ;;  %s3481_s9 = sshll.u32 %s4063_s21, 3  ;;  %s3483_s11 = sshll.u32 %s4063_s21, 6 }
  0x8f   : > { %561 = vmatprep.subr.bf16.mxu0 %v3674_v26  ;;  %634 = vmatprep.subr.bf16.mxu1 %v3676_v27  ;;  %v4488_v20 = vrot.slane %v367_v14, %v375_v15  ;;  %vm4622_vm4 = vmand %vm1106_vm0, %vm1386_vm3  ;;  %vm1637_vm5 = vcmask 1041409   ;;  %vm1638_vm6 = vsmask.f32 1280  ;;  %vm1925_vm8 = vsmask.f32 7942  ;;  %s3198_s14 = sshll.u32 %s4319_s30, 4  ;;  %s5246_s13 = scalar_lea.hbm %s5321_s5, %s3483_s11  ;;  %s5258_s14 = int_to_ptr.vmem [resolvable:$true] %s3198_s14 }
  0x90   : > { %vm4716_vm7 = vmand %vm1637_vm5, %vm1638_vm6  ;;  %vm2176_vm10 = vcmask 1042434   ;;  %vm2177_vm11 = vsmask.f32 2304  ;;  %vm2464_vm13 = vsmask.f32 7946  ;;  %vm2715_vm15 = vcmask 1043459  }
  0x91   : > { %vm4853_vm9 = vmand %vm1637_vm5, %vm1925_vm8  ;;  %vm2716_vm0 = vsmask.f32 3328  ;;  %s3183_s25 = scalar_lea.sflag [#allocation7], %s4305_s16  ;;  %s3985_s17 = scalar_lea.vmem %s5258_s14, 512 }
  0x92   : > { %562 = vmatpush1.bf16.msra.mxu0 %v3678_v28  ;;  %635 = vmatpush1.bf16.msra.mxu1 %v3679_v29  ;;  %vm4932_vm12 = vmand %vm2176_vm10, %vm2177_vm11  ;;  %p3986_p12 = scmp.ne.s32.totalorder %s5258_s14, %s3985_s17  ;;  %p5360_p1 = scmp.ne.s32.totalorder %s5332_s8, 0 }
  0x93   : > { %563 = vmatprep.subr.bf16.mxu0 %v3680_v30  ;;  %636 = vmatprep.subr.bf16.mxu1 %v3682_v31  ;;  %vm5017_vm14 = vmand %vm2176_vm10, %vm2464_vm13  ;;  %s4083_s15 = smov [#allocation11]  }
  0x94   : > { %vm5105_vm1 = vmand %vm2715_vm15, %vm2716_vm0  ;;  %p3987_p10 = pnand %p3986_p12, %p5360_p1  ;;  %s3989_s27 = sshll.u32 %s4083_s15, 4  ;;  %s3990_s27 = int_to_ptr.vmem [resolvable:$false] %s3989_s27 }
  0x95   : > { %s3991_s26 = scalar_lea.vmem %s3990_s27, 1024  ;;  %p3992_p5 = scmp.lt.s32.totalorder %s5258_s14, %s3990_s27 }
  0x96   : > { %564 = vmatpush1.bf16.msra.mxu0 %v3684_v32  ;;  %637 = vmatpush1.bf16.msra.mxu1 %v3685_v33  ;;  %p3988_p3 = pneg %p3987_p10  ;;  %p3993_p9 = scmp.lt.s32.totalorder %s3991_s26, %s3985_s17 }
  0x97   : > { %930 = vmatprep.subr.bf16.mxu0 %v4326_v34  ;;  %971 = vmatprep.subr.bf16.mxu1 %v4328_v35 }
  0x98   : > { %p3994_p11 = por %p3993_p9, %p3992_p5 }
  0x99   : > { %582 = vmatmul.mubr.bf16.vlgmr.msra.gmra.mrb[0].mxu0 %v3686_v36  ;;  %655 = vmatmul.mubr.bf16.vlgmr.msra.gmra.mrb[0].mxu1 %v3686_v36 }
  0x9a   : > { %931 = vmatpush1.bf16.msra.mxu0 %v4331_v37  ;;  %972 = vmatpush1.bf16.msra.mxu1 %v4333_v38  ;;  %p3995_p0 = pnand %p3994_p11, %p3988_p3 }
  0x9b   : > { %932 = vmatprep.subr.bf16.mxu0 %v4337_v39  ;;  %973 = vmatprep.subr.bf16.mxu1 %v4339_v40 }
  0x9c   : > { %591 = vmatprep.mubr.bf16.mxu0 %v4081_v3  ;;  %664 = vmatprep.mubr.bf16.mxu1 %v4081_v3 }
  0x9e   : > { %933 = vmatpush1.bf16.msra.mxu0 %v4341_v41  ;;  %974 = vmatpush1.bf16.msra.mxu1 %v4345_v42 }
  0x9f   : > { %934 = vmatprep.subr.bf16.mxu0 %v4349_v43  ;;  %975 = vmatprep.subr.bf16.mxu1 %v4351_v44 }
  0xa1   : > { %592 = vmatmul.mubr.bf16.gmra.mrb[4].mxu0 %v3699_v45  ;;  %665 = vmatmul.mubr.bf16.gmra.mrb[4].mxu1 %v3699_v45 }
  0xa2   : > { %935 = vmatpush1.bf16.msra.mxu0 %v4356_v46  ;;  %976 = vmatpush1.bf16.msra.mxu1 %v4358_v47 }
  0xa3   : > { %936 = vmatprep.subr.bf16.mxu0 %v4362_v48  ;;  %977 = vmatprep.subr.bf16.mxu1 %v4366_v49 }
  0xa4   : > { %601 = vmatprep.mubr.bf16.mxu0 %v4081_v3  ;;  %674 = vmatprep.mubr.bf16.mxu1 %v4081_v3 }
  0xa6   : > { %937 = vmatpush1.bf16.msra.mxu0 %v4368_v50  ;;  %978 = vmatpush1.bf16.msra.mxu1 %v4370_v51 }
  0xa7   : > { %938 = vmatprep.subr.bf16.mxu0 %v4374_v52  ;;  %979 = vmatprep.subr.bf16.mxu1 %v4378_v53 }
  0xa9   : > { %602 = vmatmul.mubr.bf16.gmra.mrb[8].mxu0 %v3712_v54  ;;  %675 = vmatmul.mubr.bf16.gmra.mrb[8].mxu1 %v3712_v54 }
  0xaa   : > { %939 = vmatpush1.bf16.msra.mxu0 %v4385_v55  ;;  %980 = vmatpush1.bf16.msra.mxu1 %v4387_v56 }
  0xab   : > { %940 = vmatprep.subr.bf16.mxu0 %v4391_v57  ;;  %981 = vmatprep.subr.bf16.mxu1 %v4393_v58 }
  0xac   : > { %611 = vmatprep.mubr.bf16.mxu0 %v4081_v3  ;;  %684 = vmatprep.mubr.bf16.mxu1 %v4081_v3 }
  0xae   : > { %941 = vmatpush1.bf16.msra.mxu0 %v4397_v59  ;;  %982 = vmatpush1.bf16.msra.mxu1 %v4399_v60 }
  0xaf   : > { %942 = vmatprep.subr.bf16.mxu0 %v4403_v61  ;;  %983 = vmatprep.subr.bf16.mxu1 %v4405_v62 }
  0xb1   : > { %612 = vmatmul.mubr.bf16.gmra.mrb[12].mxu0 %v3725_v63  ;;  %685 = vmatmul.mubr.bf16.gmra.mrb[12].mxu1 %v3725_v63 }
  0xb2   : > { %943 = vmatpush1.bf16.msra.mxu0 %v4412_v0  ;;  %984 = vmatpush1.bf16.msra.mxu1 %v4414_v1 }
  0xb3   : > { %944 = vmatprep.subr.bf16.mxu0 %v4418_v2  ;;  %985 = vmatprep.subr.bf16.mxu1 %v4420_v4 }
  0xb4   : > { %962 = vmatprep.mubr.bf16.mxu0 %v4081_v3  ;;  %1003 = vmatprep.mubr.bf16.mxu1 %v4081_v3 }
  0xb6   : > { %945 = vmatpush1.bf16.msra.mxu0 %v4424_v5  ;;  %986 = vmatpush1.bf16.msra.mxu1 %v4426_v6 }
  0xb7   : > { %1154 = vmatprep.subr.bf16.mxu0 %v4326_v34  ;;  %1195 = vmatprep.subr.bf16.mxu1 %v4328_v35 }
  0xb9   : > { %963 = vmatmul.mubr.bf16.vlgmr.msra.gmra.mrb[16].mxu0 %v769_v8  ;;  %1004 = vmatmul.mubr.bf16.vlgmr.msra.gmra.mrb[16].mxu1 %v769_v8 }
  0xba   : > { %1155 = vmatpush1.bf16.msra.mxu0 %v4331_v37  ;;  %1196 = vmatpush1.bf16.msra.mxu1 %v4333_v38 }
  0xbb   : > { %1156 = vmatprep.subr.bf16.mxu0 %v4337_v39  ;;  %1197 = vmatprep.subr.bf16.mxu1 %v4339_v40 }
  0xbc   : > { %1186 = vmatprep.mubr.bf16.mxu0 %v4081_v3  ;;  %1227 = vmatprep.mubr.bf16.mxu1 %v4081_v3 }
  0xbe   : > { %1157 = vmatpush1.bf16.msra.mxu0 %v4341_v41  ;;  %1198 = vmatpush1.bf16.msra.mxu1 %v4345_v42 }
  0xbf   : > { %1158 = vmatprep.subr.bf16.mxu0 %v4349_v43  ;;  %1199 = vmatprep.subr.bf16.mxu1 %v4351_v44 }
  0xc2   : > { %1159 = vmatpush1.bf16.msra.mxu0 %v4356_v46  ;;  %1200 = vmatpush1.bf16.msra.mxu1 %v4358_v47 }
  0xc3   : > { %1160 = vmatprep.subr.bf16.mxu0 %v4362_v48  ;;  %1201 = vmatprep.subr.bf16.mxu1 %v4366_v49 }
  0xc6   : > { %1161 = vmatpush1.bf16.msra.mxu0 %v4368_v50  ;;  %1202 = vmatpush1.bf16.msra.mxu1 %v4370_v51 }
  0xc7   : > { %1162 = vmatprep.subr.bf16.mxu0 %v4374_v52  ;;  %1203 = vmatprep.subr.bf16.mxu1 %v4378_v53 }
  0xca   : > { %1163 = vmatpush1.bf16.msra.mxu0 %v4385_v55  ;;  %1204 = vmatpush1.bf16.msra.mxu1 %v4387_v56 }
  0xcb   : > { %1164 = vmatprep.subr.bf16.mxu0 %v4391_v57  ;;  %1205 = vmatprep.subr.bf16.mxu1 %v4393_v58 }
  0xce   : > { %1165 = vmatpush1.bf16.msra.mxu0 %v4397_v59  ;;  %1206 = vmatpush1.bf16.msra.mxu1 %v4399_v60 }
  0xcf   : > { %1166 = vmatprep.subr.bf16.mxu0 %v4403_v61  ;;  %1207 = vmatprep.subr.bf16.mxu1 %v4405_v62 }
  0xd2   : > { %1167 = vmatpush1.bf16.msra.mxu0 %v4412_v0  ;;  %1208 = vmatpush1.bf16.msra.mxu1 %v4414_v1 }
  0xd3   : > { %1168 = vmatprep.subr.bf16.mxu0 %v4418_v2  ;;  %1209 = vmatprep.subr.bf16.mxu1 %v4420_v4 }
  0xd6   : > { %1169 = vmatpush1.bf16.msra.mxu0 %v4424_v5  ;;  %1210 = vmatpush1.bf16.msra.mxu1 %v4426_v6 }
  0xd7   : > { %1421 = vmatprep.subr.bf16.mxu0 %v4326_v34  ;;  %1462 = vmatprep.subr.bf16.mxu1 %v4328_v35 }
 0x16c   : > { %v583_v19 = vpop.f32.mrb[0].mxu0  ;;  %v656_v21 = vpop.f32.mrb[0].mxu1 }
 0x16d   : > { %v585_v22 = vpop.f32.mrb[1].mxu0  ;;  %v657_v23 = vadd.f32 %v656_v21, %v4481_v16  ;;  %v658_v24 = vpop.f32.mrb[1].mxu1  ;;  %v584_v28 = vadd.f32 %v583_v19, %v4486_v18 }
 0x16e   : > { %v587_v25 = vpop.f32.mrb[2].mxu0  ;;  %v659_v26 = vadd.f32 %v658_v24, %v4483_v17  ;;  %v660_v27 = vpop.f32.mrb[2].mxu1  ;;  %v586_v33 = vadd.f32 %v585_v22, %v4488_v20 }
 0x16f   : > { %v588_v29 = vadd.f32 %v587_v25, %v4486_v18  ;;  %v589_v30 = vpop.f32.mrb[3].mxu0  ;;  %v661_v31 = vadd.f32 %v660_v27, %v4481_v16  ;;  %v662_v32 = vpop.f32.mrb[3].mxu1 }
 0x170   : > { %v590_v36 = vadd.f32 %v589_v30, %v4488_v20  ;;  %v663_v45 = vadd.f32 %v662_v32, %v4483_v17 }
 0x171   : > { %v695_v54 = vpack.c.bf16 %v588_v29, %v584_v28  ;;  %v697_v63 = vpack.c.bf16 %v661_v31, %v657_v23 }
 0x172   : > { %v696_v7 = vpack.c.bf16 %v590_v36, %v586_v33  ;;  %v698_v8 = vpack.c.bf16 %v663_v45, %v659_v26 }
 0x173   : > { %711 = vst [vmem:[#allocation2] sm:$0xff] %v695_v54  ;;  %713 = vst [vmem:[#allocation2 + $0x10] sm:$0xff] %v697_v63 }
 0x174   : > { %712 = vst [vmem:[#allocation2 + $0x8] sm:$0xff] %v696_v7  ;;  %v593_v9 = vpop.f32.mrb[4].mxu0  ;;  %714 = vst [vmem:[#allocation2 + $0x18] sm:$0xff] %v698_v8  ;;  %v666_v11 = vpop.f32.mrb[4].mxu1 }
 0x175   : > { %v595_v12 = vpop.f32.mrb[5].mxu0  ;;  %v667_v14 = vadd.f32 %v666_v11, %v4481_v16  ;;  %v668_v15 = vpop.f32.mrb[5].mxu1  ;;  %v594_v24 = vadd.f32 %v593_v9, %v4486_v18 }
 0x176   : > { %v597_v19 = vpop.f32.mrb[6].mxu0  ;;  %v669_v21 = vadd.f32 %v668_v15, %v4483_v17  ;;  %v670_v22 = vpop.f32.mrb[6].mxu1  ;;  %v596_v28 = vadd.f32 %v595_v12, %v4488_v20 }
 0x177   : > { %v598_v23 = vadd.f32 %v597_v19, %v4486_v18  ;;  %v599_v25 = vpop.f32.mrb[7].mxu0  ;;  %v671_v26 = vadd.f32 %v670_v22, %v4481_v16  ;;  %v672_v27 = vpop.f32.mrb[7].mxu1 }
 0x178   : > { %v600_v29 = vadd.f32 %v599_v25, %v4488_v20  ;;  %v673_v30 = vadd.f32 %v672_v27, %v4483_v17 }
 0x179   : > { %v699_v31 = vpack.c.bf16 %v598_v23, %v594_v24  ;;  %v701_v32 = vpack.c.bf16 %v671_v26, %v667_v14 }
 0x17a   : > { %v700_v33 = vpack.c.bf16 %v600_v29, %v596_v28  ;;  %v702_v36 = vpack.c.bf16 %v673_v30, %v669_v21 }
 0x17b   : > { %715 = vst [vmem:[#allocation2 + $0x20] sm:$0xff] %v699_v31  ;;  %717 = vst [vmem:[#allocation2 + $0x30] sm:$0xff] %v701_v32 }
 0x17c   : > { %716 = vst [vmem:[#allocation2 + $0x28] sm:$0xff] %v700_v33  ;;  %v603_v45 = vpop.f32.mrb[8].mxu0  ;;  %718 = vst [vmem:[#allocation2 + $0x38] sm:$0xff] %v702_v36  ;;  %v676_v54 = vpop.f32.mrb[8].mxu1 }
 0x17d   : > { %v605_v63 = vpop.f32.mrb[9].mxu0  ;;  %v677_v7 = vadd.f32 %v676_v54, %v4481_v16  ;;  %v678_v8 = vpop.f32.mrb[9].mxu1  ;;  %v604_v15 = vadd.f32 %v603_v45, %v4486_v18 }
 0x17e   : > { %v607_v9 = vpop.f32.mrb[10].mxu0  ;;  %v679_v11 = vadd.f32 %v678_v8, %v4483_v17  ;;  %v680_v12 = vpop.f32.mrb[10].mxu1  ;;  %v606_v24 = vadd.f32 %v605_v63, %v4488_v20 }
 0x17f   : > { %v608_v14 = vadd.f32 %v607_v9, %v4486_v18  ;;  %v609_v19 = vpop.f32.mrb[11].mxu0  ;;  %v681_v21 = vadd.f32 %v680_v12, %v4481_v16  ;;  %v682_v22 = vpop.f32.mrb[11].mxu1 }
 0x180   : > { %v610_v23 = vadd.f32 %v609_v19, %v4488_v20  ;;  %v683_v25 = vadd.f32 %v682_v22, %v4483_v17 }
 0x181   : > { %v703_v26 = vpack.c.bf16 %v608_v14, %v604_v15  ;;  %v705_v27 = vpack.c.bf16 %v681_v21, %v677_v7  ;;  %v761_v21 = vld [vmem:[#allocation2] ss:$16 sps:$4 sm:$0xff]  }
 0x182   : > { %v704_v28 = vpack.c.bf16 %v610_v23, %v606_v24  ;;  %v706_v29 = vpack.c.bf16 %v683_v25, %v679_v11  ;;  %v762_v23 = vld [vmem:[#allocation2 + $0x8] ss:$16 sps:$4 sm:$0xff]  }
 0x183   : > { %719 = vst [vmem:[#allocation2 + $0x40] sm:$0xff] %v703_v26  ;;  %721 = vst [vmem:[#allocation2 + $0x50] sm:$0xff] %v705_v27  ;;  %v765_v27 = vunpack.c.l.bf16 %v761_v21 }
 0x184   : > { %720 = vst [vmem:[#allocation2 + $0x48] sm:$0xff] %v704_v28  ;;  %v613_v30 = vpop.f32.mrb[12].mxu0  ;;  %722 = vst [vmem:[#allocation2 + $0x58] sm:$0xff] %v706_v29  ;;  %v686_v31 = vpop.f32.mrb[12].mxu1  ;;  %v766_v28 = vunpack.c.l.bf16 %v762_v23 }
 0x185   : > { %v615_v32 = vpop.f32.mrb[13].mxu0  ;;  %v687_v33 = vadd.f32 %v686_v31, %v4481_v16  ;;  %v688_v36 = vpop.f32.mrb[13].mxu1  ;;  %v614_v8 = vadd.f32 %v613_v30, %v4486_v18 }
 0x186   : > { %v617_v45 = vpop.f32.mrb[14].mxu0  ;;  %v689_v54 = vadd.f32 %v688_v36, %v4483_v17  ;;  %v690_v63 = vpop.f32.mrb[14].mxu1  ;;  %v616_v15 = vadd.f32 %v615_v32, %v4488_v20 }
 0x187   : > { %v618_v7 = vadd.f32 %v617_v45, %v4486_v18  ;;  %v619_v9 = vpop.f32.mrb[15].mxu0  ;;  %v691_v11 = vadd.f32 %v690_v63, %v4481_v16  ;;  %v692_v12 = vpop.f32.mrb[15].mxu1 }
 0x188   : > { %v620_v14 = vadd.f32 %v619_v9, %v4488_v20  ;;  %v693_v19 = vadd.f32 %v692_v12, %v4483_v17 }
 0x189   : > { %v707_v22 = vpack.c.bf16 %v618_v7, %v614_v8  ;;  %v709_v24 = vpack.c.bf16 %v691_v11, %v687_v33  ;;  %v767_v7 = vunpack.c.h.bf16 %v761_v21  ;;  %v4082_v21 = vmov 1966171168  }
 0x18a   : > { %v708_v25 = vpack.c.bf16 %v620_v14, %v616_v15  ;;  %v710_v26 = vpack.c.bf16 %v693_v19, %v689_v54  ;;  %v768_v54 = vunpack.c.h.bf16 %v762_v23 }
 0x18b   : > { %723 = vst [vmem:[#allocation2 + $0x60] sm:$0xff] %v707_v22  ;;  %725 = vst [vmem:[#allocation2 + $0x70] sm:$0xff] %v709_v24 }
 0x18c   : > { %724 = vst [vmem:[#allocation2 + $0x68] sm:$0xff] %v708_v25  ;;  %726 = vst [vmem:[#allocation2 + $0x78] sm:$0xff] %v710_v26  ;;  %v964_v18 = vpop.f32.mrb[16].mxu0  ;;  %v1005_v16 = vpop.f32.mrb[16].mxu1  ;;  %v760_v25 = vld [vmem:[#allocation4] sm:$0xff] }
 0x18d   : > { %v1012_v29 = vadd.f32 %v964_v18, %v765_v27  ;;  %v966_v30 = vpop.f32.mrb[17].mxu0  ;;  %v1007_v31 = vpop.f32.mrb[17].mxu1  ;;  %v1014_v11 = vadd.f32 %v1005_v16, %v767_v7  ;;  %v1043_v16 = vunpack.c.l.s4 %v4082_v21 }
 0x18e   : > { %v1013_v20 = vadd.f32 %v966_v30, %v766_v28  ;;  %v968_v32 = vpop.f32.mrb[18].mxu0  ;;  %v1009_v17 = vpop.f32.mrb[18].mxu1  ;;  %v1015_v8 = vadd.f32 %v1007_v31, %v768_v54 }
 0x18f   : > { %v3401_v36 = vmul.f32 -1.442695, %v1012_v29  ;;  %v969_v45 = vpop.f32.mrb[19].mxu0  ;;  %v1010_v33 = vpop.f32.mrb[19].mxu1  ;;  %v1044_v30 = vunpack.c.0.s8 %v1043_v16 }
 0x190   : > { %v3402_v63 = vmul.f32 -1.442695, %v1013_v20  ;;  %v3403_v9 = vmul.f32 -1.442695, %v1015_v8 }
 0x191   : > { %3739 = vpow2.f32 %v3401_v36  ;;  %v4526_v20 = vsub.s32 %v1044_v30, %v4470_v10  ;;  %v1118_v30 = vld [vmem:[%s4319_s30 + $0xc] sm:$0x1] }
 0x192   : > { %3741 = vpow2.f32 %v3402_v63 }
 0x193   : > { %3743 = vpow2.f32 %v3403_v9 }
 0x194   : > { %3745 = vtanh.f32 %v1014_v11 }
 0x19b   : > { %v3740_v12 = vpop.eup %3739 }
 0x19c   : > { %v3742_v15 = vpop.eup %3741  ;;  %v1019_v14 = vadd.f32 1.0, %v3740_v12 }
 0x19d   : > { %v1025_v19 = vadd.f32 1.0, %v3742_v15  ;;  %v3744_v22 = vpop.eup %3743  ;;  %v1133_v15 = vld [vmem:[#allocation2] sm:$0xf0] }
 0x19e   : > { %3747 = vrcp.f32 %v1019_v14  ;;  %v3746_v24 = vpop.eup %3745  ;;  %v1032_v28 = vadd.f32 1.0, %v3744_v22  ;;  %v1109_v14 = vld [vmem:[%s4319_s30] sm:$0x1] }
 0x19f   : > { %3749 = vrcp.f32 %v1025_v19 }
 0x1a0   : > { %3751 = vrcp.f32 %v1032_v28  ;;  %v1121_v28 = vld [vmem:[%s4319_s30 + $0x10] sm:$0x1] }
 0x1a8   : > { %v3748_v26 = vpop.eup %3747 }
 0x1a9   : > { %v3750_v27 = vpop.eup %3749  ;;  %v1036_v18 = vmul.f32 %v3748_v26, %v3746_v24 }
 0x1aa   : > { %v1035_v23 = vmul.f32 %v3750_v27, %v760_v25  ;;  %v3752_v31 = vpop.eup %3751  ;;  %v1112_v27 = vld [vmem:[%s4319_s30 + $0x4] sm:$0x1] }
 0x1ac   : > { %v4522_v29 = vadd.f32 %v1036_v18, %v1035_v23  ;;  %v1115_v18 = vld [vmem:[%s4319_s30 + $0x8] sm:$0x1] }
 0x1ae   : > { %3753 = vtanh.f32 %v4522_v29 }
 0x1b8   : > { %v3754_v32 = vpop.eup %3753 }
 0x1b9   : > { %v1039_v17 = vmul.f32 %v3754_v32, %v3752_v31  ;;  %v1124_v31 = vld [vmem:[%s4319_s30 + $0x14] sm:$0x1]  ;;  %v1127_v32 = vld [vmem:[%s4319_s30 + $0x18] sm:$0x1] }
 0x1bb   : > { %v1041_v36 = vcombine.high %v1039_v17, %v1039_v17  ;;  %v1048_v45 = vrot.slane %v1039_v17, %v4526_v20  ;;  %v1153_v33 = vpack.c.bf16 %v1039_v17, %v1039_v17 }
 0x1bd   : > { %v1055_v63 = vrot.slane %v1041_v36, %v4526_v20  ;;  %v1056_v54 = vcombine.high %v1048_v45, %v1048_v45  ;;  %v1064_v8 = vrot.slane %v1048_v45, %v4526_v20  ;;  %1187 = vmatmul.mubr.bf16.vlgmr.msra.gmra.mrb[20].mxu0 %v1153_v33  ;;  %1228 = vmatmul.mubr.bf16.vlgmr.msra.gmra.mrb[20].mxu1 %v1153_v33 }
 0x1be   : > { %1422 = vmatpush1.bf16.msra.mxu0 %v4331_v37  ;;  %1463 = vmatpush1.bf16.msra.mxu1 %v4333_v38 }
 0x1bf   : > { %v1057_v7 = vcombine.high %v1055_v63, %v1055_v63  ;;  %v1071_v9 = vrot.slane %v1055_v63, %v4526_v20  ;;  %v1078_v11 = vrot.slane %v1056_v54, %v4526_v20  ;;  %v1086_v12 = vcombine.high %v1064_v8, %v1064_v8  ;;  %1423 = vmatprep.subr.bf16.mxu0 %v4337_v39 }
 0x1c0   : > { %v1098_v19 = vpack.c.bf16 %v1064_v8, %v1064_v8  ;;  %1464 = vmatprep.subr.bf16.mxu1 %v4339_v40  ;;  %1453 = vmatprep.mubr.bf16.mxu0 %v4081_v3 }
 0x1c1   : > { %v1085_v22 = vrot.slane %v1057_v7, %v4526_v20  ;;  %v1087_v24 = vcombine.high %v1071_v9, %v1071_v9  ;;  %v1088_v25 = vcombine.high %v1078_v11, %v1078_v11  ;;  %v1099_v26 = vpack.c.bf16 %v1078_v11, %v1078_v11  ;;  %1494 = vmatprep.mubr.bf16.mxu1 %v4081_v3  ;;  %v1130_v7 = vld [vmem:[%s4319_s30 + $0x1c] sm:$0x1] }
 0x1c2   : > { %v1100_v23 = vpack.c.bf16 %v1086_v12, %v1086_v12  ;;  %v1102_v21 = vpack.c.bf16 %v1071_v9, %v1071_v9  ;;  %v1110_v16 = vsel %vm4536_vm2, %v1098_v19, %v1109_v14  ;;  %1424 = vmatpush1.bf16.msra.mxu0 %v4341_v41  ;;  %1465 = vmatpush1.bf16.msra.mxu1 %v4345_v42 }
 0x1c3   : > { %v1089_v17 = vcombine.high %v1085_v22, %v1085_v22  ;;  %v1101_v36 = vpack.c.bf16 %v1088_v25, %v1088_v25  ;;  %v1103_v45 = vpack.c.bf16 %v1085_v22, %v1085_v22  ;;  %v1104_v33 = vpack.c.bf16 %v1087_v24, %v1087_v24  ;;  %1111 = vst [vmem:[%s4319_s30] sm:$0x1] %v1110_v16  ;;  %v1134_v22 = vld [vmem:[#allocation2 + $0x8] sm:$0xf0] }
 0x1c4   : > { %1425 = vmatprep.subr.bf16.mxu0 %v4349_v43  ;;  %v1113_v63 = vsel %vm4536_vm2, %v1099_v26, %v1112_v27  ;;  %v1116_v54 = vsel %vm4536_vm2, %v1100_v23, %v1115_v18  ;;  %v1122_v8 = vsel %vm4536_vm2, %v1102_v21, %v1121_v28  ;;  %1466 = vmatprep.subr.bf16.mxu1 %v4351_v44  ;;  %v1141_v24 = vrot.slane %v1133_v15, 4  ;;  %v1136_v27 = vld [vmem:[#allocation2 + $0x18] sm:$0xf0] }
 0x1c5   : > { %v1105_v9 = vpack.c.bf16 %v1089_v17, %v1089_v17  ;;  %1114 = vst [vmem:[%s4319_s30 + $0x4] sm:$0x1] %v1113_v63  ;;  %1117 = vst [vmem:[%s4319_s30 + $0x8] sm:$0x1] %v1116_v54  ;;  %v1119_v11 = vsel %vm4536_vm2, %v1101_v36, %v1118_v30  ;;  %v1125_v12 = vsel %vm4536_vm2, %v1103_v45, %v1124_v31  ;;  %v1142_v25 = vrot.slane %v1134_v22, 4 }
 0x1c6   : > { %1123 = vst [vmem:[%s4319_s30 + $0x10] sm:$0x1] %v1122_v8  ;;  %v1128_v14 = vsel %vm4536_vm2, %v1104_v33, %v1127_v32  ;;  %1120 = vst [vmem:[%s4319_s30 + $0xc] sm:$0x1] %v1119_v11  ;;  %1426 = vmatpush1.bf16.msra.mxu0 %v4356_v46  ;;  %1467 = vmatpush1.bf16.msra.mxu1 %v4358_v47  ;;  %v1149_v26 = vunpack.c.l.bf16 %v1141_v24  ;;  %v1144_v32 = vrot.slane %v1136_v27, 4 }
 0x1c7   : > { %1126 = vst [vmem:[%s4319_s30 + $0x14] sm:$0x1] %v1125_v12  ;;  %1129 = vst [vmem:[%s4319_s30 + $0x18] sm:$0x1] %v1128_v14  ;;  %v1131_v19 = vsel %vm4536_vm2, %v1105_v9, %v1130_v7  ;;  %1427 = vmatprep.subr.bf16.mxu0 %v4362_v48  ;;  %1468 = vmatprep.subr.bf16.mxu1 %v4366_v49  ;;  %v1150_v23 = vunpack.c.l.bf16 %v1142_v25  ;;  %vm3003_vm2 = vsmask.f32 7950 }
 0x1c8   : > { %1132 = vst [vmem:[%s4319_s30 + $0x1c] sm:$0x1] %v1131_v19  ;;  %v1152_v54 = vunpack.c.l.bf16 %v1144_v32 }
 0x1ca   : > { %1428 = vmatpush1.bf16.msra.mxu0 %v4368_v50  ;;  %1469 = vmatpush1.bf16.msra.mxu1 %v4370_v51 }
 0x1cb   : > { %1429 = vmatprep.subr.bf16.mxu0 %v4374_v52  ;;  %1470 = vmatprep.subr.bf16.mxu1 %v4378_v53 }
 0x1ce   : > { %1430 = vmatpush1.bf16.msra.mxu0 %v4385_v55  ;;  %1471 = vmatpush1.bf16.msra.mxu1 %v4387_v56 }
 0x1cf   : > { %1431 = vmatprep.subr.bf16.mxu0 %v4391_v57  ;;  %1472 = vmatprep.subr.bf16.mxu1 %v4393_v58 }
 0x1d2   : > { %1432 = vmatpush1.bf16.msra.mxu0 %v4397_v59  ;;  %1473 = vmatpush1.bf16.msra.mxu1 %v4399_v60 }
 0x1d3   : > { %1433 = vmatprep.subr.bf16.mxu0 %v4403_v61  ;;  %1474 = vmatprep.subr.bf16.mxu1 %v4405_v62 }
 0x1d6   : > { %1434 = vmatpush1.bf16.msra.mxu0 %v4412_v0  ;;  %1475 = vmatpush1.bf16.msra.mxu1 %v4414_v1 }
 0x1d7   : > { %1435 = vmatprep.subr.bf16.mxu0 %v4418_v2  ;;  %1476 = vmatprep.subr.bf16.mxu1 %v4420_v4 }
 0x1da   : > { %1436 = vmatpush1.bf16.msra.mxu0 %v4424_v5  ;;  %1477 = vmatpush1.bf16.msra.mxu1 %v4426_v6 }
 0x1db   : > { %1685 = vmatprep.subr.bf16.mxu0 %v4326_v34  ;;  %1726 = vmatprep.subr.bf16.mxu1 %v4328_v35  ;;  %v1135_v35 = vld [vmem:[#allocation2 + $0x10] sm:$0xf0] }
 0x1dc   : > { %v1143_v8 = vrot.slane %v1135_v35, 4 }
 0x1de   : > { %v1151_v9 = vunpack.c.l.bf16 %v1143_v8 }
 0x290   : > { %v1188_v18 = vpop.f32.mrb[20].mxu0  ;;  %v1229_v28 = vpop.f32.mrb[20].mxu1 }
 0x291   : > { %v1236_v21 = vadd.f32 %v1188_v18, %v1149_v26  ;;  %v1190_v16 = vpop.f32.mrb[21].mxu0  ;;  %v1231_v30 = vpop.f32.mrb[21].mxu1  ;;  %v1238_v12 = vadd.f32 %v1229_v28, %v1151_v9 }
 0x292   : > { %v1237_v31 = vadd.f32 %v1190_v16, %v1150_v23  ;;  %v1192_v17 = vpop.f32.mrb[22].mxu0  ;;  %v1233_v36 = vpop.f32.mrb[22].mxu1  ;;  %v1239_v7 = vadd.f32 %v1231_v30, %v1152_v54 }
 0x293   : > { %v3404_v45 = vmul.f32 -1.442695, %v1236_v21  ;;  %v1193_v34 = vpop.f32.mrb[23].mxu0  ;;  %v1234_v33 = vpop.f32.mrb[23].mxu1 }
 0x294   : > { %v3405_v63 = vmul.f32 -1.442695, %v1237_v31  ;;  %v3406_v11 = vmul.f32 -1.442695, %v1239_v7 }
 0x295   : > { %3755 = vpow2.f32 %v3404_v45 }
 0x296   : > { %3757 = vpow2.f32 %v3405_v63 }
 0x297   : > { %3759 = vpow2.f32 %v3406_v11 }
 0x298   : > { %3761 = vtanh.f32 %v1238_v12 }
 0x29f   : > { %v3756_v14 = vpop.eup %3755 }
 0x2a0   : > { %v3758_v19 = vpop.eup %3757  ;;  %v1243_v15 = vadd.f32 1.0, %v3756_v14 }
 0x2a1   : > { %v1249_v22 = vadd.f32 1.0, %v3758_v19  ;;  %v3760_v24 = vpop.eup %3759 }
 0x2a2   : > { %3763 = vrcp.f32 %v1243_v15  ;;  %v3762_v25 = vpop.eup %3761  ;;  %v1256_v23 = vadd.f32 1.0, %v3760_v24  ;;  %v1388_v24 = vld [vmem:[%s4319_s30] sm:$0x1] }
 0x2a3   : > { %3765 = vrcp.f32 %v1249_v22 }
 0x2a4   : > { %3767 = vrcp.f32 %v1256_v23 }
 0x2ac   : > { %v3764_v26 = vpop.eup %3763 }
 0x2ad   : > { %v3766_v27 = vpop.eup %3765  ;;  %v1260_v18 = vmul.f32 %v3764_v26, %v3762_v25  ;;  %v1391_v25 = vld [vmem:[%s4319_s30 + $0x4] sm:$0x1] }
 0x2ae   : > { %v1259_v21 = vmul.f32 %v3766_v27, %v4522_v29  ;;  %v3768_v28 = vpop.eup %3767 }
 0x2b0   : > { %v4606_v16 = vadd.f32 %v1260_v18, %v1259_v21 }
 0x2b2   : > { %3769 = vtanh.f32 %v4606_v16 }
 0x2bc   : > { %v3770_v30 = vpop.eup %3769 }
 0x2bd   : > { %v1263_v31 = vmul.f32 %v3770_v30, %v3768_v28 }
 0x2bf   : > { %v1265_v32 = vcombine.high %v1263_v31, %v1263_v31  ;;  %v1272_v17 = vrot.slane %v1263_v31, %v4526_v20  ;;  %v1420_v36 = vpack.c.bf16 %v1263_v31, %v1263_v31 }
 0x2c1   : > { %v1279_v45 = vrot.slane %v1265_v32, %v4526_v20  ;;  %v1280_v34 = vcombine.high %v1272_v17, %v1272_v17  ;;  %v1288_v33 = vrot.slane %v1272_v17, %v4526_v20  ;;  %1454 = vmatmul.mubr.bf16.vlgmr.msra.gmra.mrb[24].mxu0 %v1420_v36  ;;  %1495 = vmatmul.mubr.bf16.vlgmr.msra.gmra.mrb[24].mxu1 %v1420_v36  ;;  %v1397_v17 = vld [vmem:[%s4319_s30 + $0xc] sm:$0x1]  ;;  %v1403_v36 = vld [vmem:[%s4319_s30 + $0x14] sm:$0x1] }
 0x2c2   : > { %1686 = vmatpush1.bf16.msra.mxu0 %v4331_v37  ;;  %1727 = vmatpush1.bf16.msra.mxu1 %v4333_v38 }
 0x2c3   : > { %v1281_v29 = vcombine.high %v1279_v45, %v1279_v45  ;;  %v1295_v35 = vrot.slane %v1279_v45, %v4526_v20  ;;  %v1302_v63 = vrot.slane %v1280_v34, %v4526_v20  ;;  %v1310_v54 = vcombine.high %v1288_v33, %v1288_v33  ;;  %1687 = vmatprep.subr.bf16.mxu0 %v4337_v39  ;;  %v1406_v45 = vld [vmem:[%s4319_s30 + $0x18] sm:$0x1] }
 0x2c4   : > { %v3487_v8 = vpack.c.bf16 %v1288_v33, %v1288_v33  ;;  %1728 = vmatprep.subr.bf16.mxu1 %v4339_v40  ;;  %1717 = vmatprep.mubr.bf16.mxu0 %v4081_v3 }
 0x2c5   : > { %v1309_v7 = vrot.slane %v1281_v29, %v4526_v20  ;;  %v1311_v37 = vcombine.high %v1295_v35, %v1295_v35  ;;  %v1312_v9 = vcombine.high %v1302_v63, %v1302_v63  ;;  %v3488_v38 = vpack.c.bf16 %v1302_v63, %v1302_v63  ;;  %1758 = vmatprep.mubr.bf16.mxu1 %v4081_v3 }
 0x2c6   : > { %v3489_v39 = vpack.c.bf16 %v1310_v54, %v1310_v54  ;;  %v3491_v40 = vpack.c.bf16 %v1295_v35, %v1295_v35  ;;  %v1355_v12 = vshll.u32 %v3487_v8, 16  ;;  %1688 = vmatpush1.bf16.msra.mxu0 %v4341_v41  ;;  %1729 = vmatpush1.bf16.msra.mxu1 %v4345_v42  ;;  %v1394_v42 = vld [vmem:[%s4319_s30 + $0x8] sm:$0x1] }
 0x2c7   : > { %v1313_v14 = vcombine.high %v1309_v7, %v1309_v7  ;;  %v3490_v19 = vpack.c.bf16 %v1312_v9, %v1312_v9  ;;  %v3492_v15 = vpack.c.bf16 %v1309_v7, %v1309_v7  ;;  %v3493_v22 = vpack.c.bf16 %v1311_v37, %v1311_v37  ;;  %1689 = vmatprep.subr.bf16.mxu0 %v4349_v43  ;;  %v1400_v43 = vld [vmem:[%s4319_s30 + $0x10] sm:$0x1] }
 0x2c8   : > { %v1358_v26 = vshll.u32 %v3488_v38, 16  ;;  %v1361_v27 = vshll.u32 %v3489_v39, 16  ;;  %v1367_v18 = vshll.u32 %v3491_v40, 16  ;;  %v1389_v41 = vsel %vm4622_vm4, %v1355_v12, %v1388_v24  ;;  %1730 = vmatprep.subr.bf16.mxu1 %v4351_v44 }
 0x2c9   : > { %v3494_v23 = vpack.c.bf16 %v1313_v14, %v1313_v14  ;;  %v1364_v21 = vshll.u32 %v3490_v19, 16  ;;  %v1370_v28 = vshll.u32 %v3492_v15, 16  ;;  %v1373_v30 = vshll.u32 %v3493_v22, 16  ;;  %1390 = vst [vmem:[%s4319_s30] sm:$0x1] %v1389_v41 }
 0x2ca   : > { %v1392_v31 = vsel %vm4622_vm4, %v1358_v26, %v1391_v25  ;;  %v1395_v32 = vsel %vm4622_vm4, %v1361_v27, %v1394_v42  ;;  %v1401_v44 = vsel %vm4622_vm4, %v1367_v18, %v1400_v43  ;;  %1690 = vmatpush1.bf16.msra.mxu0 %v4356_v46  ;;  %1731 = vmatpush1.bf16.msra.mxu1 %v4358_v47  ;;  %v1409_v46 = vld [vmem:[%s4319_s30 + $0x1c] sm:$0x1] }
 0x2cb   : > { %v1376_v34 = vshll.u32 %v3494_v23, 16  ;;  %1393 = vst [vmem:[%s4319_s30 + $0x4] sm:$0x1] %v1392_v31  ;;  %1396 = vst [vmem:[%s4319_s30 + $0x8] sm:$0x1] %v1395_v32  ;;  %v1398_v33 = vsel %vm4622_vm4, %v1364_v21, %v1397_v17  ;;  %v1404_v29 = vsel %vm4622_vm4, %v1370_v28, %v1403_v36  ;;  %v1407_v35 = vsel %vm4622_vm4, %v1373_v30, %v1406_v45 }
 0x2cc   : > { %1402 = vst [vmem:[%s4319_s30 + $0x10] sm:$0x1] %v1401_v44  ;;  %1691 = vmatprep.subr.bf16.mxu0 %v4362_v48  ;;  %1732 = vmatprep.subr.bf16.mxu1 %v4366_v49  ;;  %1399 = vst [vmem:[%s4319_s30 + $0xc] sm:$0x1] %v1398_v33  ;;  %v4685_v48 = vld [vmem:[#allocation10 + $0x4] ss:$16 sps:$4 sm:$0xff]  }
 0x2cd   : > { %1405 = vst [vmem:[%s4319_s30 + $0x14] sm:$0x1] %v1404_v29  ;;  %1408 = vst [vmem:[%s4319_s30 + $0x18] sm:$0x1] %v1407_v35  ;;  %v1410_v47 = vsel %vm4622_vm4, %v1376_v34, %v1409_v46  ;;  %v4688_v49 = vld [vmem:[#allocation10 + $0xc] ss:$16 sps:$4 sm:$0xff]  }
 0x2ce   : > { %1411 = vst [vmem:[%s4319_s30 + $0x1c] sm:$0x1] %v1410_v47  ;;  %1692 = vmatpush1.bf16.msra.mxu0 %v4368_v50  ;;  %1733 = vmatpush1.bf16.msra.mxu1 %v4370_v51  ;;  %v1412_v50 = vld [vmem:[#allocation2 + $0x20] ss:$16 sps:$4 sm:$0xff]   ;;  %v1413_v51 = vld [vmem:[#allocation2 + $0x28] ss:$16 sps:$4 sm:$0xff]   ;;  %vm5161_vm4 = vmand %vm2715_vm15, %vm3003_vm2 }
 0x2cf   : > { %1693 = vmatprep.subr.bf16.mxu0 %v4374_v52  ;;  %1734 = vmatprep.subr.bf16.mxu1 %v4378_v53  ;;  %v1416_v52 = vunpack.c.l.bf16 %v1412_v50  ;;  %v1418_v63 = vunpack.c.h.bf16 %v1412_v50  ;;  %v4701_v28 = vld [vmem:[#allocation10 + $0x8] ss:$16 sps:$4 sm:$0xff]   ;;  %v4706_v17 = vld [vmem:[#allocation10 + $0x24] ss:$16 sps:$4 sm:$0xff]   ;;  %v4709_v36 = vld [vmem:[#allocation10 + $0x2c] ss:$16 sps:$4 sm:$0xff]  }
 0x2d0   : > { %v1640_v46 = vld [vmem:[%s4319_s30] sm:$0x2]  ;;  %v4816_v35 = vld [vmem:[#allocation10 + $0xc8] ss:$16 sps:$4 sm:$0xff]  }
 0x2d2   : > { %1694 = vmatpush1.bf16.msra.mxu0 %v4385_v55  ;;  %1735 = vmatpush1.bf16.msra.mxu1 %v4387_v56  ;;  %v1417_v56 = vunpack.c.l.bf16 %v1413_v51 }
 0x2d3   : > { %1695 = vmatprep.subr.bf16.mxu0 %v4391_v57  ;;  %1736 = vmatprep.subr.bf16.mxu1 %v4393_v58 }
 0x2d6   : > { %1696 = vmatpush1.bf16.msra.mxu0 %v4397_v59  ;;  %1737 = vmatpush1.bf16.msra.mxu1 %v4399_v60 }
 0x2d7   : > { %1697 = vmatprep.subr.bf16.mxu0 %v4403_v61  ;;  %1738 = vmatprep.subr.bf16.mxu1 %v4405_v62 }
 0x2da   : > { %1698 = vmatpush1.bf16.msra.mxu0 %v4412_v0  ;;  %1739 = vmatpush1.bf16.msra.mxu1 %v4414_v1 }
 0x2db   : > { %1699 = vmatprep.subr.bf16.mxu0 %v4418_v2  ;;  %1740 = vmatprep.subr.bf16.mxu1 %v4420_v4 }
 0x2de   : > { %1700 = vmatpush1.bf16.msra.mxu0 %v4424_v5  ;;  %1741 = vmatpush1.bf16.msra.mxu1 %v4426_v6  ;;  %v1419_v5 = vunpack.c.h.bf16 %v1413_v51 }
 0x2df   : > { %1960 = vmatprep.subr.bf16.mxu0 %v4685_v48  ;;  %2001 = vmatprep.subr.bf16.mxu1 %v4688_v49 }
 0x394   : > { %v1455_v53 = vpop.f32.mrb[24].mxu0  ;;  %v1496_v55 = vpop.f32.mrb[24].mxu1 }
 0x395   : > { %v1503_v57 = vadd.f32 %v1455_v53, %v1416_v52  ;;  %v1457_v58 = vpop.f32.mrb[25].mxu0  ;;  %v1498_v59 = vpop.f32.mrb[25].mxu1  ;;  %v1505_v8 = vadd.f32 %v1496_v55, %v1418_v63  ;;  %v1643_v52 = vld [vmem:[%s4319_s30 + $0x4] sm:$0x2]  ;;  %v1646_v53 = vld [vmem:[%s4319_s30 + $0x8] sm:$0x2] }
 0x396   : > { %v1504_v60 = vadd.f32 %v1457_v58, %v1417_v56  ;;  %v1459_v61 = vpop.f32.mrb[26].mxu0  ;;  %v1500_v62 = vpop.f32.mrb[26].mxu1  ;;  %v1506_v6 = vadd.f32 %v1498_v59, %v1419_v5  ;;  %v4724_v55 = vld [vmem:[#allocation10 + $0x20] ss:$16 sps:$4 sm:$0xff]   ;;  %v4727_v56 = vld [vmem:[#allocation10 + $0x28] ss:$16 sps:$4 sm:$0xff]  }
 0x397   : > { %v3415_v0 = vmul.f32 -1.442695, %v1503_v57  ;;  %v1460_v1 = vpop.f32.mrb[27].mxu0  ;;  %v1501_v2 = vpop.f32.mrb[27].mxu1  ;;  %v1649_v61 = vld [vmem:[%s4319_s30 + $0xc] sm:$0x2] }
 0x398   : > { %v3416_v4 = vmul.f32 -1.442695, %v1504_v60  ;;  %v3417_v54 = vmul.f32 -1.442695, %v1506_v6  ;;  %v1652_v62 = vld [vmem:[%s4319_s30 + $0x10] sm:$0x2] }
 0x399   : > { %3771 = vpow2.f32 %v3415_v0  ;;  %v1655_v0 = vld [vmem:[%s4319_s30 + $0x14] sm:$0x2]  ;;  %v1658_v63 = vld [vmem:[%s4319_s30 + $0x18] sm:$0x2] }
 0x39a   : > { %3773 = vpow2.f32 %v3416_v4  ;;  %v4733_v1 = vld [vmem:[#allocation10 + $0x44] ss:$16 sps:$4 sm:$0xff]  }
 0x39b   : > { %3775 = vpow2.f32 %v3417_v54  ;;  %v4739_v54 = vld [vmem:[#allocation10 + $0x4c] ss:$16 sps:$4 sm:$0xff]  }
 0x39c   : > { %3777 = vtanh.f32 %v1505_v8 }
 0x3a3   : > { %v3772_v7 = vpop.eup %3771 }
 0x3a4   : > { %v3774_v37 = vpop.eup %3773  ;;  %v1510_v9 = vadd.f32 1.0, %v3772_v7 }
 0x3a5   : > { %v1516_v38 = vadd.f32 1.0, %v3774_v37  ;;  %v3776_v11 = vpop.eup %3775 }
 0x3a6   : > { %3779 = vrcp.f32 %v1510_v9  ;;  %v3778_v39 = vpop.eup %3777  ;;  %v1523_v19 = vadd.f32 1.0, %v3776_v11 }
 0x3a7   : > { %3781 = vrcp.f32 %v1516_v38 }
 0x3a8   : > { %3783 = vrcp.f32 %v1523_v19 }
 0x3b0   : > { %v3780_v40 = vpop.eup %3779 }
 0x3b1   : > { %v3782_v12 = vpop.eup %3781  ;;  %v1527_v14 = vmul.f32 %v3780_v40, %v3778_v39  ;;  %v1661_v40 = vld [vmem:[%s4319_s30 + $0x1c] sm:$0x2] }
 0x3b2   : > { %v1526_v15 = vmul.f32 %v3782_v12, %v4606_v16  ;;  %v3784_v24 = vpop.eup %3783  ;;  %v4698_v16 = vld [vmem:[#allocation10] ss:$16 sps:$4 sm:$0xff]  }
 0x3b3   : > { %v4750_v12 = vld [vmem:[#allocation10 + $0x40] ss:$16 sps:$4 sm:$0xff]  }
 0x3b4   : > { %v4692_v22 = vadd.f32 %v1527_v14, %v1526_v15  ;;  %v4753_v14 = vld [vmem:[#allocation10 + $0x48] ss:$16 sps:$4 sm:$0xff]  }
 0x3b6   : > { %3785 = vtanh.f32 %v4692_v22 }
 0x3c0   : > { %v3786_v25 = vpop.eup %3785 }
 0x3c1   : > { %v1530_v26 = vmul.f32 %v3786_v25, %v3784_v24 }
 0x3c3   : > { %v1532_v27 = vcombine.high %v1530_v26, %v1530_v26  ;;  %v1539_v18 = vrot.slane %v1530_v26, %v4526_v20  ;;  %v1684_v41 = vpack.c.bf16 %v1530_v26, %v1530_v26  ;;  %v4765_v26 = vld [vmem:[#allocation10 + $0x64] ss:$16 sps:$4 sm:$0xff]  }
 0x3c5   : > { %v1546_v42 = vrot.slane %v1532_v27, %v4526_v20  ;;  %v1547_v23 = vcombine.high %v1539_v18, %v1539_v18  ;;  %v1555_v21 = vrot.slane %v1539_v18, %v4526_v20  ;;  %1718 = vmatmul.mubr.bf16.vlgmr.msra.gmra.mrb[28].mxu0 %v1684_v41  ;;  %1759 = vmatmul.mubr.bf16.vlgmr.msra.gmra.mrb[28].mxu1 %v1684_v41  ;;  %v4768_v27 = vld [vmem:[#allocation10 + $0x6c] ss:$16 sps:$4 sm:$0xff]   ;;  %v4777_v41 = vld [vmem:[#allocation10 + $0x60] ss:$16 sps:$4 sm:$0xff]  }
 0x3c6   : > { %1961 = vmatpush1.bf16.msra.mxu0 %v4698_v16  ;;  %2002 = vmatpush1.bf16.msra.mxu1 %v4701_v28 }
 0x3c7   : > { %v1548_v30 = vcombine.high %v1546_v42, %v1546_v42  ;;  %v1562_v43 = vrot.slane %v1546_v42, %v4526_v20  ;;  %v1569_v31 = vrot.slane %v1547_v23, %v4526_v20  ;;  %v1577_v32 = vcombine.high %v1555_v21, %v1555_v21  ;;  %1962 = vmatprep.subr.bf16.mxu0 %v4706_v17  ;;  %v4780_v42 = vld [vmem:[#allocation10 + $0x68] ss:$16 sps:$4 sm:$0xff]   ;;  %v4783_v23 = vld [vmem:[#allocation10 + $0x84] ss:$16 sps:$4 sm:$0xff]  }
 0x3c8   : > { %v3495_v44 = vpack.c.bf16 %v1555_v21, %v1555_v21  ;;  %2003 = vmatprep.subr.bf16.mxu1 %v4709_v36  ;;  %1992 = vmatprep.mubr.bf16.mxu0 %v4081_v3  ;;  %v4786_v21 = vld [vmem:[#allocation10 + $0x8c] ss:$16 sps:$4 sm:$0xff]  }
 0x3c9   : > { %v1576_v45 = vrot.slane %v1548_v30, %v4526_v20  ;;  %v1578_v34 = vcombine.high %v1562_v43, %v1562_v43  ;;  %v1579_v33 = vcombine.high %v1569_v31, %v1569_v31  ;;  %v3496_v29 = vpack.c.bf16 %v1569_v31, %v1569_v31  ;;  %2033 = vmatprep.mubr.bf16.mxu1 %v4081_v3  ;;  %v4789_v30 = vld [vmem:[#allocation10 + $0x80] ss:$16 sps:$4 sm:$0xff]   ;;  %v4795_v31 = vld [vmem:[#allocation10 + $0xa4] ss:$16 sps:$4 sm:$0xff]  }
 0x3ca   : > { %v3497_v47 = vpack.c.bf16 %v1577_v32, %v1577_v32  ;;  %v3499_v50 = vpack.c.bf16 %v1562_v43, %v1562_v43  ;;  %v1621_v51 = vrot.slane %v3495_v44, 7  ;;  %1963 = vmatpush1.bf16.msra.mxu0 %v4724_v55  ;;  %2004 = vmatpush1.bf16.msra.mxu1 %v4727_v56  ;;  %v4792_v43 = vld [vmem:[#allocation10 + $0x88] ss:$16 sps:$4 sm:$0xff]   ;;  %v4798_v32 = vld [vmem:[#allocation10 + $0xac] ss:$16 sps:$4 sm:$0xff]  }
 0x3cb   : > { %v1580_v57 = vcombine.high %v1576_v45, %v1576_v45  ;;  %v3498_v58 = vpack.c.bf16 %v1579_v33, %v1579_v33  ;;  %v3500_v59 = vpack.c.bf16 %v1576_v45, %v1576_v45  ;;  %v3501_v60 = vpack.c.bf16 %v1578_v34, %v1578_v34  ;;  %1964 = vmatprep.subr.bf16.mxu0 %v4733_v1  ;;  %v4801_v44 = vld [vmem:[#allocation10 + $0xa0] ss:$16 sps:$4 sm:$0xff]   ;;  %v4804_v45 = vld [vmem:[#allocation10 + $0xa8] ss:$16 sps:$4 sm:$0xff]   ;;  %v4807_v34 = vld [vmem:[#allocation10 + $0xc4] ss:$16 sps:$4 sm:$0xff]  }
 0x3cc   : > { %v1622_v2 = vrot.slane %v3496_v29, 7  ;;  %v1623_v4 = vrot.slane %v3497_v47, 7  ;;  %v1625_v5 = vrot.slane %v3499_v50, 7  ;;  %v1641_v6 = vsel %vm4716_vm7, %v1621_v51, %v1640_v46  ;;  %2005 = vmatprep.subr.bf16.mxu1 %v4739_v54  ;;  %v4810_v33 = vld [vmem:[#allocation10 + $0xcc] ss:$16 sps:$4 sm:$0xff]  }
 0x3cd   : > { %v3502_v8 = vpack.c.bf16 %v1580_v57, %v1580_v57  ;;  %v1624_v7 = vrot.slane %v3498_v58, 7  ;;  %v1626_v37 = vrot.slane %v3500_v59, 7  ;;  %v1627_v9 = vrot.slane %v3501_v60, 7  ;;  %1642 = vst [vmem:[%s4319_s30] sm:$0x2] %v1641_v6  ;;  %v4813_v29 = vld [vmem:[#allocation10 + $0xc0] ss:$16 sps:$4 sm:$0xff]  }
 0x3ce   : > { %v1644_v38 = vsel %vm4716_vm7, %v1622_v2, %v1643_v52  ;;  %v1647_v11 = vsel %vm4716_vm7, %v1623_v4, %v1646_v53  ;;  %v1653_v39 = vsel %vm4716_vm7, %v1625_v5, %v1652_v62  ;;  %1965 = vmatpush1.bf16.msra.mxu0 %v4750_v12  ;;  %2006 = vmatpush1.bf16.msra.mxu1 %v4753_v14  ;;  %v4819_v46 = vld [vmem:[#allocation10 + $0xe4] ss:$16 sps:$4 sm:$0xff]   ;;  %v4822_v47 = vld [vmem:[#allocation10 + $0xec] ss:$16 sps:$4 sm:$0xff]   ;;  %v4825_v50 = vld [vmem:[#allocation10 + $0xe0] ss:$16 sps:$4 sm:$0xff]  }
 0x3cf   : > { %v1628_v19 = vrot.slane %v3502_v8, 7  ;;  %1645 = vst [vmem:[%s4319_s30 + $0x4] sm:$0x2] %v1644_v38  ;;  %1648 = vst [vmem:[%s4319_s30 + $0x8] sm:$0x2] %v1647_v11  ;;  %v1650_v15 = vsel %vm4716_vm7, %v1624_v7, %v1649_v61  ;;  %v1656_v24 = vsel %vm4716_vm7, %v1626_v37, %v1655_v0  ;;  %v1659_v25 = vsel %vm4716_vm7, %v1627_v9, %v1658_v63 }
 0x3d0   : > { %1654 = vst [vmem:[%s4319_s30 + $0x10] sm:$0x2] %v1653_v39  ;;  %1966 = vmatprep.subr.bf16.mxu0 %v4765_v26  ;;  %2007 = vmatprep.subr.bf16.mxu1 %v4768_v27  ;;  %1651 = vst [vmem:[%s4319_s30 + $0xc] sm:$0x2] %v1650_v15  ;;  %v4828_v51 = vld [vmem:[#allocation10 + $0xe8] ss:$16 sps:$4 sm:$0xff]  }
 0x3d1   : > { %1657 = vst [vmem:[%s4319_s30 + $0x14] sm:$0x2] %v1656_v24  ;;  %1660 = vst [vmem:[%s4319_s30 + $0x18] sm:$0x2] %v1659_v25  ;;  %v1662_v18 = vsel %vm4716_vm7, %v1628_v19, %v1661_v40  ;;  %v1664_v52 = vld [vmem:[#allocation2 + $0x20] sm:$0xf0] }
 0x3d2   : > { %1663 = vst [vmem:[%s4319_s30 + $0x1c] sm:$0x2] %v1662_v18  ;;  %1967 = vmatpush1.bf16.msra.mxu0 %v4777_v41  ;;  %2008 = vmatpush1.bf16.msra.mxu1 %v4780_v42  ;;  %v1665_v53 = vld [vmem:[#allocation2 + $0x28] sm:$0xf0]  ;;  %v1672_v57 = vrot.slane %v1664_v52, 4 }
 0x3d3   : > { %1968 = vmatprep.subr.bf16.mxu0 %v4783_v23  ;;  %2009 = vmatprep.subr.bf16.mxu1 %v4786_v21  ;;  %v1673_v58 = vrot.slane %v1665_v53, 4  ;;  %v1667_v60 = vld [vmem:[#allocation2 + $0x38] sm:$0xf0]  ;;  %v1666_v11 = vld [vmem:[#allocation2 + $0x30] sm:$0xf0] }
 0x3d4   : > { %v1680_v59 = vunpack.c.l.bf16 %v1672_v57  ;;  %v1675_v63 = vrot.slane %v1667_v60, 4  ;;  %v1674_v19 = vrot.slane %v1666_v11, 4 }
 0x3d5   : > { %v1681_v0 = vunpack.c.l.bf16 %v1673_v58 }
 0x3d6   : > { %1969 = vmatpush1.bf16.msra.mxu0 %v4789_v30  ;;  %2010 = vmatpush1.bf16.msra.mxu1 %v4792_v43  ;;  %v1683_v40 = vunpack.c.l.bf16 %v1675_v63  ;;  %v1682_v24 = vunpack.c.l.bf16 %v1674_v19 }
 0x3d7   : > { %1970 = vmatprep.subr.bf16.mxu0 %v4795_v31  ;;  %2011 = vmatprep.subr.bf16.mxu1 %v4798_v32 }
 0x3da   : > { %1971 = vmatpush1.bf16.msra.mxu0 %v4801_v44  ;;  %2012 = vmatpush1.bf16.msra.mxu1 %v4804_v45 }
 0x3db   : > { %1972 = vmatprep.subr.bf16.mxu0 %v4807_v34  ;;  %2013 = vmatprep.subr.bf16.mxu1 %v4810_v33 }
 0x3de   : > { %1973 = vmatpush1.bf16.msra.mxu0 %v4813_v29  ;;  %2014 = vmatpush1.bf16.msra.mxu1 %v4816_v35 }
 0x3df   : > { %1974 = vmatprep.subr.bf16.mxu0 %v4819_v46  ;;  %2015 = vmatprep.subr.bf16.mxu1 %v4822_v47 }
 0x3e2   : > { %1975 = vmatpush1.bf16.msra.mxu0 %v4825_v50  ;;  %2016 = vmatpush1.bf16.msra.mxu1 %v4828_v51 }
 0x3e3   : > { %2224 = vmatprep.subr.bf16.mxu0 %v4685_v48  ;;  %2265 = vmatprep.subr.bf16.mxu1 %v4688_v49 }
 0x498   : > { %v1719_v61 = vpop.f32.mrb[28].mxu0  ;;  %v1760_v62 = vpop.f32.mrb[28].mxu1 }
 0x499   : > { %v1767_v2 = vadd.f32 %v1719_v61, %v1680_v59  ;;  %v1721_v4 = vpop.f32.mrb[29].mxu0  ;;  %v1762_v5 = vpop.f32.mrb[29].mxu1  ;;  %v1769_v18 = vadd.f32 %v1760_v62, %v1682_v24 }
 0x49a   : > { %v1768_v6 = vadd.f32 %v1721_v4, %v1681_v0  ;;  %v1723_v8 = vpop.f32.mrb[30].mxu0  ;;  %v1764_v7 = vpop.f32.mrb[30].mxu1  ;;  %v1770_v15 = vadd.f32 %v1762_v5, %v1683_v40 }
 0x49b   : > { %v3426_v37 = vmul.f32 -1.442695, %v1767_v2  ;;  %v1724_v9 = vpop.f32.mrb[31].mxu0  ;;  %v1765_v38 = vpop.f32.mrb[31].mxu1 }
 0x49c   : > { %v3427_v39 = vmul.f32 -1.442695, %v1768_v6  ;;  %v3428_v25 = vmul.f32 -1.442695, %v1770_v15 }
 0x49d   : > { %3787 = vpow2.f32 %v3426_v37 }
 0x49e   : > { %3789 = vpow2.f32 %v3427_v39 }
 0x49f   : > { %3791 = vpow2.f32 %v3428_v25 }
 0x4a0   : > { %3793 = vtanh.f32 %v1769_v18 }
 0x4a7   : > { %v3788_v52 = vpop.eup %3787 }
 0x4a8   : > { %v3790_v53 = vpop.eup %3789  ;;  %v1774_v57 = vadd.f32 1.0, %v3788_v52 }
 0x4a9   : > { %v1780_v58 = vadd.f32 1.0, %v3790_v53  ;;  %v3792_v59 = vpop.eup %3791 }
 0x4aa   : > { %3795 = vrcp.f32 %v1774_v57  ;;  %v3794_v60 = vpop.eup %3793  ;;  %v1787_v4 = vadd.f32 1.0, %v3792_v59 }
 0x4ab   : > { %3797 = vrcp.f32 %v1780_v58 }
 0x4ac   : > { %3799 = vrcp.f32 %v1787_v4  ;;  %v1951_v4 = vld [vmem:[#allocation2 + $0x40] ss:$16 sps:$4 sm:$0xff]  }
 0x4b4   : > { %v3796_v61 = vpop.eup %3795 }
 0x4b5   : > { %v3798_v0 = vpop.eup %3797  ;;  %v1791_v2 = vmul.f32 %v3796_v61, %v3794_v60 }
 0x4b6   : > { %v1790_v6 = vmul.f32 %v3798_v0, %v4692_v22  ;;  %v3800_v62 = vpop.eup %3799 }
 0x4b8   : > { %v4834_v5 = vadd.f32 %v1791_v2, %v1790_v6 }
 0x4ba   : > { %3801 = vtanh.f32 %v4834_v5 }
 0x4c4   : > { %v3802_v63 = vpop.eup %3801 }
 0x4c5   : > { %v1794_v8 = vmul.f32 %v3802_v63, %v3800_v62 }
 0x4c7   : > { %v1796_v7 = vcombine.high %v1794_v8, %v1794_v8  ;;  %v1803_v37 = vrot.slane %v1794_v8, %v4526_v20  ;;  %v1959_v9 = vpack.c.bf16 %v1794_v8, %v1794_v8 }
 0x4c9   : > { %v1810_v38 = vrot.slane %v1796_v7, %v4526_v20  ;;  %v1811_v11 = vcombine.high %v1803_v37, %v1803_v37  ;;  %v1819_v39 = vrot.slane %v1803_v37, %v4526_v20  ;;  %1993 = vmatmul.mubr.bf16.vlgmr.msra.gmra.mrb[32].mxu0 %v1959_v9  ;;  %2034 = vmatmul.mubr.bf16.vlgmr.msra.gmra.mrb[32].mxu1 %v1959_v9  ;;  %v1927_v7 = vld [vmem:[%s4319_s30] sm:$0x2] }
 0x4ca   : > { %2225 = vmatpush1.bf16.msra.mxu0 %v4698_v16  ;;  %2266 = vmatpush1.bf16.msra.mxu1 %v4701_v28 }
 0x4cb   : > { %v1812_v22 = vcombine.high %v1810_v38, %v1810_v38  ;;  %v1826_v40 = vrot.slane %v1810_v38, %v4526_v20  ;;  %v1833_v19 = vrot.slane %v1811_v11, %v4526_v20  ;;  %v1841_v15 = vcombine.high %v1819_v39, %v1819_v39  ;;  %2226 = vmatprep.subr.bf16.mxu0 %v4706_v17 }
 0x4cc   : > { %v3503_v24 = vpack.c.bf16 %v1819_v39, %v1819_v39  ;;  %2267 = vmatprep.subr.bf16.mxu1 %v4709_v36  ;;  %2256 = vmatprep.mubr.bf16.mxu0 %v4081_v3  ;;  %v1930_v39 = vld [vmem:[%s4319_s30 + $0x4] sm:$0x2] }
 0x4cd   : > { %v1840_v25 = vrot.slane %v1812_v22, %v4526_v20  ;;  %v1842_v18 = vcombine.high %v1826_v40, %v1826_v40  ;;  %v1843_v52 = vcombine.high %v1833_v19, %v1833_v19  ;;  %v3504_v53 = vpack.c.bf16 %v1833_v19, %v1833_v19  ;;  %2297 = vmatprep.mubr.bf16.mxu1 %v4081_v3 }
 0x4ce   : > { %v3505_v57 = vpack.c.bf16 %v1841_v15, %v1841_v15  ;;  %v3507_v58 = vpack.c.bf16 %v1826_v40, %v1826_v40  ;;  %v1886_v59 = vshll.u32 %v3503_v24, 16  ;;  %2227 = vmatpush1.bf16.msra.mxu0 %v4724_v55  ;;  %2268 = vmatpush1.bf16.msra.mxu1 %v4727_v56  ;;  %v1933_v24 = vld [vmem:[%s4319_s30 + $0x8] sm:$0x2] }
 0x4cf   : > { %v1844_v60 = vcombine.high %v1840_v25, %v1840_v25  ;;  %v3506_v61 = vpack.c.bf16 %v1843_v52, %v1843_v52  ;;  %v3508_v0 = vpack.c.bf16 %v1840_v25, %v1840_v25  ;;  %v3509_v2 = vpack.c.bf16 %v1842_v18, %v1842_v18  ;;  %2228 = vmatprep.subr.bf16.mxu0 %v4733_v1 }
 0x4d0   : > { %v1888_v6 = vrot.slane %v1886_v59, 7  ;;  %v1890_v62 = vshll.u32 %v3504_v53, 16  ;;  %v1894_v63 = vshll.u32 %v3505_v57, 16  ;;  %v1902_v8 = vshll.u32 %v3507_v58, 16  ;;  %2269 = vmatprep.subr.bf16.mxu1 %v4739_v54  ;;  %v1939_v57 = vld [vmem:[%s4319_s30 + $0x10] sm:$0x2] }
 0x4d1   : > { %v3510_v37 = vpack.c.bf16 %v1844_v60, %v1844_v60  ;;  %v1898_v9 = vshll.u32 %v3506_v61, 16  ;;  %v1906_v38 = vshll.u32 %v3508_v0, 16  ;;  %v1910_v11 = vshll.u32 %v3509_v2, 16  ;;  %v1936_v60 = vld [vmem:[%s4319_s30 + $0xc] sm:$0x2] }
 0x4d2   : > { %v1892_v22 = vrot.slane %v1890_v62, 7  ;;  %v1896_v40 = vrot.slane %v1894_v63, 7  ;;  %v1904_v19 = vrot.slane %v1902_v8, 7  ;;  %v1928_v15 = vsel %vm4853_vm9, %v1888_v6, %v1927_v7  ;;  %2229 = vmatpush1.bf16.msra.mxu0 %v4750_v12  ;;  %2270 = vmatpush1.bf16.msra.mxu1 %v4753_v14  ;;  %v1942_v0 = vld [vmem:[%s4319_s30 + $0x14] sm:$0x2] }
 0x4d3   : > { %v1900_v25 = vrot.slane %v1898_v9, 7  ;;  %v1908_v18 = vrot.slane %v1906_v38, 7  ;;  %v1912_v52 = vrot.slane %v1910_v11, 7  ;;  %v1914_v53 = vshll.u32 %v3510_v37, 16  ;;  %1929 = vst [vmem:[%s4319_s30] sm:$0x2] %v1928_v15  ;;  %2230 = vmatprep.subr.bf16.mxu0 %v4765_v26  ;;  %2271 = vmatprep.subr.bf16.mxu1 %v4768_v27 }
 0x4d4   : > { %v1931_v58 = vsel %vm4853_vm9, %v1892_v22, %v1930_v39  ;;  %v1934_v59 = vsel %vm4853_vm9, %v1896_v40, %v1933_v24  ;;  %v1940_v61 = vsel %vm4853_vm9, %v1904_v19, %v1939_v57  ;;  %v1945_v2 = vld [vmem:[%s4319_s30 + $0x18] sm:$0x2]  ;;  %v1948_v7 = vld [vmem:[%s4319_s30 + $0x1c] sm:$0x2]  ;;  %v1955_v38 = vunpack.c.l.bf16 %v1951_v4 }
 0x4d5   : > { %v1916_v6 = vrot.slane %v1914_v53, 7  ;;  %1932 = vst [vmem:[%s4319_s30 + $0x4] sm:$0x2] %v1931_v58  ;;  %1935 = vst [vmem:[%s4319_s30 + $0x8] sm:$0x2] %v1934_v59  ;;  %v1937_v62 = vsel %vm4853_vm9, %v1900_v25, %v1936_v60  ;;  %v1943_v63 = vsel %vm4853_vm9, %v1908_v18, %v1942_v0  ;;  %v1946_v8 = vsel %vm4853_vm9, %v1912_v52, %v1945_v2 }
 0x4d6   : > { %1941 = vst [vmem:[%s4319_s30 + $0x10] sm:$0x2] %v1940_v61  ;;  %1938 = vst [vmem:[%s4319_s30 + $0xc] sm:$0x2] %v1937_v62  ;;  %2231 = vmatpush1.bf16.msra.mxu0 %v4777_v41  ;;  %2272 = vmatpush1.bf16.msra.mxu1 %v4780_v42  ;;  %v1952_v9 = vld [vmem:[#allocation2 + $0x48] ss:$16 sps:$4 sm:$0xff]   ;;  %v1957_v61 = vunpack.c.h.bf16 %v1951_v4 }
 0x4d7   : > { %1944 = vst [vmem:[%s4319_s30 + $0x14] sm:$0x2] %v1943_v63  ;;  %1947 = vst [vmem:[%s4319_s30 + $0x18] sm:$0x2] %v1946_v8  ;;  %v1949_v37 = vsel %vm4853_vm9, %v1916_v6, %v1948_v7  ;;  %2232 = vmatprep.subr.bf16.mxu0 %v4783_v23  ;;  %2273 = vmatprep.subr.bf16.mxu1 %v4786_v21  ;;  %v1956_v22 = vunpack.c.l.bf16 %v1952_v9  ;;  %v1958_v59 = vunpack.c.h.bf16 %v1952_v9 }
 0x4d8   : > { %1950 = vst [vmem:[%s4319_s30 + $0x1c] sm:$0x2] %v1949_v37 }
 0x4da   : > { %2233 = vmatpush1.bf16.msra.mxu0 %v4789_v30  ;;  %2274 = vmatpush1.bf16.msra.mxu1 %v4792_v43 }
 0x4db   : > { %2234 = vmatprep.subr.bf16.mxu0 %v4795_v31  ;;  %2275 = vmatprep.subr.bf16.mxu1 %v4798_v32 }
 0x4de   : > { %2235 = vmatpush1.bf16.msra.mxu0 %v4801_v44  ;;  %2276 = vmatpush1.bf16.msra.mxu1 %v4804_v45 }
 0x4df   : > { %2236 = vmatprep.subr.bf16.mxu0 %v4807_v34  ;;  %2277 = vmatprep.subr.bf16.mxu1 %v4810_v33 }
 0x4e2   : > { %2237 = vmatpush1.bf16.msra.mxu0 %v4813_v29  ;;  %2278 = vmatpush1.bf16.msra.mxu1 %v4816_v35 }
 0x4e3   : > { %2238 = vmatprep.subr.bf16.mxu0 %v4819_v46  ;;  %2279 = vmatprep.subr.bf16.mxu1 %v4822_v47 }
 0x4e6   : > { %2239 = vmatpush1.bf16.msra.mxu0 %v4825_v50  ;;  %2280 = vmatpush1.bf16.msra.mxu1 %v4828_v51 }
 0x4e7   : > { %2499 = vmatprep.subr.bf16.mxu0 %v4685_v48  ;;  %2540 = vmatprep.subr.bf16.mxu1 %v4688_v49 }
 0x59c   : > { %v1994_v11 = vpop.f32.mrb[32].mxu0  ;;  %v2035_v39 = vpop.f32.mrb[32].mxu1 }
 0x59d   : > { %v2042_v40 = vadd.f32 %v1994_v11, %v1955_v38  ;;  %v1996_v19 = vpop.f32.mrb[33].mxu0  ;;  %v2037_v15 = vpop.f32.mrb[33].mxu1  ;;  %v2044_v2 = vadd.f32 %v2035_v39, %v1957_v61 }
 0x59e   : > { %v2043_v24 = vadd.f32 %v1996_v19, %v1956_v22  ;;  %v1998_v25 = vpop.f32.mrb[34].mxu0  ;;  %v2039_v18 = vpop.f32.mrb[34].mxu1  ;;  %v2045_v60 = vadd.f32 %v2037_v15, %v1958_v59 }
 0x59f   : > { %v3437_v52 = vmul.f32 -1.442695, %v2042_v40  ;;  %v1999_v53 = vpop.f32.mrb[35].mxu0  ;;  %v2040_v57 = vpop.f32.mrb[35].mxu1 }
 0x5a0   : > { %v3438_v58 = vmul.f32 -1.442695, %v2043_v24  ;;  %v3439_v0 = vmul.f32 -1.442695, %v2045_v60 }
 0x5a1   : > { %3803 = vpow2.f32 %v3437_v52 }
 0x5a2   : > { %3805 = vpow2.f32 %v3438_v58 }
 0x5a3   : > { %3807 = vpow2.f32 %v3439_v0 }
 0x5a4   : > { %3809 = vtanh.f32 %v2044_v2 }
 0x5ab   : > { %v3804_v6 = vpop.eup %3803 }
 0x5ac   : > { %v3806_v62 = vpop.eup %3805  ;;  %v2049_v63 = vadd.f32 1.0, %v3804_v6 }
 0x5ad   : > { %v2055_v8 = vadd.f32 1.0, %v3806_v62  ;;  %v3808_v7 = vpop.eup %3807 }
 0x5ae   : > { %3811 = vrcp.f32 %v2049_v63  ;;  %v3810_v37 = vpop.eup %3809  ;;  %v2062_v40 = vadd.f32 1.0, %v3808_v7  ;;  %v2203_v63 = vld [vmem:[#allocation2 + $0x40] sm:$0xf0] }
 0x5af   : > { %3813 = vrcp.f32 %v2055_v8  ;;  %v2179_v8 = vld [vmem:[%s4319_s30] sm:$0x4] }
 0x5b0   : > { %3815 = vrcp.f32 %v2062_v40 }
 0x5b8   : > { %v3812_v38 = vpop.eup %3811 }
 0x5b9   : > { %v3814_v11 = vpop.eup %3813  ;;  %v2066_v22 = vmul.f32 %v3812_v38, %v3810_v37 }
 0x5ba   : > { %v2065_v9 = vmul.f32 %v3814_v11, %v4834_v5  ;;  %v3816_v4 = vpop.eup %3815  ;;  %v2182_v11 = vld [vmem:[%s4319_s30 + $0x4] sm:$0x4] }
 0x5bc   : > { %v4916_v19 = vadd.f32 %v2066_v22, %v2065_v9  ;;  %v2185_v22 = vld [vmem:[%s4319_s30 + $0x8] sm:$0x4] }
 0x5be   : > { %3817 = vtanh.f32 %v4916_v19 }
 0x5c8   : > { %v3818_v39 = vpop.eup %3817 }
 0x5c9   : > { %v2069_v15 = vmul.f32 %v3818_v39, %v3816_v4 }
 0x5cb   : > { %v2071_v24 = vcombine.high %v2069_v15, %v2069_v15  ;;  %v2078_v25 = vrot.slane %v2069_v15, %v4526_v20  ;;  %v2223_v18 = vpack.c.bf16 %v2069_v15, %v2069_v15  ;;  %v2188_v15 = vld [vmem:[%s4319_s30 + $0xc] sm:$0x4] }
 0x5cd   : > { %v2085_v52 = vrot.slane %v2071_v24, %v4526_v20  ;;  %v2086_v53 = vcombine.high %v2078_v25, %v2078_v25  ;;  %v2094_v57 = vrot.slane %v2078_v25, %v4526_v20  ;;  %2257 = vmatmul.mubr.bf16.vlgmr.msra.gmra.mrb[36].mxu0 %v2223_v18  ;;  %2298 = vmatmul.mubr.bf16.vlgmr.msra.gmra.mrb[36].mxu1 %v2223_v18  ;;  %v2191_v24 = vld [vmem:[%s4319_s30 + $0x10] sm:$0x4]  ;;  %v2194_v25 = vld [vmem:[%s4319_s30 + $0x14] sm:$0x4] }
 0x5ce   : > { %2500 = vmatpush1.bf16.msra.mxu0 %v4698_v16  ;;  %2541 = vmatpush1.bf16.msra.mxu1 %v4701_v28 }
 0x5cf   : > { %v2087_v5 = vcombine.high %v2085_v52, %v2085_v52  ;;  %v2101_v58 = vrot.slane %v2085_v52, %v4526_v20  ;;  %v2108_v59 = vrot.slane %v2086_v53, %v4526_v20  ;;  %v2116_v60 = vcombine.high %v2094_v57, %v2094_v57  ;;  %2501 = vmatprep.subr.bf16.mxu0 %v4706_v17 }
 0x5d0   : > { %v3511_v61 = vpack.c.bf16 %v2094_v57, %v2094_v57  ;;  %2542 = vmatprep.subr.bf16.mxu1 %v4709_v36  ;;  %2531 = vmatprep.mubr.bf16.mxu0 %v4081_v3 }
 0x5d1   : > { %v2115_v0 = vrot.slane %v2087_v5, %v4526_v20  ;;  %v2117_v2 = vcombine.high %v2101_v58, %v2101_v58  ;;  %v2118_v6 = vcombine.high %v2108_v59, %v2108_v59  ;;  %v3512_v62 = vpack.c.bf16 %v2108_v59, %v2108_v59  ;;  %2572 = vmatprep.mubr.bf16.mxu1 %v4081_v3  ;;  %v2197_v5 = vld [vmem:[%s4319_s30 + $0x18] sm:$0x4] }
 0x5d2   : > { %v3513_v7 = vpack.c.bf16 %v2116_v60, %v2116_v60  ;;  %v3515_v37 = vpack.c.bf16 %v2101_v58, %v2101_v58  ;;  %v2160_v38 = vrot.slane %v3511_v61, 6  ;;  %2502 = vmatpush1.bf16.msra.mxu0 %v4724_v55  ;;  %2543 = vmatpush1.bf16.msra.mxu1 %v4727_v56 }
 0x5d3   : > { %v2119_v40 = vcombine.high %v2115_v0, %v2115_v0  ;;  %v3514_v9 = vpack.c.bf16 %v2118_v6, %v2118_v6  ;;  %v3516_v4 = vpack.c.bf16 %v2115_v0, %v2115_v0  ;;  %v3517_v39 = vpack.c.bf16 %v2117_v2, %v2117_v2  ;;  %2503 = vmatprep.subr.bf16.mxu0 %v4733_v1 }
 0x5d4   : > { %v2161_v18 = vrot.slane %v3512_v62, 6  ;;  %v2162_v52 = vrot.slane %v3513_v7, 6  ;;  %v2164_v53 = vrot.slane %v3515_v37, 6  ;;  %v2180_v57 = vsel %vm4932_vm12, %v2160_v38, %v2179_v8  ;;  %2544 = vmatprep.subr.bf16.mxu1 %v4739_v54  ;;  %v2200_v62 = vld [vmem:[%s4319_s30 + $0x1c] sm:$0x4] }
 0x5d5   : > { %v3518_v58 = vpack.c.bf16 %v2119_v40, %v2119_v40  ;;  %v2163_v59 = vrot.slane %v3514_v9, 6  ;;  %v2165_v60 = vrot.slane %v3516_v4, 6  ;;  %v2166_v61 = vrot.slane %v3517_v39, 6  ;;  %2181 = vst [vmem:[%s4319_s30] sm:$0x4] %v2180_v57  ;;  %v2206_v39 = vld [vmem:[#allocation2 + $0x58] sm:$0xf0] }
 0x5d6   : > { %v2183_v0 = vsel %vm4932_vm12, %v2161_v18, %v2182_v11  ;;  %v2186_v2 = vsel %vm4932_vm12, %v2162_v52, %v2185_v22  ;;  %v2192_v6 = vsel %vm4932_vm12, %v2164_v53, %v2191_v24  ;;  %2504 = vmatpush1.bf16.msra.mxu0 %v4750_v12  ;;  %2545 = vmatpush1.bf16.msra.mxu1 %v4753_v14  ;;  %v2204_v22 = vld [vmem:[#allocation2 + $0x48] sm:$0xf0]  ;;  %v2211_v40 = vrot.slane %v2203_v63, 4 }
 0x5d7   : > { %v2167_v8 = vrot.slane %v3518_v58, 6  ;;  %2184 = vst [vmem:[%s4319_s30 + $0x4] sm:$0x4] %v2183_v0  ;;  %2187 = vst [vmem:[%s4319_s30 + $0x8] sm:$0x4] %v2186_v2  ;;  %v2189_v7 = vsel %vm4932_vm12, %v2163_v59, %v2188_v15  ;;  %v2195_v37 = vsel %vm4932_vm12, %v2165_v60, %v2194_v25  ;;  %v2198_v38 = vsel %vm4932_vm12, %v2166_v61, %v2197_v5 }
 0x5d8   : > { %2193 = vst [vmem:[%s4319_s30 + $0x10] sm:$0x4] %v2192_v6  ;;  %2505 = vmatprep.subr.bf16.mxu0 %v4765_v26  ;;  %2546 = vmatprep.subr.bf16.mxu1 %v4768_v27  ;;  %2190 = vst [vmem:[%s4319_s30 + $0xc] sm:$0x4] %v2189_v7  ;;  %v2212_v9 = vrot.slane %v2204_v22, 4  ;;  %v2219_v4 = vunpack.c.l.bf16 %v2211_v40  ;;  %v2214_v5 = vrot.slane %v2206_v39, 4 }
 0x5d9   : > { %2196 = vst [vmem:[%s4319_s30 + $0x14] sm:$0x4] %v2195_v37  ;;  %2199 = vst [vmem:[%s4319_s30 + $0x18] sm:$0x4] %v2198_v38  ;;  %v2201_v11 = vsel %vm4932_vm12, %v2167_v8, %v2200_v62 }
 0x5da   : > { %2202 = vst [vmem:[%s4319_s30 + $0x1c] sm:$0x4] %v2201_v11  ;;  %2506 = vmatpush1.bf16.msra.mxu0 %v4777_v41  ;;  %2547 = vmatpush1.bf16.msra.mxu1 %v4780_v42  ;;  %v2220_v25 = vunpack.c.l.bf16 %v2212_v9  ;;  %v2222_v2 = vunpack.c.l.bf16 %v2214_v5 }
 0x5db   : > { %2507 = vmatprep.subr.bf16.mxu0 %v4783_v23  ;;  %2548 = vmatprep.subr.bf16.mxu1 %v4786_v21 }
 0x5de   : > { %2508 = vmatpush1.bf16.msra.mxu0 %v4789_v30  ;;  %2549 = vmatpush1.bf16.msra.mxu1 %v4792_v43 }
 0x5df   : > { %2509 = vmatprep.subr.bf16.mxu0 %v4795_v31  ;;  %2550 = vmatprep.subr.bf16.mxu1 %v4798_v32 }
 0x5e2   : > { %2510 = vmatpush1.bf16.msra.mxu0 %v4801_v44  ;;  %2551 = vmatpush1.bf16.msra.mxu1 %v4804_v45 }
 0x5e3   : > { %2511 = vmatprep.subr.bf16.mxu0 %v4807_v34  ;;  %2552 = vmatprep.subr.bf16.mxu1 %v4810_v33 }
 0x5e6   : > { %2512 = vmatpush1.bf16.msra.mxu0 %v4813_v29  ;;  %2553 = vmatpush1.bf16.msra.mxu1 %v4816_v35 }
 0x5e7   : > { %2513 = vmatprep.subr.bf16.mxu0 %v4819_v46  ;;  %2554 = vmatprep.subr.bf16.mxu1 %v4822_v47 }
 0x5ea   : > { %2514 = vmatpush1.bf16.msra.mxu0 %v4825_v50  ;;  %2555 = vmatpush1.bf16.msra.mxu1 %v4828_v51 }
 0x5eb   : > { %2763 = vmatprep.subr.bf16.mxu0 %v4685_v48  ;;  %2804 = vmatprep.subr.bf16.mxu1 %v4688_v49  ;;  %v2205_v49 = vld [vmem:[#allocation2 + $0x50] sm:$0xf0] }
 0x5ec   : > { %v2213_v6 = vrot.slane %v2205_v49, 4 }
 0x5ee   : > { %v2221_v8 = vunpack.c.l.bf16 %v2213_v6 }
 0x6a0   : > { %v2258_v15 = vpop.f32.mrb[36].mxu0  ;;  %v2299_v24 = vpop.f32.mrb[36].mxu1 }
 0x6a1   : > { %v2306_v18 = vadd.f32 %v2258_v15, %v2219_v4  ;;  %v2260_v52 = vpop.f32.mrb[37].mxu0  ;;  %v2301_v53 = vpop.f32.mrb[37].mxu1  ;;  %v2308_v37 = vadd.f32 %v2299_v24, %v2221_v8 }
 0x6a2   : > { %v2307_v57 = vadd.f32 %v2260_v52, %v2220_v25  ;;  %v2262_v58 = vpop.f32.mrb[38].mxu0  ;;  %v2303_v59 = vpop.f32.mrb[38].mxu1  ;;  %v2309_v62 = vadd.f32 %v2301_v53, %v2222_v2 }
 0x6a3   : > { %v3448_v60 = vmul.f32 -1.442695, %v2306_v18  ;;  %v2263_v48 = vpop.f32.mrb[39].mxu0  ;;  %v2304_v61 = vpop.f32.mrb[39].mxu1 }
 0x6a4   : > { %v3449_v0 = vmul.f32 -1.442695, %v2307_v57  ;;  %v3450_v7 = vmul.f32 -1.442695, %v2309_v62 }
 0x6a5   : > { %3819 = vpow2.f32 %v3448_v60 }
 0x6a6   : > { %3821 = vpow2.f32 %v3449_v0 }
 0x6a7   : > { %3823 = vpow2.f32 %v3450_v7 }
 0x6a8   : > { %3825 = vtanh.f32 %v2308_v37 }
 0x6af   : > { %v3820_v38 = vpop.eup %3819 }
 0x6b0   : > { %v3822_v11 = vpop.eup %3821  ;;  %v2313_v63 = vadd.f32 1.0, %v3820_v38 }
 0x6b1   : > { %v2319_v22 = vadd.f32 1.0, %v3822_v11  ;;  %v3824_v40 = vpop.eup %3823 }
 0x6b2   : > { %3827 = vrcp.f32 %v2313_v63  ;;  %v3826_v9 = vpop.eup %3825  ;;  %v2326_v25 = vadd.f32 1.0, %v3824_v40 }
 0x6b3   : > { %3829 = vrcp.f32 %v2319_v22 }
 0x6b4   : > { %3831 = vrcp.f32 %v2326_v25 }
 0x6bc   : > { %v3828_v4 = vpop.eup %3827 }
 0x6bd   : > { %v3830_v39 = vpop.eup %3829  ;;  %v2330_v15 = vmul.f32 %v3828_v4, %v3826_v9  ;;  %v2466_v4 = vld [vmem:[%s4319_s30] sm:$0x4] }
 0x6be   : > { %v2329_v18 = vmul.f32 %v3830_v39, %v4916_v19  ;;  %v3832_v24 = vpop.eup %3831 }
 0x6c0   : > { %v4998_v52 = vadd.f32 %v2330_v15, %v2329_v18  ;;  %v2469_v18 = vld [vmem:[%s4319_s30 + $0x4] sm:$0x4] }
 0x6c2   : > { %3833 = vtanh.f32 %v4998_v52 }
 0x6cc   : > { %v3834_v53 = vpop.eup %3833 }
 0x6cd   : > { %v2333_v57 = vmul.f32 %v3834_v53, %v3832_v24 }
 0x6cf   : > { %v2335_v5 = vcombine.high %v2333_v57, %v2333_v57  ;;  %v2342_v58 = vrot.slane %v2333_v57, %v4526_v20  ;;  %v2498_v59 = vpack.c.bf16 %v2333_v57, %v2333_v57 }
 0x6d1   : > { %v2349_v60 = vrot.slane %v2335_v5, %v4526_v20  ;;  %v2350_v48 = vcombine.high %v2342_v58, %v2342_v58  ;;  %v2358_v61 = vrot.slane %v2342_v58, %v4526_v20  ;;  %2532 = vmatmul.mubr.bf16.vlgmr.msra.gmra.mrb[40].mxu0 %v2498_v59  ;;  %2573 = vmatmul.mubr.bf16.vlgmr.msra.gmra.mrb[40].mxu1 %v2498_v59  ;;  %v2472_v5 = vld [vmem:[%s4319_s30 + $0x8] sm:$0x4] }
 0x6d2   : > { %2764 = vmatpush1.bf16.msra.mxu0 %v4698_v16  ;;  %2805 = vmatpush1.bf16.msra.mxu1 %v4701_v28 }
 0x6d3   : > { %v2351_v19 = vcombine.high %v2349_v60, %v2349_v60  ;;  %v2365_v49 = vrot.slane %v2349_v60, %v4526_v20  ;;  %v2372_v0 = vrot.slane %v2350_v48, %v4526_v20  ;;  %v2380_v2 = vcombine.high %v2358_v61, %v2358_v61  ;;  %2765 = vmatprep.subr.bf16.mxu0 %v4706_v17  ;;  %v2478_v48 = vld [vmem:[%s4319_s30 + $0x10] sm:$0x4] }
 0x6d4   : > { %v3519_v6 = vpack.c.bf16 %v2358_v61, %v2358_v61  ;;  %2806 = vmatprep.subr.bf16.mxu1 %v4709_v36  ;;  %2795 = vmatprep.mubr.bf16.mxu0 %v4081_v3  ;;  %v2475_v61 = vld [vmem:[%s4319_s30 + $0xc] sm:$0x4] }
 0x6d5   : > { %v2379_v62 = vrot.slane %v2351_v19, %v4526_v20  ;;  %v2381_v8 = vcombine.high %v2365_v49, %v2365_v49  ;;  %v2382_v16 = vcombine.high %v2372_v0, %v2372_v0  ;;  %v3520_v7 = vpack.c.bf16 %v2372_v0, %v2372_v0  ;;  %2836 = vmatprep.mubr.bf16.mxu1 %v4081_v3  ;;  %v2484_v0 = vld [vmem:[%s4319_s30 + $0x18] sm:$0x4] }
 0x6d6   : > { %v3521_v28 = vpack.c.bf16 %v2380_v2, %v2380_v2  ;;  %v3523_v37 = vpack.c.bf16 %v2365_v49, %v2365_v49  ;;  %v2425_v38 = vshll.u32 %v3519_v6, 16  ;;  %2766 = vmatpush1.bf16.msra.mxu0 %v4724_v55  ;;  %2807 = vmatpush1.bf16.msra.mxu1 %v4727_v56  ;;  %v2481_v49 = vld [vmem:[%s4319_s30 + $0x14] sm:$0x4] }
 0x6d7   : > { %v2383_v17 = vcombine.high %v2379_v62, %v2379_v62  ;;  %v3522_v36 = vpack.c.bf16 %v2382_v16, %v2382_v16  ;;  %v3524_v11 = vpack.c.bf16 %v2379_v62, %v2379_v62  ;;  %v3525_v63 = vpack.c.bf16 %v2381_v8, %v2381_v8  ;;  %2767 = vmatprep.subr.bf16.mxu0 %v4733_v1  ;;  %v2487_v62 = vld [vmem:[%s4319_s30 + $0x1c] sm:$0x4] }
 0x6d8   : > { %v2427_v3 = vrot.slane %v2425_v38, 6  ;;  %v2429_v40 = vshll.u32 %v3520_v7, 16  ;;  %v2433_v9 = vshll.u32 %v3521_v28, 16  ;;  %v2441_v55 = vshll.u32 %v3523_v37, 16  ;;  %2808 = vmatprep.subr.bf16.mxu1 %v4739_v54  ;;  %v2490_v38 = vld [vmem:[#allocation2 + $0x60] ss:$16 sps:$4 sm:$0xff]  }
 0x6d9   : > { %v3526_v56 = vpack.c.bf16 %v2383_v17, %v2383_v17  ;;  %v2437_v39 = vshll.u32 %v3522_v36, 16  ;;  %v2445_v15 = vshll.u32 %v3524_v11, 16  ;;  %v2449_v25 = vshll.u32 %v3525_v63, 16  ;;  %v2491_v17 = vld [vmem:[#allocation2 + $0x68] ss:$16 sps:$4 sm:$0xff]  }
 0x6da   : > { %v2431_v24 = vrot.slane %v2429_v40, 6  ;;  %v2435_v53 = vrot.slane %v2433_v9, 6  ;;  %v2443_v57 = vrot.slane %v2441_v55, 6  ;;  %v2467_v1 = vsel %vm5017_vm14, %v2427_v3, %v2466_v4  ;;  %2768 = vmatpush1.bf16.msra.mxu0 %v4750_v12  ;;  %2809 = vmatpush1.bf16.msra.mxu1 %v4753_v14 }
 0x6db   : > { %v2439_v54 = vrot.slane %v2437_v39, 6  ;;  %v2447_v58 = vrot.slane %v2445_v15, 6  ;;  %v2451_v59 = vrot.slane %v2449_v25, 6  ;;  %v2453_v60 = vshll.u32 %v3526_v56, 16  ;;  %2468 = vst [vmem:[%s4319_s30] sm:$0x4] %v2467_v1  ;;  %2769 = vmatprep.subr.bf16.mxu0 %v4765_v26  ;;  %2810 = vmatprep.subr.bf16.mxu1 %v4768_v27 }
 0x6dc   : > { %v2470_v12 = vsel %vm5017_vm14, %v2431_v24, %v2469_v18  ;;  %v2473_v14 = vsel %vm5017_vm14, %v2435_v53, %v2472_v5  ;;  %v2479_v19 = vsel %vm5017_vm14, %v2443_v57, %v2478_v48  ;;  %v2494_v36 = vunpack.c.l.bf16 %v2490_v38 }
 0x6dd   : > { %v2455_v2 = vrot.slane %v2453_v60, 6  ;;  %2471 = vst [vmem:[%s4319_s30 + $0x4] sm:$0x4] %v2470_v12  ;;  %2474 = vst [vmem:[%s4319_s30 + $0x8] sm:$0x4] %v2473_v14  ;;  %v2476_v26 = vsel %vm5017_vm14, %v2439_v54, %v2475_v61  ;;  %v2482_v27 = vsel %vm5017_vm14, %v2447_v58, %v2481_v49  ;;  %v2485_v6 = vsel %vm5017_vm14, %v2451_v59, %v2484_v0 }
 0x6de   : > { %2480 = vst [vmem:[%s4319_s30 + $0x10] sm:$0x4] %v2479_v19  ;;  %2477 = vst [vmem:[%s4319_s30 + $0xc] sm:$0x4] %v2476_v26  ;;  %2770 = vmatpush1.bf16.msra.mxu0 %v4777_v41  ;;  %2811 = vmatpush1.bf16.msra.mxu1 %v4780_v42  ;;  %v3036_v41 = vld [vmem:[%s5317_s1] sm:$0xff]  ;;  %v2495_v22 = vunpack.c.l.bf16 %v2491_v17  ;;  %v2496_v53 = vunpack.c.h.bf16 %v2490_v38 }
 0x6df   : > { %2483 = vst [vmem:[%s4319_s30 + $0x14] sm:$0x4] %v2482_v27  ;;  %2486 = vst [vmem:[%s4319_s30 + $0x18] sm:$0x4] %v2485_v6  ;;  %v2488_v8 = vsel %vm5017_vm14, %v2455_v2, %v2487_v62  ;;  %2771 = vmatprep.subr.bf16.mxu0 %v4783_v23  ;;  %2812 = vmatprep.subr.bf16.mxu1 %v4786_v21  ;;  %v3037_v42 = vcombine.high %v3036_v41, %v3036_v41  ;;  %v2727_v38 = vld [vmem:[%s4319_s30 + $0xc] sm:$0x8] }
 0x6e0   : > { %2489 = vst [vmem:[%s4319_s30 + $0x1c] sm:$0x4] %v2488_v8  ;;  %v3044_v23 = vrot.slane %v3036_v41, %v4526_v20 }
 0x6e2   : > { %2772 = vmatpush1.bf16.msra.mxu0 %v4789_v30  ;;  %2813 = vmatpush1.bf16.msra.mxu1 %v4792_v43  ;;  %v3052_v21 = vcombine.high %v3044_v23, %v3044_v23  ;;  %v3060_v30 = vrot.slane %v3044_v23, %v4526_v20  ;;  %v3051_v43 = vrot.slane %v3037_v42, %v4526_v20 }
 0x6e3   : > { %2773 = vmatprep.subr.bf16.mxu0 %v4795_v31  ;;  %2814 = vmatprep.subr.bf16.mxu1 %v4798_v32 }
 0x6e4   : > { %v3082_v31 = vcombine.high %v3060_v30, %v3060_v30  ;;  %v3097_v32 = vrot.slane %v3060_v30, %v4475_v13 }
 0x6e6   : > { %2774 = vmatpush1.bf16.msra.mxu0 %v4801_v44  ;;  %2815 = vmatpush1.bf16.msra.mxu1 %v4804_v45  ;;  %v3053_v44 = vcombine.high %v3051_v43, %v3051_v43  ;;  %v3067_v45 = vrot.slane %v3051_v43, %v4526_v20 }
 0x6e7   : > { %2775 = vmatprep.subr.bf16.mxu0 %v4807_v34  ;;  %2816 = vmatprep.subr.bf16.mxu1 %v4810_v33  ;;  %v3074_v34 = vrot.slane %v3052_v21, %v4526_v20  ;;  %v3105_v33 = vrot.slane %v3082_v31, %v4475_v13 }
 0x6e8   : > { %3127 = vperm.xlu0 %3636, %v3097_v32  }
 0x6e9   : > { %3133 = vperm.xlu1 %3637, %v3105_v33  }
 0x6ea   : > { %2776 = vmatpush1.bf16.msra.mxu0 %v4813_v29  ;;  %2817 = vmatpush1.bf16.msra.mxu1 %v4816_v35  ;;  %v3081_v29 = vrot.slane %v3053_v44, %v4526_v20  ;;  %v3113_v35 = vrot.slane %v3067_v45, %v4475_v13 }
 0x6eb   : > { %2777 = vmatprep.subr.bf16.mxu0 %v4819_v46  ;;  %2818 = vmatprep.subr.bf16.mxu1 %v4822_v47  ;;  %v3084_v47 = vcombine.high %v3074_v34, %v3074_v34 }
 0x6ec   : > { %v3117_v46 = vrot.slane %v3081_v29, %v4475_v13  ;;  %3139 = vperm.xlu0 %3636, %v3113_v35   ;;  %v3085_v7 = vcombine.high %v3081_v29, %v3081_v29  ;;  %v2718_v29 = vld [vmem:[%s4319_s30] sm:$0x8] }
 0x6ed   : > { %v3109_v16 = vrot.slane %v3084_v47, %v4475_v13 }
 0x6ee   : > { %2778 = vmatpush1.bf16.msra.mxu0 %v4825_v50  ;;  %2819 = vmatpush1.bf16.msra.mxu1 %v4828_v51  ;;  %v3101_v50 = vrot.slane %v3074_v34, %v4475_v13  ;;  %v3083_v51 = vcombine.high %v3067_v45, %v3067_v45  ;;  %v3125_v37 = vrot.slane %v3085_v7, %v4475_v13 }
 0x6ef   : > { %3142 = vperm.xlu1 %3637, %v3117_v46  }
 0x6f0   : > { %3130 = vperm.xlu0 %3636, %v3101_v50   ;;  %v3121_v28 = vrot.slane %v3083_v51, %v4475_v13  ;;  %v2497_v13 = vunpack.c.h.bf16 %v2491_v17  ;;  %v2721_v50 = vld [vmem:[%s4319_s30 + $0x4] sm:$0x8]  ;;  %v2724_v51 = vld [vmem:[%s4319_s30 + $0x8] sm:$0x8]  ;;  %v2730_v17 = vld [vmem:[%s4319_s30 + $0x10] sm:$0x8] }
 0x6f3   : > { %3136 = vperm.xlu1 %3637, %v3109_v16  }
 0x6f4   : > { %3145 = vperm.xlu0 %3636, %v3121_v28  }
 0x6f7   : > { %3148 = vperm.xlu1 %3637, %v3125_v37  }
 0x7a4   : > { %v2533_v11 = vpop.f32.mrb[40].mxu0  ;;  %v2574_v63 = vpop.f32.mrb[40].mxu1 }
 0x7a5   : > { %v2581_v3 = vadd.f32 %v2533_v11, %v2494_v36  ;;  %v2535_v40 = vpop.f32.mrb[41].mxu0  ;;  %v2576_v9 = vpop.f32.mrb[41].mxu1  ;;  %v2583_v1 = vadd.f32 %v2574_v63, %v2496_v53  ;;  %v2733_v36 = vld [vmem:[%s4319_s30 + $0x14] sm:$0x8] }
 0x7a6   : > { %v2582_v55 = vadd.f32 %v2535_v40, %v2495_v22  ;;  %v2537_v4 = vpop.f32.mrb[42].mxu0  ;;  %v2578_v56 = vpop.f32.mrb[42].mxu1  ;;  %v2584_v24 = vadd.f32 %v2576_v9, %v2497_v13  ;;  %v2736_v40 = vld [vmem:[%s4319_s30 + $0x18] sm:$0x8] }
 0x7a7   : > { %v3459_v39 = vmul.f32 -1.442695, %v2581_v3  ;;  %v2538_v15 = vpop.f32.mrb[43].mxu0  ;;  %v2579_v25 = vpop.f32.mrb[43].mxu1 }
 0x7a8   : > { %v3460_v18 = vmul.f32 -1.442695, %v2582_v55  ;;  %v3461_v57 = vmul.f32 -1.442695, %v2584_v24 }
 0x7a9   : > { %3835 = vpow2.f32 %v3459_v39 }
 0x7aa   : > { %3837 = vpow2.f32 %v3460_v18  ;;  %v2739_v18 = vld [vmem:[%s4319_s30 + $0x1c] sm:$0x8] }
 0x7ab   : > { %3839 = vpow2.f32 %v3461_v57 }
 0x7ac   : > { %3841 = vtanh.f32 %v2583_v1 }
 0x7b3   : > { %v3836_v5 = vpop.eup %3835 }
 0x7b4   : > { %v3838_v54 = vpop.eup %3837  ;;  %v2588_v58 = vadd.f32 1.0, %v3836_v5  ;;  %v2742_v5 = vld [vmem:[#allocation2 + $0x60] sm:$0xf0] }
 0x7b5   : > { %v2594_v59 = vadd.f32 1.0, %v3838_v54  ;;  %v3840_v60 = vpop.eup %3839  ;;  %v2743_v54 = vld [vmem:[#allocation2 + $0x68] sm:$0xf0] }
 0x7b6   : > { %3843 = vrcp.f32 %v2588_v58  ;;  %v3842_v48 = vpop.eup %3841  ;;  %v2601_v19 = vadd.f32 1.0, %v3840_v60  ;;  %v2750_v58 = vrot.slane %v2742_v5, 4 }
 0x7b7   : > { %3845 = vrcp.f32 %v2594_v59  ;;  %v2751_v59 = vrot.slane %v2743_v54, 4 }
 0x7b8   : > { %3847 = vrcp.f32 %v2601_v19  ;;  %v2758_v60 = vunpack.c.l.bf16 %v2750_v58 }
 0x7c0   : > { %v3844_v12 = vpop.eup %3843 }
 0x7c1   : > { %v3846_v14 = vpop.eup %3845  ;;  %v2605_v61 = vmul.f32 %v3844_v12, %v3842_v48  ;;  %v2745_v48 = vld [vmem:[#allocation2 + $0x78] sm:$0xf0] }
 0x7c2   : > { %v2604_v49 = vmul.f32 %v3846_v14, %v4998_v52  ;;  %v3848_v2 = vpop.eup %3847 }
 0x7c4   : > { %v5095_v0 = vadd.f32 %v2605_v61, %v2604_v49  ;;  %v2759_v61 = vunpack.c.l.bf16 %v2751_v59 }
 0x7c6   : > { %3849 = vtanh.f32 %v5095_v0 }
 0x7d0   : > { %v3850_v26 = vpop.eup %3849 }
 0x7d1   : > { %v2608_v27 = vmul.f32 %v3850_v26, %v3848_v2 }
 0x7d3   : > { %v2610_v6 = vcombine.high %v2608_v27, %v2608_v27  ;;  %v2617_v62 = vrot.slane %v2608_v27, %v4526_v20  ;;  %v2762_v8 = vpack.c.bf16 %v2608_v27, %v2608_v27  ;;  %v2753_v27 = vrot.slane %v2745_v48, 4 }
 0x7d5   : > { %v2624_v41 = vrot.slane %v2610_v6, %v4526_v20  ;;  %v2625_v42 = vcombine.high %v2617_v62, %v2617_v62  ;;  %v2633_v23 = vrot.slane %v2617_v62, %v4526_v20  ;;  %2796 = vmatmul.mubr.bf16.vlgmr.msra.gmra.mrb[44].mxu0 %v2762_v8  ;;  %2837 = vmatmul.mubr.bf16.vlgmr.msra.gmra.mrb[44].mxu1 %v2762_v8 }
 0x7d7   : > { %v2626_v52 = vcombine.high %v2624_v41, %v2624_v41  ;;  %v2640_v21 = vrot.slane %v2624_v41, %v4526_v20  ;;  %v2647_v30 = vrot.slane %v2625_v42, %v4526_v20  ;;  %v2655_v43 = vcombine.high %v2633_v23, %v2633_v23 }
 0x7d8   : > { %v3527_v31 = vpack.c.bf16 %v2633_v23, %v2633_v23  ;;  %v2744_v23 = vld [vmem:[#allocation2 + $0x70] sm:$0xf0] }
 0x7d9   : > { %v2654_v32 = vrot.slane %v2626_v52, %v4526_v20  ;;  %v2656_v44 = vcombine.high %v2640_v21, %v2640_v21  ;;  %v2657_v45 = vcombine.high %v2647_v30, %v2647_v30  ;;  %v3528_v34 = vpack.c.bf16 %v2647_v30, %v2647_v30 }
 0x7da   : > { %v3529_v35 = vpack.c.bf16 %v2655_v43, %v2655_v43  ;;  %v3531_v46 = vpack.c.bf16 %v2640_v21, %v2640_v21  ;;  %v2699_v47 = vrot.slane %v3527_v31, 5  ;;  %v2761_v21 = vunpack.c.l.bf16 %v2753_v27 }
 0x7db   : > { %v2658_v16 = vcombine.high %v2654_v32, %v2654_v32  ;;  %v3530_v7 = vpack.c.bf16 %v2657_v45, %v2657_v45  ;;  %v3532_v28 = vpack.c.bf16 %v2654_v32, %v2654_v32  ;;  %v3533_v37 = vpack.c.bf16 %v2656_v44, %v2656_v44 }
 0x7dc   : > { %v2700_v11 = vrot.slane %v3528_v34, 5  ;;  %v2701_v63 = vrot.slane %v3529_v35, 5  ;;  %v2703_v22 = vrot.slane %v3531_v46, 5  ;;  %v2719_v3 = vsel %vm5105_vm1, %v2699_v47, %v2718_v29 }
 0x7dd   : > { %v3534_v9 = vpack.c.bf16 %v2658_v16, %v2658_v16  ;;  %v2702_v55 = vrot.slane %v3530_v7, 5  ;;  %v2704_v4 = vrot.slane %v3532_v28, 5  ;;  %v2705_v56 = vrot.slane %v3533_v37, 5  ;;  %2720 = vst [vmem:[%s4319_s30] sm:$0x8] %v2719_v3  ;;  %v5146_v3 = vpop.permute.xlu1 %3133 }
 0x7de   : > { %v2722_v39 = vsel %vm5105_vm1, %v2700_v11, %v2721_v50  ;;  %v2725_v15 = vsel %vm5105_vm1, %v2701_v63, %v2724_v51  ;;  %v2731_v25 = vsel %vm5105_vm1, %v2703_v22, %v2730_v17  ;;  %v2752_v30 = vrot.slane %v2744_v23, 4 }
 0x7df   : > { %v2706_v13 = vrot.slane %v3534_v9, 5  ;;  %2723 = vst [vmem:[%s4319_s30 + $0x4] sm:$0x8] %v2722_v39  ;;  %2726 = vst [vmem:[%s4319_s30 + $0x8] sm:$0x8] %v2725_v15  ;;  %v2728_v24 = vsel %vm5105_vm1, %v2702_v55, %v2727_v38  ;;  %v2734_v53 = vsel %vm5105_vm1, %v2704_v4, %v2733_v36  ;;  %v2737_v57 = vsel %vm5105_vm1, %v2705_v56, %v2736_v40  ;;  %v5143_v36 = vpop.permute.xlu0 %3127 }
 0x7e0   : > { %2732 = vst [vmem:[%s4319_s30 + $0x10] sm:$0x8] %v2731_v25  ;;  %2729 = vst [vmem:[%s4319_s30 + $0xc] sm:$0x8] %v2728_v24  ;;  %v2760_v31 = vunpack.c.l.bf16 %v2752_v30  ;;  %v3034_v22 = vstv %s3481_s9 }
 0x7e1   : > { %2735 = vst [vmem:[%s4319_s30 + $0x14] sm:$0x8] %v2734_v53  ;;  %2738 = vst [vmem:[%s4319_s30 + $0x18] sm:$0x8] %v2737_v57  ;;  %v2740_v1 = vsel %vm5105_vm1, %v2706_v13, %v2739_v18  ;;  %v5151_v55 = vadd.s32 %v3034_v22, %v4470_v10 }
 0x7e2   : > { %2741 = vst [vmem:[%s4319_s30 + $0x1c] sm:$0x8] %v2740_v1  ;;  %v3143_v1 = vpop.permute.xlu1 %3142 }
 0x7e3   : > { %v5155_v18 = vpop.permute.xlu0 %3139  ;;  %vm3152_vm3 = vcmp.lt.s32.totalorder %v5151_v55, %v5146_v3  ;;  %vm3150_vm5 = vcmp.lt.s32.totalorder %v5151_v55, %v5143_v36  ;;  %vm3155_vm6 = vcmp.lt.s32.totalorder %v5151_v55, %v3143_v1 }
 0x7e4   : > { %vm5203_vm7 = vmpackc.low %vm3152_vm3, %vm3152_vm3  ;;  %vm3154_vm8 = vcmp.lt.s32.totalorder %v5151_v55, %v5155_v18 }
 0x7e5   : > { %vm3158_vm9 = vmpackc.low %vm3150_vm5, %vm3150_vm5 }
 0x7e6   : > { %vm5215_vm11 = vmpackc.low %vm3155_vm6, %vm3155_vm6 }
 0x7e7   : > { %vm5220_vm12 = vmpackc.low %vm3154_vm8, %vm3154_vm8 }
 0x8a8   : > { %v2797_v12 = vpop.f32.mrb[44].mxu0  ;;  %v2838_v14 = vpop.f32.mrb[44].mxu1 }
 0x8a9   : > { %v2845_v19 = vadd.f32 %v2797_v12, %v2758_v60  ;;  %v2799_v49 = vpop.f32.mrb[45].mxu0  ;;  %v2840_v2 = vpop.f32.mrb[45].mxu1  ;;  %v2847_v44 = vadd.f32 %v2838_v14, %v2760_v31 }
 0x8aa   : > { %v2846_v26 = vadd.f32 %v2799_v49, %v2759_v61  ;;  %v2801_v6 = vpop.f32.mrb[46].mxu0  ;;  %v2842_v62 = vpop.f32.mrb[46].mxu1  ;;  %v2848_v43 = vadd.f32 %v2840_v2, %v2761_v21  ;;  %v3005_v49 = vld [vmem:[%s4319_s30] sm:$0x8] }
 0x8ab   : > { %v3470_v8 = vmul.f32 -1.442695, %v2845_v19  ;;  %v2802_v41 = vpop.f32.mrb[47].mxu0  ;;  %v2843_v42 = vpop.f32.mrb[47].mxu1  ;;  %v3008_v62 = vld [vmem:[%s4319_s30 + $0x4] sm:$0x8] }
 0x8ac   : > { %v3471_v52 = vmul.f32 -1.442695, %v2846_v26  ;;  %v3472_v32 = vmul.f32 -1.442695, %v2848_v43  ;;  %v3131_v21 = vpop.permute.xlu0 %3130 }
 0x8ad   : > { %3851 = vpow2.f32 %v3470_v8  ;;  %vm3151_vm13 = vcmp.lt.s32.totalorder %v5151_v55, %v3131_v21 }
 0x8ae   : > { %3853 = vpow2.f32 %v3471_v52  ;;  %v3011_v52 = vld [vmem:[%s4319_s30 + $0x8] sm:$0x8]  ;;  %vm3159_vm1 = vmpackc.low %vm3151_vm13, %vm3151_vm13 }
 0x8af   : > { %3855 = vpow2.f32 %v3472_v32 }
 0x8b0   : > { %3857 = vtanh.f32 %v2847_v44  ;;  %v3017_v44 = vld [vmem:[%s4319_s30 + $0x10] sm:$0x8] }
 0x8b7   : > { %v3852_v45 = vpop.eup %3851 }
 0x8b8   : > { %v3854_v34 = vpop.eup %3853  ;;  %v2852_v33 = vadd.f32 1.0, %v3852_v45  ;;  %v3137_v45 = vpop.permute.xlu1 %3136 }
 0x8b9   : > { %v2858_v29 = vadd.f32 1.0, %v3854_v34  ;;  %v3856_v35 = vpop.eup %3855  ;;  %vm3153_vm10 = vcmp.lt.s32.totalorder %v5151_v55, %v3137_v45 }
 0x8ba   : > { %3859 = vrcp.f32 %v2852_v33  ;;  %v3858_v46 = vpop.eup %3857  ;;  %v2865_v16 = vadd.f32 1.0, %v3856_v35  ;;  %vm5226_vm14 = vmpackc.low %vm3153_vm10, %vm3153_vm10 }
 0x8bb   : > { %3861 = vrcp.f32 %v2858_v29  ;;  %v3014_v29 = vld [vmem:[%s4319_s30 + $0xc] sm:$0x8] }
 0x8bc   : > { %3863 = vrcp.f32 %v2865_v16 }
 0x8c4   : > { %v3860_v47 = vpop.eup %3859 }
 0x8c5   : > { %v3862_v50 = vpop.eup %3861  ;;  %v2869_v51 = vmul.f32 %v3860_v47, %v3858_v46  ;;  %v3020_v46 = vld [vmem:[%s4319_s30 + $0x14] sm:$0x8]  ;;  %v3023_v47 = vld [vmem:[%s4319_s30 + $0x18] sm:$0x8] }
 0x8c6   : > { %v2868_v7 = vmul.f32 %v3862_v50, %v5095_v0  ;;  %v3864_v37 = vpop.eup %3863 }
 0x8c8   : > { %v2870_v28 = vadd.f32 %v2869_v51, %v2868_v7 }
 0x8ca   : > { %3865 = vtanh.f32 %v2870_v28  ;;  %3030 = vst [vmem:[#allocation4] sm:$0xff] %v2870_v28  ;;  %v3026_v28 = vld [vmem:[%s4319_s30 + $0x1c] sm:$0x8] }
 0x8d4   : > { %v3866_v38 = vpop.eup %3865 }
 0x8d5   : > { %v2872_v17 = vmul.f32 %v3866_v38, %v3864_v37 }
 0x8d7   : > { %v2874_v11 = vcombine.high %v2872_v17, %v2872_v17  ;;  %v2881_v63 = vrot.slane %v2872_v17, %v4526_v20  ;;  %3029 = vst [vmem:[#allocation3] sm:$0xff] %v2872_v17  ;;  %v3146_v17 = vpop.permute.xlu0 %3145 }
 0x8d8   : > { %vm3156_vm15 = vcmp.lt.s32.totalorder %v5151_v55, %v3146_v17 }
 0x8d9   : > { %v2888_v40 = vrot.slane %v2874_v11, %v4526_v20  ;;  %v2889_v0 = vcombine.high %v2881_v63, %v2881_v63  ;;  %v2897_v9 = vrot.slane %v2881_v63, %v4526_v20  ;;  %v3149_v63 = vpop.permute.xlu1 %3148  ;;  %vm3164_vm2 = vmpackc.low %vm3156_vm15, %vm3156_vm15 }
 0x8da   : > { %vm3157_vm0 = vcmp.lt.s32.totalorder %v5151_v55, %v3149_v63 }
 0x8db   : > { %v2890_v4 = vcombine.high %v2888_v40, %v2888_v40  ;;  %v2904_v56 = vrot.slane %v2888_v40, %v4526_v20  ;;  %v2911_v39 = vrot.slane %v2889_v0, %v4526_v20  ;;  %v2919_v15 = vcombine.high %v2897_v9, %v2897_v9  ;;  %vm3165_vm3 = vmpackc.low %vm3157_vm0, %vm3157_vm0 }
 0x8dc   : > { %v3535_v25 = vpack.c.bf16 %v2897_v9, %v2897_v9 }
 0x8dd   : > { %v2918_v13 = vrot.slane %v2890_v4, %v4526_v20  ;;  %v2920_v24 = vcombine.high %v2904_v56, %v2904_v56  ;;  %v2921_v53 = vcombine.high %v2911_v39, %v2911_v39  ;;  %v3536_v57 = vpack.c.bf16 %v2911_v39, %v2911_v39 }
 0x8de   : > { %v3537_v5 = vpack.c.bf16 %v2919_v15, %v2919_v15  ;;  %v3539_v10 = vpack.c.bf16 %v2904_v56, %v2904_v56  ;;  %v2964_v54 = vshll.u32 %v3535_v25, 16 }
 0x8df   : > { %v2922_v59 = vcombine.high %v2918_v13, %v2918_v13  ;;  %v3538_v60 = vpack.c.bf16 %v2921_v53, %v2921_v53  ;;  %v3540_v20 = vpack.c.bf16 %v2918_v13, %v2918_v13  ;;  %v3541_v48 = vpack.c.bf16 %v2920_v24, %v2920_v24 }
 0x8e0   : > { %v2966_v12 = vrot.slane %v2964_v54, 5  ;;  %v2968_v14 = vshll.u32 %v3536_v57, 16  ;;  %v2972_v61 = vshll.u32 %v3537_v5, 16  ;;  %v2980_v19 = vshll.u32 %v3539_v10, 16 }
 0x8e1   : > { %v3542_v2 = vpack.c.bf16 %v2922_v59, %v2922_v59  ;;  %v2976_v26 = vshll.u32 %v3538_v60, 16  ;;  %v2984_v27 = vshll.u32 %v3540_v20, 16  ;;  %v2988_v6 = vshll.u32 %v3541_v48, 16 }
 0x8e2   : > { %v2970_v8 = vrot.slane %v2968_v14, 5  ;;  %v2974_v41 = vrot.slane %v2972_v61, 5  ;;  %v2982_v42 = vrot.slane %v2980_v19, 5  ;;  %v3006_v23 = vsel %vm5161_vm4, %v2966_v12, %v3005_v49 }
 0x8e3   : > { %v2978_v30 = vrot.slane %v2976_v26, 5  ;;  %v2986_v43 = vrot.slane %v2984_v27, 5  ;;  %v2990_v31 = vrot.slane %v2988_v6, 5  ;;  %v2992_v32 = vshll.u32 %v3542_v2, 16  ;;  %3007 = vst [vmem:[%s4319_s30] sm:$0x8] %v3006_v23 }
 0x8e4   : > { %v3009_v34 = vsel %vm5161_vm4, %v2970_v8, %v3008_v62  ;;  %v3012_v33 = vsel %vm5161_vm4, %v2974_v41, %v3011_v52  ;;  %v3018_v35 = vsel %vm5161_vm4, %v2982_v42, %v3017_v44 }
 0x8e5   : > { %v2994_v50 = vrot.slane %v2992_v32, 5  ;;  %3013 = vst [vmem:[%s4319_s30 + $0x8] sm:$0x8] %v3012_v33  ;;  %v3015_v51 = vsel %vm5161_vm4, %v2978_v30, %v3014_v29  ;;  %v3021_v16 = vsel %vm5161_vm4, %v2986_v43, %v3020_v46  ;;  %v3024_v7 = vsel %vm5161_vm4, %v2990_v31, %v3023_v47  ;;  %3010 = vst [vmem:[%s4319_s30 + $0x4] sm:$0x8] %v3009_v34 }
 0x8e6   : > { %3019 = vst [vmem:[%s4319_s30 + $0x10] sm:$0x8] %v3018_v35  ;;  %3016 = vst [vmem:[%s4319_s30 + $0xc] sm:$0x8] %v3015_v51 }
 0x8e7   : > { %3022 = vst [vmem:[%s4319_s30 + $0x14] sm:$0x8] %v3021_v16  ;;  %3025 = vst [vmem:[%s4319_s30 + $0x18] sm:$0x8] %v3024_v7  ;;  %v3027_v37 = vsel %vm5161_vm4, %v2994_v50, %v3026_v28 }
 0x8e8   : > { %3028 = vst [vmem:[%s4319_s30 + $0x1c] sm:$0x8] %v3027_v37 }
 0x8ea   : > { %v3086_v22 = vld [vmem:[%s4319_s30] sm:$0xf] }
 0x8eb   : > { %v3166_v36 = vsel %vm3158_vm9, %v3086_v22, 0 }
 0x8ec   : > { %v3088_v0 = vld [vmem:[%s4319_s30 + $0x8] sm:$0xf]  ;;  %3174 = vst [vmem:[%s4319_s30] sm:$0xf] %v3166_v36  ;;  %v3087_v4 = vld [vmem:[%s4319_s30 + $0x4] sm:$0xf] }
 0x8ed   : > { %v3090_v9 = vld [vmem:[%s4319_s30 + $0x10] sm:$0xf]  ;;  %v3168_v56 = vsel %vm5203_vm7, %v3088_v0, 0  ;;  %v3089_v25 = vld [vmem:[%s4319_s30 + $0xc] sm:$0xf]  ;;  %v3167_v24 = vsel %vm3159_vm1, %v3087_v4, 0 }
 0x8ee   : > { %v3091_v39 = vld [vmem:[%s4319_s30 + $0x14] sm:$0xf]  ;;  %v3170_v15 = vsel %vm5220_vm12, %v3090_v9, 0  ;;  %3176 = vst [vmem:[%s4319_s30 + $0x8] sm:$0xf] %v3168_v56  ;;  %v3169_v13 = vsel %vm5226_vm14, %v3089_v25, 0 }
 0x8ef   : > { %v3171_v18 = vsel %vm5215_vm11, %v3091_v39, 0  ;;  %3178 = vst [vmem:[%s4319_s30 + $0x10] sm:$0xf] %v3170_v15  ;;  %v3092_v53 = vld [vmem:[%s4319_s30 + $0x18] sm:$0xf] }
 0x8f0   : > { %3179 = vst [vmem:[%s4319_s30 + $0x14] sm:$0xf] %v3171_v18  ;;  %3177 = vst [vmem:[%s4319_s30 + $0xc] sm:$0xf] %v3169_v13  ;;  %v3093_v57 = vld [vmem:[%s4319_s30 + $0x1c] sm:$0xf] }
 0x8f1   : > { %3175 = vst [vmem:[%s4319_s30 + $0x4] sm:$0xf] %v3167_v24  ;;  %v3172_v1 = vsel %vm3164_vm2, %v3092_v53, 0  ;;  %v3173_v5 = vsel %vm3165_vm3, %v3093_v57, 0 }
 0x8f2   : > { %3180 = vst [vmem:[%s4319_s30 + $0x18] sm:$0xf] %v3172_v1  ;;  %3181 = vst [vmem:[%s4319_s30 + $0x1c] sm:$0xf] %v3173_v5 }
 0x8f3   : > { %3998 = shalt.err (!%p3995_p0)
}
 0x8f4   : > { %s3999_s30 = scalar_lea.hbm %s5246_s13, 512  ;;  %s4003_s7 = scalar_lea.hbm %s5321_s5, 1024 }
 0x8f5   : > { %p4000_p4 = scmp.ne.s32.totalorder %s5246_s13, %s3999_s30  ;;  %p4004_p7 = scmp.lt.u32.totalorder %s5246_s13, %s5321_s5 }
 0x8f6   : > { %p4005_p2 = scmp.lt.u32.totalorder %s4003_s7, %s3999_s30  ;;  %p4007_p12 = scmp.lt.u32.totalorder %s3999_s30, %s5246_s13 }
 0x8f7   : > { %p4001_p13 = pnand %p4000_p4, %p5360_p1 }
 0x8f8   : > { %p4006_p8 = por %p4005_p2, %p4004_p7 }
 0x8f9   : > { %p4002_p6 = pneg %p4001_p13 }
 0x8fa   : > { %p4008_p10 = por %p4007_p12, %p4006_p8 }
 0x8fc   : > { %p4009_p3 = pnand %p4008_p10, %p4002_p6 }
 0x8fe   : > { %4012 = shalt.err (!%p4009_p3)
}
 0x8ff   : > { %s4084_s21 = smov 64   ;;  %s4085_s10 = smov 128  }
 0x900   : > { %s4086_s17 = smov 4  }
 0x901   : > { %3553 = dma.vmem_to_hbm [thread:$0]  (%p5360_p1), %s5258_s14, 512, %s5246_s13, %s3183_s25, %s4084_s21, %s4085_s10, %s4086_s17  }
 0x902 PF: > { %s3213_s15 = sand.u32 1, %s4051_s18   ;;  %p5361_p5 = scmp.ne.s32.totalorder %s5329_s29, 0 }
 0x903   : > { %p5362_p9 = scmp.ge.s32.totalorder %s4071_s23, 2  ;;  %s3214_s27 = scalar_lea.sflag [#allocation7], %s3213_s15 }
 0x905   : > { %p3567_p11 = pnand %p5362_p9, %p5361_p5 }
 0x907   : > { %4046 = dma.done.wait (!%p3567_p11), %s3214_s27, 512  }
 0x908   : > { %4048 = vsyncadd (!%p3567_p11), %s3214_s27, 4294966784  ;;  %s22_s23 = sadd.s32 1, %s4071_s23   ;;  %s5363_s18 = smov %s4055_s19 }
 0x909   : > { %p19_p0 = scmp.ge.s32.totalorder %s22_s23, 4   ;;  %s5364_s19 = smov %s4059_s20 }
 0x90a   : > { %s5365_s20 = smov %s4259_s6  ;;  %s5366_s21 = smov %s4067_s22 }
 0x90b   : > { %s5367_s22 = smov %s5369_s12  ;;  %21 = sbr.rel (!%p19_p0) target bundleno = 7 (0x7), region = 100 }
 0x912   :  { %3219 = vsyncpa [#allocation6], 1 }
 0x913   :  { %3221 = vsyncpa [#allocation6 + $0x1], 1 }
 0x914   :  { %3222 = vsyncpa [#allocation9], 1 }
 0x915   :  { %3223 = vsyncpa [#allocation7], 1 }
 0x916   :  { %3225 = vsyncpa [#allocation7 + $0x1], 1 }

</bundles_post_ra>
